<compile_context>
chip_gen: v6e
topology: v6e:2x2x1
jax: 0.10.0
libtpu: 0.0.40
codegen_flags: <defaults>
</compile_context>

<pallas_src>
import functools
import math

import jax
import jax.numpy as jnp
from jax import lax
from jax.experimental import pallas as pl
from jax.experimental.pallas import tpu as pltpu


def _layernorm(x, gamma, beta, eps=1e-6):
    # eps=1e-6 matches nn.LayerNorm(dim, eps=1e-06) in the reference module.
    mean = jnp.mean(x, axis=-1, keepdims=True)
    var = jnp.mean(jnp.square(x - mean), axis=-1, keepdims=True)
    inv = lax.rsqrt(var + eps)
    return (x - mean) * inv * gamma + beta


def transformer_kernel(
    x_ref,                              # (2, B_blk, S, D) f32; [0]=x2, [1]=x1
    g1_ref, b1_ref, g2_ref, b2_ref,     # (1, D) f32 LayerNorm params
    wqkv_ref, bqkv_ref,                 # (D, 3D) bf16 (q cols pre-scaled), (1, 3D) f32
    wo_ref, bo_ref,                     # (D, D) bf16, (1, D) f32
    w1_ref, bm1_ref,                    # (D, Hm) bf16, (1, Hm) f32
    w2_ref, bm2_ref,                    # (Hm, D) bf16, (1, D) f32
    y_ref,                              # (2, B_blk, S, D) f32; [0]=y1, [1]=y2
    *, n_heads,
):
    _, b_blk, S, D = x_ref.shape
    M = b_blk * S
    hd = D // n_heads

    # Flatten the batch block into the matmul M dimension (free reshape: only
    # leading dims are merged, lanes/sublanes untouched).
    x2 = x_ref[0].reshape(M, D)
    x1 = x_ref[1].reshape(M, D)

    # ---------------- attention branch: y2 = x2 + attn(norm1(x1)) ----------
    h1 = _layernorm(x1, g1_ref[...], b1_ref[...])

    # Fused QKV projection (M x D x 3D), bf16 in / f32 accumulate.  The
    # 1/sqrt(head_dim) scale is pre-folded into the q block of W_qkv / b_qkv.
    qkv = (jnp.dot(h1.astype(jnp.bfloat16), wqkv_ref[...],
                   preferred_element_type=jnp.float32) + bqkv_ref[...])
    qkv = qkv.astype(jnp.bfloat16)          # drop the f32 copy immediately

    # Aligned 128-lane slices + free row reshape to (B_blk, S, D).
    q = qkv[:, 0 * D:1 * D].reshape(b_blk, S, D)
    k = qkv[:, 1 * D:2 * D].reshape(b_blk, S, D)
    v = qkv[:, 2 * D:3 * D].reshape(b_blk, S, D)

    # Per-head attention (static, short loop; no stacks, no f32 copies).
    # NOTE: for S >= 128 the score tiles are already lane-dense; at S=64 they
    # run at 50% lane occupancy (acceptable for the toy shape).
    ctx_heads = []
    for h in range(n_heads):
        lo, hi = h * hd, (h + 1) * hd
        qh = q[:, :, lo:hi]                 # (B_blk, S, hd) bf16, pre-scaled
        kh = k[:, :, lo:hi]
        vh = v[:, :, lo:hi]
        s = jnp.einsum("bqd,bkd->bqk", qh, kh,
                       preferred_element_type=jnp.float32)       # (B_blk, S, S)
        s = s - jnp.max(s, axis=-1, keepdims=True)
        p = jnp.exp(s)
        p = p / jnp.sum(p, axis=-1, keepdims=True)               # exact softmax
        ctx_h = jnp.einsum("bqk,bkd->bqd", p.astype(jnp.bfloat16), vh,
                           preferred_element_type=jnp.float32)   # (B_blk, S, hd)
        ctx_heads.append(ctx_h.astype(jnp.bfloat16).reshape(M, hd))

    # One lane concatenate, then a single K=128 output projection.
    ctx = jnp.concatenate(ctx_heads, axis=-1)                    # (M, D) bf16
    attn_out = jnp.dot(ctx, wo_ref[...],
                       preferred_element_type=jnp.float32) + bo_ref[...]

    y2 = x2 + attn_out

    # ---------------- MLP branch: y1 = x1 + mlp(norm2(y2)) -----------------
    h2 = _layernorm(y2, g2_ref[...], b2_ref[...])
    hid = jnp.dot(h2.astype(jnp.bfloat16), w1_ref[...],
                  preferred_element_type=jnp.float32) + bm1_ref[...]
    hid = jax.nn.gelu(hid, approximate=True)
    mlp_out = jnp.dot(hid.astype(jnp.bfloat16), w2_ref[...],
                      preferred_element_type=jnp.float32) + bm2_ref[...]
    y1 = x1 + mlp_out

    y_ref[0] = y1.reshape(b_blk, S, D)
    y_ref[1] = y2.reshape(b_blk, S, D)


def _pick_b_blk(B, S):
    """Batch elements per grid step.

    Keep >= 2 grid steps whenever B allows (uses both v7x TensorCores and
    enables DMA/compute overlap on every generation) while targeting
    M = B_blk*S around 512 rows for real batch sizes.  Per-step VMEM stays
    tiny at these D/Hm, well under the v7x 64 MiB budget.
    """
    target = max(1, 512 // S)
    b_blk = min(target, max(1, B // 2)) if B >= 2 else 1
    while B % b_blk:
        b_blk -= 1
    return b_blk


def prepare_params(params, *, n_heads):
    """One-time weight prep (hoisted out of the per-call hot path).

    Folds the 1/sqrt(head_dim) attention scale into the q block of
    W_qkv / b_qkv and casts all MXU weights to bf16 (f32 accumulation happens
    inside the kernel).  Call once and reuse the result.
    """
    D = params["wqkv"].shape[0]
    hd = D // n_heads
    scale = 1.0 / math.sqrt(hd)
    q_scale = jnp.concatenate(
        [jnp.full((1, D), scale, jnp.float32), jnp.ones((1, 2 * D), jnp.float32)],
        axis=1)
    return {
        "g1": params["g1"].astype(jnp.float32),
        "b1": params["b1"].astype(jnp.float32),
        "g2": params["g2"].astype(jnp.float32),
        "b2": params["b2"].astype(jnp.float32),
        "wqkv": (params["wqkv"] * q_scale).astype(jnp.bfloat16),
        "bqkv": (params["bqkv"] * q_scale).astype(jnp.float32),
        "wo": params["wo"].astype(jnp.bfloat16),
        "bo": params["bo"].astype(jnp.float32),
        "w1": params["w1"].astype(jnp.bfloat16),
        "bm1": params["bm1"].astype(jnp.float32),
        "w2": params["w2"].astype(jnp.bfloat16),
        "bm2": params["bm2"].astype(jnp.float32),
    }


def transformer_forward_cm(xc, prepped, *, n_heads):
    """Channel-major forward: xc (2, B, S, D) f32 -> (2, B, S, D) f32.

    Use this entry point directly when stacking reversible layers so the
    (B,S,D,2) <-> (2,B,S,D) relayout is paid only once at model entry/exit.
    xc[0]=x2, xc[1]=x1 (PyTorch `x2, x1 = x.chunk(2, -1)`); output
    yc[0]=y1, yc[1]=y2 (PyTorch `cat([y1, y2], -1)`).
    """
    _, B, S, D = xc.shape
    Hm = prepped["w1"].shape[1]

    B_blk = _pick_b_blk(B, S)
    n_blocks = B // B_blk

    # Constant-index weights/biases: single-buffered (no point double-buffering
    # blocks whose index_map never changes) -> frees VMEM headroom.
    def const_spec(shape):
        return pl.BlockSpec(shape, lambda i: (0, 0),
                            pipeline_mode=pl.Buffered(1))

    x_spec = pl.BlockSpec((2, B_blk, S, D), lambda i: (0, i, 0, 0))

    kernel = functools.partial(transformer_kernel, n_heads=n_heads)

    yc = pl.pallas_call(
        kernel,
        out_shape=jax.ShapeDtypeStruct((2, B, S, D), jnp.float32),
        grid_spec=pltpu.PrefetchScalarGridSpec(
            num_scalar_prefetch=0,
            grid=(n_blocks,),
            in_specs=[
                x_spec,                       # x (channel-major), double-buffered
                const_spec((1, D)),           # ln1 gamma
                const_spec((1, D)),           # ln1 beta
                const_spec((1, D)),           # ln2 gamma
                const_spec((1, D)),           # ln2 beta
                const_spec((D, 3 * D)),       # W_qkv (bf16, q cols pre-scaled)
                const_spec((1, 3 * D)),       # b_qkv (f32, q part pre-scaled)
                const_spec((D, D)),           # W_o   (bf16)
                const_spec((1, D)),           # b_o
                const_spec((D, Hm)),          # W_mlp1 (bf16)
                const_spec((1, Hm)),          # b_mlp1
                const_spec((Hm, D)),          # W_mlp2 (bf16)
                const_spec((1, D)),           # b_mlp2
            ],
            out_specs=x_spec,
        ),
        compiler_params=pltpu.CompilerParams(
            dimension_semantics=("parallel",),
            vmem_limit_bytes=32 * 1024 * 1024,
        ),
    )(
        xc,
        prepped["g1"], prepped["b1"], prepped["g2"], prepped["b2"],
        prepped["wqkv"], prepped["bqkv"], prepped["wo"], prepped["bo"],
        prepped["w1"], prepped["bm1"], prepped["w2"], prepped["bm2"],
    )
    return yc


@functools.partial(jax.jit, static_argnames=("n_heads",))
def transformer_forward(x, prepped, *, n_heads):
    """PyTorch-convention forward: x (B, S, D, 2) f32 -> (B, S, D, 2) f32."""
    xc = jnp.moveaxis(x, -1, 0)                       # [0]=x2, [1]=x1
    yc = transformer_forward_cm(xc, prepped, n_heads=n_heads)
    return jnp.moveaxis(yc, 0, -1)                    # [...,0]=y1, [...,1]=y2


def make_params(key, dim, hidden, dtype=jnp.float32):
    ks = jax.random.split(key, 8)
    s = 0.02
    return {
        "g1":   jnp.ones((1, dim), dtype),
        "b1":   jnp.zeros((1, dim), dtype),
        "g2":   jnp.ones((1, dim), dtype),
        "b2":   jnp.zeros((1, dim), dtype),
        "wqkv": s * jax.random.normal(ks[0], (dim, 3 * dim), dtype),
        "bqkv": s * jax.random.normal(ks[1], (1, 3 * dim), dtype),
        "wo":   s * jax.random.normal(ks[2], (dim, dim), dtype),
        "bo":   s * jax.random.normal(ks[3], (1, dim), dtype),
        "w1":   s * jax.random.normal(ks[4], (dim, hidden), dtype),
        "bm1":  s * jax.random.normal(ks[5], (1, hidden), dtype),
        "w2":   s * jax.random.normal(ks[6], (hidden, dim), dtype),
        "bm2":  s * jax.random.normal(ks[7], (1, dim), dtype),
    }


if __name__ == "__main__":
    # Small shapes consistent with the module: batch=2, n_heads=4,
    # n_patches=64, dim=128, mlp_ratio=4.0 -> hidden=512.
    B, S, D, n_heads = 2, 64, 128, 4
    hidden = int(D * 4.0)

    key = jax.random.PRNGKey(0)
    kx, kp = jax.random.split(key)
    x = jax.random.normal(kx, (B, S, D, 2), jnp.float32)
    params = make_params(kp, D, hidden)

    # Weight prep happens exactly once, outside the per-call hot path.
    prepped = prepare_params(params, n_heads=n_heads)

    out = transformer_forward(x, prepped, n_heads=n_heads)
    jax.block_until_ready(out)
    assert out.shape == (B, S, D, 2) and out.dtype == jnp.float32
    assert bool(jnp.all(jnp.isfinite(out)))
    print("KERNEL_OK")
</pallas_src>

<mosaic_0001>
module attributes {stable_mosaic.version = 11 : i64} {
  func.func @transformer_kernel(%arg0: i32, %arg1: memref<2x1x64x128xf32, #tpu.memory_space<vmem>>, %arg2: memref<1x128xf32, #tpu.memory_space<vmem>>, %arg3: memref<1x128xf32, #tpu.memory_space<vmem>>, %arg4: memref<1x128xf32, #tpu.memory_space<vmem>>, %arg5: memref<1x128xf32, #tpu.memory_space<vmem>>, %arg6: memref<128x384xbf16, #tpu.memory_space<vmem>>, %arg7: memref<1x384xf32, #tpu.memory_space<vmem>>, %arg8: memref<128x128xbf16, #tpu.memory_space<vmem>>, %arg9: memref<1x128xf32, #tpu.memory_space<vmem>>, %arg10: memref<128x512xbf16, #tpu.memory_space<vmem>>, %arg11: memref<1x512xf32, #tpu.memory_space<vmem>>, %arg12: memref<512x128xbf16, #tpu.memory_space<vmem>>, %arg13: memref<1x128xf32, #tpu.memory_space<vmem>>, %arg14: memref<2x1x64x128xf32, #tpu.memory_space<vmem>>) attributes {dimension_semantics = [#tpu.dimension_semantics<parallel>], iteration_bounds = array<i64: 2>, scalar_prefetch = 0 : i64, scratch_operands = 0 : i64, tpu.core_type = #tpu.core_type<tc>, window_params = [{transform_indices = @transform_0, window_bounds = array<i64: 2, 1, 64, 128>}, {pipeline_mode = #tpu.pipeline_mode<synchronous>, transform_indices = @transform_1, window_bounds = array<i64: 1, 128>}, {pipeline_mode = #tpu.pipeline_mode<synchronous>, transform_indices = @transform_2, window_bounds = array<i64: 1, 128>}, {pipeline_mode = #tpu.pipeline_mode<synchronous>, transform_indices = @transform_3, window_bounds = array<i64: 1, 128>}, {pipeline_mode = #tpu.pipeline_mode<synchronous>, transform_indices = @transform_4, window_bounds = array<i64: 1, 128>}, {pipeline_mode = #tpu.pipeline_mode<synchronous>, transform_indices = @transform_5, window_bounds = array<i64: 128, 384>}, {pipeline_mode = #tpu.pipeline_mode<synchronous>, transform_indices = @transform_6, window_bounds = array<i64: 1, 384>}, {pipeline_mode = #tpu.pipeline_mode<synchronous>, transform_indices = @transform_7, window_bounds = array<i64: 128, 128>}, {pipeline_mode = #tpu.pipeline_mode<synchronous>, transform_indices = @transform_8, window_bounds = array<i64: 1, 128>}, {pipeline_mode = #tpu.pipeline_mode<synchronous>, transform_indices = @transform_9, window_bounds = array<i64: 128, 512>}, {pipeline_mode = #tpu.pipeline_mode<synchronous>, transform_indices = @transform_10, window_bounds = array<i64: 1, 512>}, {pipeline_mode = #tpu.pipeline_mode<synchronous>, transform_indices = @transform_11, window_bounds = array<i64: 512, 128>}, {pipeline_mode = #tpu.pipeline_mode<synchronous>, transform_indices = @transform_12, window_bounds = array<i64: 1, 128>}, {transform_indices = @transform_13, window_bounds = array<i64: 2, 1, 64, 128>}]} {
    %c0 = arith.constant 0 : index
    %c0_0 = arith.constant 0 : index
    %c0_1 = arith.constant 0 : index
    %c0_2 = arith.constant 0 : index
    %0 = vector.load %arg1[%c0, %c0_0, %c0_1, %c0_2] : memref<2x1x64x128xf32, #tpu.memory_space<vmem>>, vector<1x1x64x128xf32>
    %1 = vector.shape_cast %0 : vector<1x1x64x128xf32> to vector<1x64x128xf32>
    %2 = vector.shape_cast %1 : vector<1x64x128xf32> to vector<64x128xf32>
    %c1 = arith.constant 1 : index
    %c0_3 = arith.constant 0 : index
    %c0_4 = arith.constant 0 : index
    %c0_5 = arith.constant 0 : index
    %3 = vector.load %arg1[%c1, %c0_3, %c0_4, %c0_5] : memref<2x1x64x128xf32, #tpu.memory_space<vmem>>, vector<1x1x64x128xf32>
    %4 = vector.shape_cast %3 : vector<1x1x64x128xf32> to vector<1x64x128xf32>
    %5 = vector.shape_cast %4 : vector<1x64x128xf32> to vector<64x128xf32>
    %c0_6 = arith.constant 0 : index
    %c0_7 = arith.constant 0 : index
    %6 = vector.load %arg2[%c0_6, %c0_7] : memref<1x128xf32, #tpu.memory_space<vmem>>, vector<1x128xf32>
    %c0_8 = arith.constant 0 : index
    %c0_9 = arith.constant 0 : index
    %7 = vector.load %arg3[%c0_8, %c0_9] : memref<1x128xf32, #tpu.memory_space<vmem>>, vector<1x128xf32>
    %cst = arith.constant dense<0.000000e+00> : vector<64xf32>
    %8 = vector.multi_reduction <add>, %5, %cst [1] : vector<64x128xf32> to vector<64xf32>
    %9 = vector.shape_cast %8 : vector<64xf32> to vector<64x1xf32>
    %cst_10 = arith.constant 1.280000e+02 : f32
    %10 = vector.broadcast %cst_10 : f32 to vector<64x1xf32>
    %11 = arith.divf %9, %10 : vector<64x1xf32>
    %12 = vector.broadcast %11 : vector<64x1xf32> to vector<64x128xf32>
    %13 = arith.subf %5, %12 : vector<64x128xf32>
    %14 = arith.mulf %13, %13 : vector<64x128xf32>
    %cst_11 = arith.constant dense<0.000000e+00> : vector<64xf32>
    %15 = vector.multi_reduction <add>, %14, %cst_11 [1] : vector<64x128xf32> to vector<64xf32>
    %16 = vector.shape_cast %15 : vector<64xf32> to vector<64x1xf32>
    %cst_12 = arith.constant 1.280000e+02 : f32
    %17 = vector.broadcast %cst_12 : f32 to vector<64x1xf32>
    %18 = arith.divf %16, %17 : vector<64x1xf32>
    %cst_13 = arith.constant 9.99999997E-7 : f32
    %19 = vector.broadcast %cst_13 : f32 to vector<64x1xf32>
    %20 = arith.addf %18, %19 : vector<64x1xf32>
    %21 = math.rsqrt %20 : vector<64x1xf32>
    %22 = vector.broadcast %11 : vector<64x1xf32> to vector<64x128xf32>
    %23 = arith.subf %5, %22 : vector<64x128xf32>
    %24 = vector.broadcast %21 : vector<64x1xf32> to vector<64x128xf32>
    %25 = arith.mulf %23, %24 : vector<64x128xf32>
    %26 = vector.broadcast %6 : vector<1x128xf32> to vector<64x128xf32>
    %27 = arith.mulf %25, %26 : vector<64x128xf32>
    %28 = vector.broadcast %7 : vector<1x128xf32> to vector<64x128xf32>
    %29 = arith.addf %27, %28 : vector<64x128xf32>
    %30 = arith.truncf %29 : vector<64x128xf32> to vector<64x128xbf16>
    %c0_14 = arith.constant 0 : index
    %c0_15 = arith.constant 0 : index
    %31 = vector.load %arg6[%c0_14, %c0_15] : memref<128x384xbf16, #tpu.memory_space<vmem>>, vector<128x384xbf16>
    %cst_16 = arith.constant dense<0.000000e+00> : vector<64x384xf32>
    %32 = tpu.matmul %30, %31, %cst_16 {dimension_numbers = #tpu.dot_dimension_numbers<[1], [0], [0], [1], [0, 0, 1, 1], [], []>} : vector<64x128xbf16>, vector<128x384xbf16>, vector<64x384xf32> -> vector<64x384xf32>
    %c0_17 = arith.constant 0 : index
    %c0_18 = arith.constant 0 : index
    %33 = vector.load %arg7[%c0_17, %c0_18] : memref<1x384xf32, #tpu.memory_space<vmem>>, vector<1x384xf32>
    %34 = vector.broadcast %33 : vector<1x384xf32> to vector<64x384xf32>
    %35 = arith.addf %32, %34 : vector<64x384xf32>
    %36 = arith.truncf %35 : vector<64x384xf32> to vector<64x384xbf16>
    %37 = vector.extract_strided_slice %36 {offsets = [0, 0], sizes = [64, 128], strides = [1, 1]} : vector<64x384xbf16> to vector<64x128xbf16>
    %38 = vector.shape_cast %37 : vector<64x128xbf16> to vector<1x64x128xbf16>
    %39 = vector.extract_strided_slice %36 {offsets = [0, 128], sizes = [64, 128], strides = [1, 1]} : vector<64x384xbf16> to vector<64x128xbf16>
    %40 = vector.shape_cast %39 : vector<64x128xbf16> to vector<1x64x128xbf16>
    %41 = vector.extract_strided_slice %36 {offsets = [0, 256], sizes = [64, 128], strides = [1, 1]} : vector<64x384xbf16> to vector<64x128xbf16>
    %42 = vector.shape_cast %41 : vector<64x128xbf16> to vector<1x64x128xbf16>
    %43 = vector.extract_strided_slice %38 {offsets = [0, 0, 0], sizes = [1, 64, 32], strides = [1, 1, 1]} : vector<1x64x128xbf16> to vector<1x64x32xbf16>
    %44 = vector.extract_strided_slice %40 {offsets = [0, 0, 0], sizes = [1, 64, 32], strides = [1, 1, 1]} : vector<1x64x128xbf16> to vector<1x64x32xbf16>
    %45 = vector.extract_strided_slice %42 {offsets = [0, 0, 0], sizes = [1, 64, 32], strides = [1, 1, 1]} : vector<1x64x128xbf16> to vector<1x64x32xbf16>
    "tpu.trace_start"() <{level = 10 : i32, message = "bqd,bkd->bqk"}> : () -> ()
    %cst_19 = arith.constant dense<0.000000e+00> : vector<1x64x64xf32>
    %46 = tpu.matmul %43, %44, %cst_19 {dimension_numbers = #tpu.dot_dimension_numbers<[2], [2], [1], [1], [0, 0, 0, 1, 1, 1], [0], [0]>} : vector<1x64x32xbf16>, vector<1x64x32xbf16>, vector<1x64x64xf32> -> vector<1x64x64xf32>
    "tpu.trace_stop"() : () -> ()
    %cst_20 = arith.constant dense<0xFF800000> : vector<1x64xf32>
    %47 = vector.multi_reduction <maximumf>, %46, %cst_20 [2] : vector<1x64x64xf32> to vector<1x64xf32>
    %48 = vector.shape_cast %47 : vector<1x64xf32> to vector<1x64x1xf32>
    %49 = vector.broadcast %48 : vector<1x64x1xf32> to vector<1x64x64xf32>
    %50 = arith.subf %46, %49 : vector<1x64x64xf32>
    %51 = math.exp %50 : vector<1x64x64xf32>
    %cst_21 = arith.constant dense<0.000000e+00> : vector<1x64xf32>
    %52 = vector.multi_reduction <add>, %51, %cst_21 [2] : vector<1x64x64xf32> to vector<1x64xf32>
    %53 = vector.shape_cast %52 : vector<1x64xf32> to vector<1x64x1xf32>
    %54 = vector.broadcast %53 : vector<1x64x1xf32> to vector<1x64x64xf32>
    %55 = arith.divf %51, %54 : vector<1x64x64xf32>
    %56 = arith.truncf %55 : vector<1x64x64xf32> to vector<1x64x64xbf16>
    "tpu.trace_start"() <{level = 10 : i32, message = "bqk,bkd->bqd"}> : () -> ()
    %cst_22 = arith.constant dense<0.000000e+00> : vector<1x64x32xf32>
    %57 = tpu.matmul %56, %45, %cst_22 {dimension_numbers = #tpu.dot_dimension_numbers<[2], [1], [1], [2], [0, 0, 0, 1, 1, 2], [0], [0]>} : vector<1x64x64xbf16>, vector<1x64x32xbf16>, vector<1x64x32xf32> -> vector<1x64x32xf32>
    "tpu.trace_stop"() : () -> ()
    %58 = arith.truncf %57 : vector<1x64x32xf32> to vector<1x64x32xbf16>
    %59 = vector.shape_cast %58 : vector<1x64x32xbf16> to vector<64x32xbf16>
    %60 = vector.extract_strided_slice %38 {offsets = [0, 0, 32], sizes = [1, 64, 32], strides = [1, 1, 1]} : vector<1x64x128xbf16> to vector<1x64x32xbf16>
    %61 = vector.extract_strided_slice %40 {offsets = [0, 0, 32], sizes = [1, 64, 32], strides = [1, 1, 1]} : vector<1x64x128xbf16> to vector<1x64x32xbf16>
    %62 = vector.extract_strided_slice %42 {offsets = [0, 0, 32], sizes = [1, 64, 32], strides = [1, 1, 1]} : vector<1x64x128xbf16> to vector<1x64x32xbf16>
    "tpu.trace_start"() <{level = 10 : i32, message = "bqd,bkd->bqk"}> : () -> ()
    %cst_23 = arith.constant dense<0.000000e+00> : vector<1x64x64xf32>
    %63 = tpu.matmul %60, %61, %cst_23 {dimension_numbers = #tpu.dot_dimension_numbers<[2], [2], [1], [1], [0, 0, 0, 1, 1, 1], [0], [0]>} : vector<1x64x32xbf16>, vector<1x64x32xbf16>, vector<1x64x64xf32> -> vector<1x64x64xf32>
    "tpu.trace_stop"() : () -> ()
    %cst_24 = arith.constant dense<0xFF800000> : vector<1x64xf32>
    %64 = vector.multi_reduction <maximumf>, %63, %cst_24 [2] : vector<1x64x64xf32> to vector<1x64xf32>
    %65 = vector.shape_cast %64 : vector<1x64xf32> to vector<1x64x1xf32>
    %66 = vector.broadcast %65 : vector<1x64x1xf32> to vector<1x64x64xf32>
    %67 = arith.subf %63, %66 : vector<1x64x64xf32>
    %68 = math.exp %67 : vector<1x64x64xf32>
    %cst_25 = arith.constant dense<0.000000e+00> : vector<1x64xf32>
    %69 = vector.multi_reduction <add>, %68, %cst_25 [2] : vector<1x64x64xf32> to vector<1x64xf32>
    %70 = vector.shape_cast %69 : vector<1x64xf32> to vector<1x64x1xf32>
    %71 = vector.broadcast %70 : vector<1x64x1xf32> to vector<1x64x64xf32>
    %72 = arith.divf %68, %71 : vector<1x64x64xf32>
    %73 = arith.truncf %72 : vector<1x64x64xf32> to vector<1x64x64xbf16>
    "tpu.trace_start"() <{level = 10 : i32, message = "bqk,bkd->bqd"}> : () -> ()
    %cst_26 = arith.constant dense<0.000000e+00> : vector<1x64x32xf32>
    %74 = tpu.matmul %73, %62, %cst_26 {dimension_numbers = #tpu.dot_dimension_numbers<[2], [1], [1], [2], [0, 0, 0, 1, 1, 2], [0], [0]>} : vector<1x64x64xbf16>, vector<1x64x32xbf16>, vector<1x64x32xf32> -> vector<1x64x32xf32>
    "tpu.trace_stop"() : () -> ()
    %75 = arith.truncf %74 : vector<1x64x32xf32> to vector<1x64x32xbf16>
    %76 = vector.shape_cast %75 : vector<1x64x32xbf16> to vector<64x32xbf16>
    %77 = vector.extract_strided_slice %38 {offsets = [0, 0, 64], sizes = [1, 64, 32], strides = [1, 1, 1]} : vector<1x64x128xbf16> to vector<1x64x32xbf16>
    %78 = vector.extract_strided_slice %40 {offsets = [0, 0, 64], sizes = [1, 64, 32], strides = [1, 1, 1]} : vector<1x64x128xbf16> to vector<1x64x32xbf16>
    %79 = vector.extract_strided_slice %42 {offsets = [0, 0, 64], sizes = [1, 64, 32], strides = [1, 1, 1]} : vector<1x64x128xbf16> to vector<1x64x32xbf16>
    "tpu.trace_start"() <{level = 10 : i32, message = "bqd,bkd->bqk"}> : () -> ()
    %cst_27 = arith.constant dense<0.000000e+00> : vector<1x64x64xf32>
    %80 = tpu.matmul %77, %78, %cst_27 {dimension_numbers = #tpu.dot_dimension_numbers<[2], [2], [1], [1], [0, 0, 0, 1, 1, 1], [0], [0]>} : vector<1x64x32xbf16>, vector<1x64x32xbf16>, vector<1x64x64xf32> -> vector<1x64x64xf32>
    "tpu.trace_stop"() : () -> ()
    %cst_28 = arith.constant dense<0xFF800000> : vector<1x64xf32>
    %81 = vector.multi_reduction <maximumf>, %80, %cst_28 [2] : vector<1x64x64xf32> to vector<1x64xf32>
    %82 = vector.shape_cast %81 : vector<1x64xf32> to vector<1x64x1xf32>
    %83 = vector.broadcast %82 : vector<1x64x1xf32> to vector<1x64x64xf32>
    %84 = arith.subf %80, %83 : vector<1x64x64xf32>
    %85 = math.exp %84 : vector<1x64x64xf32>
    %cst_29 = arith.constant dense<0.000000e+00> : vector<1x64xf32>
    %86 = vector.multi_reduction <add>, %85, %cst_29 [2] : vector<1x64x64xf32> to vector<1x64xf32>
    %87 = vector.shape_cast %86 : vector<1x64xf32> to vector<1x64x1xf32>
    %88 = vector.broadcast %87 : vector<1x64x1xf32> to vector<1x64x64xf32>
    %89 = arith.divf %85, %88 : vector<1x64x64xf32>
    %90 = arith.truncf %89 : vector<1x64x64xf32> to vector<1x64x64xbf16>
    "tpu.trace_start"() <{level = 10 : i32, message = "bqk,bkd->bqd"}> : () -> ()
    %cst_30 = arith.constant dense<0.000000e+00> : vector<1x64x32xf32>
    %91 = tpu.matmul %90, %79, %cst_30 {dimension_numbers = #tpu.dot_dimension_numbers<[2], [1], [1], [2], [0, 0, 0, 1, 1, 2], [0], [0]>} : vector<1x64x64xbf16>, vector<1x64x32xbf16>, vector<1x64x32xf32> -> vector<1x64x32xf32>
    "tpu.trace_stop"() : () -> ()
    %92 = arith.truncf %91 : vector<1x64x32xf32> to vector<1x64x32xbf16>
    %93 = vector.shape_cast %92 : vector<1x64x32xbf16> to vector<64x32xbf16>
    %94 = vector.extract_strided_slice %38 {offsets = [0, 0, 96], sizes = [1, 64, 32], strides = [1, 1, 1]} : vector<1x64x128xbf16> to vector<1x64x32xbf16>
    %95 = vector.extract_strided_slice %40 {offsets = [0, 0, 96], sizes = [1, 64, 32], strides = [1, 1, 1]} : vector<1x64x128xbf16> to vector<1x64x32xbf16>
    %96 = vector.extract_strided_slice %42 {offsets = [0, 0, 96], sizes = [1, 64, 32], strides = [1, 1, 1]} : vector<1x64x128xbf16> to vector<1x64x32xbf16>
    "tpu.trace_start"() <{level = 10 : i32, message = "bqd,bkd->bqk"}> : () -> ()
    %cst_31 = arith.constant dense<0.000000e+00> : vector<1x64x64xf32>
    %97 = tpu.matmul %94, %95, %cst_31 {dimension_numbers = #tpu.dot_dimension_numbers<[2], [2], [1], [1], [0, 0, 0, 1, 1, 1], [0], [0]>} : vector<1x64x32xbf16>, vector<1x64x32xbf16>, vector<1x64x64xf32> -> vector<1x64x64xf32>
    "tpu.trace_stop"() : () -> ()
    %cst_32 = arith.constant dense<0xFF800000> : vector<1x64xf32>
    %98 = vector.multi_reduction <maximumf>, %97, %cst_32 [2] : vector<1x64x64xf32> to vector<1x64xf32>
    %99 = vector.shape_cast %98 : vector<1x64xf32> to vector<1x64x1xf32>
    %100 = vector.broadcast %99 : vector<1x64x1xf32> to vector<1x64x64xf32>
    %101 = arith.subf %97, %100 : vector<1x64x64xf32>
    %102 = math.exp %101 : vector<1x64x64xf32>
    %cst_33 = arith.constant dense<0.000000e+00> : vector<1x64xf32>
    %103 = vector.multi_reduction <add>, %102, %cst_33 [2] : vector<1x64x64xf32> to vector<1x64xf32>
    %104 = vector.shape_cast %103 : vector<1x64xf32> to vector<1x64x1xf32>
    %105 = vector.broadcast %104 : vector<1x64x1xf32> to vector<1x64x64xf32>
    %106 = arith.divf %102, %105 : vector<1x64x64xf32>
    %107 = arith.truncf %106 : vector<1x64x64xf32> to vector<1x64x64xbf16>
    "tpu.trace_start"() <{level = 10 : i32, message = "bqk,bkd->bqd"}> : () -> ()
    %cst_34 = arith.constant dense<0.000000e+00> : vector<1x64x32xf32>
    %108 = tpu.matmul %107, %96, %cst_34 {dimension_numbers = #tpu.dot_dimension_numbers<[2], [1], [1], [2], [0, 0, 0, 1, 1, 2], [0], [0]>} : vector<1x64x64xbf16>, vector<1x64x32xbf16>, vector<1x64x32xf32> -> vector<1x64x32xf32>
    "tpu.trace_stop"() : () -> ()
    %109 = arith.truncf %108 : vector<1x64x32xf32> to vector<1x64x32xbf16>
    %110 = vector.shape_cast %109 : vector<1x64x32xbf16> to vector<64x32xbf16>
    %111 = tpu.concatenate %59, %76, %93, %110 in 1 : vector<64x32xbf16>, vector<64x32xbf16>, vector<64x32xbf16>, vector<64x32xbf16> -> vector<64x128xbf16>
    %c0_35 = arith.constant 0 : index
    %c0_36 = arith.constant 0 : index
    %112 = vector.load %arg8[%c0_35, %c0_36] : memref<128x128xbf16, #tpu.memory_space<vmem>>, vector<128x128xbf16>
    %cst_37 = arith.constant dense<0.000000e+00> : vector<64x128xf32>
    %113 = tpu.matmul %111, %112, %cst_37 {dimension_numbers = #tpu.dot_dimension_numbers<[1], [0], [0], [1], [0, 0, 1, 1], [], []>} : vector<64x128xbf16>, vector<128x128xbf16>, vector<64x128xf32> -> vector<64x128xf32>
    %c0_38 = arith.constant 0 : index
    %c0_39 = arith.constant 0 : index
    %114 = vector.load %arg9[%c0_38, %c0_39] : memref<1x128xf32, #tpu.memory_space<vmem>>, vector<1x128xf32>
    %115 = vector.broadcast %114 : vector<1x128xf32> to vector<64x128xf32>
    %116 = arith.addf %113, %115 : vector<64x128xf32>
    %117 = arith.addf %2, %116 : vector<64x128xf32>
    %c0_40 = arith.constant 0 : index
    %c0_41 = arith.constant 0 : index
    %118 = vector.load %arg4[%c0_40, %c0_41] : memref<1x128xf32, #tpu.memory_space<vmem>>, vector<1x128xf32>
    %c0_42 = arith.constant 0 : index
    %c0_43 = arith.constant 0 : index
    %119 = vector.load %arg5[%c0_42, %c0_43] : memref<1x128xf32, #tpu.memory_space<vmem>>, vector<1x128xf32>
    %cst_44 = arith.constant dense<0.000000e+00> : vector<64xf32>
    %120 = vector.multi_reduction <add>, %117, %cst_44 [1] : vector<64x128xf32> to vector<64xf32>
    %121 = vector.shape_cast %120 : vector<64xf32> to vector<64x1xf32>
    %cst_45 = arith.constant 1.280000e+02 : f32
    %122 = vector.broadcast %cst_45 : f32 to vector<64x1xf32>
    %123 = arith.divf %121, %122 : vector<64x1xf32>
    %124 = vector.broadcast %123 : vector<64x1xf32> to vector<64x128xf32>
    %125 = arith.subf %117, %124 : vector<64x128xf32>
    %126 = arith.mulf %125, %125 : vector<64x128xf32>
    %cst_46 = arith.constant dense<0.000000e+00> : vector<64xf32>
    %127 = vector.multi_reduction <add>, %126, %cst_46 [1] : vector<64x128xf32> to vector<64xf32>
    %128 = vector.shape_cast %127 : vector<64xf32> to vector<64x1xf32>
    %cst_47 = arith.constant 1.280000e+02 : f32
    %129 = vector.broadcast %cst_47 : f32 to vector<64x1xf32>
    %130 = arith.divf %128, %129 : vector<64x1xf32>
    %cst_48 = arith.constant 9.99999997E-7 : f32
    %131 = vector.broadcast %cst_48 : f32 to vector<64x1xf32>
    %132 = arith.addf %130, %131 : vector<64x1xf32>
    %133 = math.rsqrt %132 : vector<64x1xf32>
    %134 = vector.broadcast %123 : vector<64x1xf32> to vector<64x128xf32>
    %135 = arith.subf %117, %134 : vector<64x128xf32>
    %136 = vector.broadcast %133 : vector<64x1xf32> to vector<64x128xf32>
    %137 = arith.mulf %135, %136 : vector<64x128xf32>
    %138 = vector.broadcast %118 : vector<1x128xf32> to vector<64x128xf32>
    %139 = arith.mulf %137, %138 : vector<64x128xf32>
    %140 = vector.broadcast %119 : vector<1x128xf32> to vector<64x128xf32>
    %141 = arith.addf %139, %140 : vector<64x128xf32>
    %142 = arith.truncf %141 : vector<64x128xf32> to vector<64x128xbf16>
    %c0_49 = arith.constant 0 : index
    %c0_50 = arith.constant 0 : index
    %143 = vector.load %arg10[%c0_49, %c0_50] : memref<128x512xbf16, #tpu.memory_space<vmem>>, vector<128x512xbf16>
    %cst_51 = arith.constant dense<0.000000e+00> : vector<64x512xf32>
    %144 = tpu.matmul %142, %143, %cst_51 {dimension_numbers = #tpu.dot_dimension_numbers<[1], [0], [0], [1], [0, 0, 1, 1], [], []>} : vector<64x128xbf16>, vector<128x512xbf16>, vector<64x512xf32> -> vector<64x512xf32>
    %c0_52 = arith.constant 0 : index
    %c0_53 = arith.constant 0 : index
    %145 = vector.load %arg11[%c0_52, %c0_53] : memref<1x512xf32, #tpu.memory_space<vmem>>, vector<1x512xf32>
    %146 = vector.broadcast %145 : vector<1x512xf32> to vector<64x512xf32>
    %147 = arith.addf %144, %146 : vector<64x512xf32>
    %148 = arith.mulf %147, %147 : vector<64x512xf32>
    %149 = arith.mulf %147, %148 : vector<64x512xf32>
    %cst_54 = arith.constant 4.471500e-02 : f32
    %150 = vector.broadcast %cst_54 : f32 to vector<64x512xf32>
    %151 = arith.mulf %150, %149 : vector<64x512xf32>
    %152 = arith.addf %147, %151 : vector<64x512xf32>
    %cst_55 = arith.constant 0.797884583 : f32
    %153 = vector.broadcast %cst_55 : f32 to vector<64x512xf32>
    %154 = arith.mulf %153, %152 : vector<64x512xf32>
    %155 = math.tanh %154 : vector<64x512xf32>
    %cst_56 = arith.constant 1.000000e+00 : f32
    %156 = vector.broadcast %cst_56 : f32 to vector<64x512xf32>
    %157 = arith.addf %156, %155 : vector<64x512xf32>
    %cst_57 = arith.constant 5.000000e-01 : f32
    %158 = vector.broadcast %cst_57 : f32 to vector<64x512xf32>
    %159 = arith.mulf %158, %157 : vector<64x512xf32>
    %160 = arith.mulf %147, %159 : vector<64x512xf32>
    %161 = arith.truncf %160 : vector<64x512xf32> to vector<64x512xbf16>
    %c0_58 = arith.constant 0 : index
    %c0_59 = arith.constant 0 : index
    %162 = vector.load %arg12[%c0_58, %c0_59] : memref<512x128xbf16, #tpu.memory_space<vmem>>, vector<512x128xbf16>
    %cst_60 = arith.constant dense<0.000000e+00> : vector<64x128xf32>
    %163 = tpu.matmul %161, %162, %cst_60 {dimension_numbers = #tpu.dot_dimension_numbers<[1], [0], [0], [1], [0, 0, 1, 1], [], []>} : vector<64x512xbf16>, vector<512x128xbf16>, vector<64x128xf32> -> vector<64x128xf32>
    %c0_61 = arith.constant 0 : index
    %c0_62 = arith.constant 0 : index
    %164 = vector.load %arg13[%c0_61, %c0_62] : memref<1x128xf32, #tpu.memory_space<vmem>>, vector<1x128xf32>
    %165 = vector.broadcast %164 : vector<1x128xf32> to vector<64x128xf32>
    %166 = arith.addf %163, %165 : vector<64x128xf32>
    %167 = arith.addf %5, %166 : vector<64x128xf32>
    %168 = vector.shape_cast %167 : vector<64x128xf32> to vector<1x64x128xf32>
    %c0_63 = arith.constant 0 : index
    %c0_64 = arith.constant 0 : index
    %c0_65 = arith.constant 0 : index
    %c0_66 = arith.constant 0 : index
    %169 = vector.load %arg14[%c0_63, %c0_64, %c0_65, %c0_66] : memref<2x1x64x128xf32, #tpu.memory_space<vmem>>, vector<1x1x64x128xf32>
    %170 = vector.shape_cast %169 : vector<1x1x64x128xf32> to vector<1x64x128xf32>
    %171 = vector.shape_cast %168 : vector<1x64x128xf32> to vector<1x1x64x128xf32>
    tpu.vector_store %arg14[%c0_63, %c0_64, %c0_65, %c0_66], %171 {strides = array<i32>} : memref<2x1x64x128xf32, #tpu.memory_space<vmem>>, vector<1x1x64x128xf32>,
    %172 = vector.shape_cast %117 : vector<64x128xf32> to vector<1x64x128xf32>
    %c1_67 = arith.constant 1 : index
    %c0_68 = arith.constant 0 : index
    %c0_69 = arith.constant 0 : index
    %c0_70 = arith.constant 0 : index
    %173 = vector.load %arg14[%c1_67, %c0_68, %c0_69, %c0_70] : memref<2x1x64x128xf32, #tpu.memory_space<vmem>>, vector<1x1x64x128xf32>
    %174 = vector.shape_cast %173 : vector<1x1x64x128xf32> to vector<1x64x128xf32>
    %175 = vector.shape_cast %172 : vector<1x64x128xf32> to vector<1x1x64x128xf32>
    tpu.vector_store %arg14[%c1_67, %c0_68, %c0_69, %c0_70], %175 {strides = array<i32>} : memref<2x1x64x128xf32, #tpu.memory_space<vmem>>, vector<1x1x64x128xf32>,
    return
  }
  func.func @transform_0(%arg0: i32) -> (i32, i32, i32, i32) {
    %c0_i32 = arith.constant 0 : i32
    %c0_i32_0 = arith.constant 0 : i32
    %c0_i32_1 = arith.constant 0 : i32
    %c0_i32_2 = arith.constant 0 : i32
    return %c0_i32, %arg0, %c0_i32_0, %c0_i32_1 : i32, i32, i32, i32
  }
  func.func @transform_1(%arg0: i32) -> (i32, i32) {
    %c0_i32 = arith.constant 0 : i32
    %c0_i32_0 = arith.constant 0 : i32
    %c0_i32_1 = arith.constant 0 : i32
    return %c0_i32, %c0_i32_0 : i32, i32
  }
  func.func @transform_2(%arg0: i32) -> (i32, i32) {
    %c0_i32 = arith.constant 0 : i32
    %c0_i32_0 = arith.constant 0 : i32
    %c0_i32_1 = arith.constant 0 : i32
    return %c0_i32, %c0_i32_0 : i32, i32
  }
  func.func @transform_3(%arg0: i32) -> (i32, i32) {
    %c0_i32 = arith.constant 0 : i32
    %c0_i32_0 = arith.constant 0 : i32
    %c0_i32_1 = arith.constant 0 : i32
    return %c0_i32, %c0_i32_0 : i32, i32
  }
  func.func @transform_4(%arg0: i32) -> (i32, i32) {
    %c0_i32 = arith.constant 0 : i32
    %c0_i32_0 = arith.constant 0 : i32
    %c0_i32_1 = arith.constant 0 : i32
    return %c0_i32, %c0_i32_0 : i32, i32
  }
  func.func @transform_5(%arg0: i32) -> (i32, i32) {
    %c0_i32 = arith.constant 0 : i32
    %c0_i32_0 = arith.constant 0 : i32
    %c0_i32_1 = arith.constant 0 : i32
    return %c0_i32, %c0_i32_0 : i32, i32
  }
  func.func @transform_6(%arg0: i32) -> (i32, i32) {
    %c0_i32 = arith.constant 0 : i32
    %c0_i32_0 = arith.constant 0 : i32
    %c0_i32_1 = arith.constant 0 : i32
    return %c0_i32, %c0_i32_0 : i32, i32
  }
  func.func @transform_7(%arg0: i32) -> (i32, i32) {
    %c0_i32 = arith.constant 0 : i32
    %c0_i32_0 = arith.constant 0 : i32
    %c0_i32_1 = arith.constant 0 : i32
    return %c0_i32, %c0_i32_0 : i32, i32
  }
  func.func @transform_8(%arg0: i32) -> (i32, i32) {
    %c0_i32 = arith.constant 0 : i32
    %c0_i32_0 = arith.constant 0 : i32
    %c0_i32_1 = arith.constant 0 : i32
    return %c0_i32, %c0_i32_0 : i32, i32
  }
  func.func @transform_9(%arg0: i32) -> (i32, i32) {
    %c0_i32 = arith.constant 0 : i32
    %c0_i32_0 = arith.constant 0 : i32
    %c0_i32_1 = arith.constant 0 : i32
    return %c0_i32, %c0_i32_0 : i32, i32
  }
  func.func @transform_10(%arg0: i32) -> (i32, i32) {
    %c0_i32 = arith.constant 0 : i32
    %c0_i32_0 = arith.constant 0 : i32
    %c0_i32_1 = arith.constant 0 : i32
    return %c0_i32, %c0_i32_0 : i32, i32
  }
  func.func @transform_11(%arg0: i32) -> (i32, i32) {
    %c0_i32 = arith.constant 0 : i32
    %c0_i32_0 = arith.constant 0 : i32
    %c0_i32_1 = arith.constant 0 : i32
    return %c0_i32, %c0_i32_0 : i32, i32
  }
  func.func @transform_12(%arg0: i32) -> (i32, i32) {
    %c0_i32 = arith.constant 0 : i32
    %c0_i32_0 = arith.constant 0 : i32
    %c0_i32_1 = arith.constant 0 : i32
    return %c0_i32, %c0_i32_0 : i32, i32
  }
  func.func @transform_13(%arg0: i32) -> (i32, i32, i32, i32) {
    %c0_i32 = arith.constant 0 : i32
    %c0_i32_0 = arith.constant 0 : i32
    %c0_i32_1 = arith.constant 0 : i32
    %c0_i32_2 = arith.constant 0 : i32
    return %c0_i32, %arg0, %c0_i32_0, %c0_i32_1 : i32, i32, i32, i32
  }
}

</mosaic_0001>

<bundles_post_ra>
// kernel: transformer_forward.1
= control target key start
LH: loop header
LB: loop body
LE: loop exit
PB: predicated region body
PF: predicated region fallthrough
CT: control target
= control target key end

     0   :  { %s6586_s0 = inlined_call_operand.vmem [shape: f32[2,2,64,128], index: 0, kind: input, shape index: {}]   ;;  %s6587_s1 = inlined_call_operand.vmem [shape: f32[1,128], index: 1, kind: input, shape index: {}]   ;;  %s6588_s2 = inlined_call_operand.hbm [shape: f32[1,128], index: 2, kind: input, shape index: {}]   ;;  %s6589_s3 = inlined_call_operand.vmem [shape: f32[1,128], index: 3, kind: input, shape index: {}]   ;;  %s6590_s4 = inlined_call_operand.hbm [shape: f32[1,128], index: 4, kind: input, shape index: {}]   ;;  %s6591_s5 = inlined_call_operand.hbm [shape: bf16[128,384], index: 5, kind: input, shape index: {}]   ;;  %s6592_s6 = inlined_call_operand.vmem [shape: f32[1,384], index: 6, kind: input, shape index: {}]   ;;  %s6593_s7 = inlined_call_operand.hbm [shape: bf16[128,128], index: 7, kind: input, shape index: {}]   ;;  %s6594_s8 = inlined_call_operand.hbm [shape: f32[1,128], index: 8, kind: input, shape index: {}]   ;;  %s6595_s9 = inlined_call_operand.vmem [shape: bf16[128,512], index: 9, kind: input, shape index: {}]   ;;  %s6596_s10 = inlined_call_operand.vmem [shape: f32[1,512], index: 10, kind: input, shape index: {}]   ;;  %s6597_s11 = inlined_call_operand.vmem [shape: bf16[512,128], index: 11, kind: input, shape index: {}]   ;;  %s6598_s12 = inlined_call_operand.hbm [shape: f32[1,128], index: 12, kind: input, shape index: {}]   ;;  %s6599_s13 = inlined_call_operand.vmem [shape: f32[2,2,64,128], index: 13, kind: output, shape index: {}]  }
   0x1   :  { %6611 = sst [smem:[#allocation22_spill]] %s6588_s2 }
   0x2   :  { %6612 = sst [smem:[#allocation23_spill]] %s6590_s4 }
   0x3   :  { %6613 = sst [smem:[#allocation24_spill]] %s6599_s13 }
   0x4   :  { %18 = vsyncpa [#allocation4], 0 }
   0x5   :  { %19 = vsyncpa [#allocation6], 0 }
   0x6   :  { %20 = vsyncpa [#allocation9], 0 }
   0x7   :  { %21 = vsyncpa [#allocation12], 0  ;;  %s5125_s25 = smov 0   ;;  %s5127_s26 = smov 0  }
   0x8   :  { %s5129_s27 = smov 0  }
   0x9 LB: > { %s5141_s28 = sadd.s32 4294967295, %s5039_s27   ;;  %s5144_s29 = sadd.s32 1, %s5039_s27   ;;  %s5039_s27 = sphi %s5129_s27, %s6647_s27   ;;  %s5035_s26 = sphi %s5127_s26, %s6650_s26   ;;  %s5031_s25 = sphi %s5125_s25, %s6649_s25  }
   0xa   : > { %6614 = sst [smem:[#allocation18_spill]] %s5144_s29  ;;  %s31_s30 = ssub.s32 %s5039_s27, %s5144_s29 }
   0xb   : > { %s34_s14 = sadd.s32 1, %s5035_s26  ;;  %p32_p0 = scmp.eq.s32.totalorder %s31_s30, 0 }
   0xc   : > { %p41_p1 = scmp.ne.s32.totalorder %s5035_s26, %s5031_s25  ;;  %p42_p2 = scmp.eq.s32.totalorder %s5039_s27, 0 }
   0xd   : > { %p323_p3 = scmp.eq.s32.totalorder %s5141_s28, 1  ;;  %p3863_p6 = scmp.ge.s32.totalorder %s5039_s27, 1 }
   0xe   : > { %s5154_s15 = scalar_select %p32_p0, %s5035_s26, %s34_s14  }
   0xf   : > { %p5156_p4 = por %p42_p2, %p41_p1  ;;  %p5160_p5 = por %p323_p3, %p41_p1 }
  0x10   : > { %6615 = sst [smem:[#allocation19_spill]] %s5154_s15  ;;  %p336_p7 = scmp.lt.s32.totalorder %s5039_s27, 3 }
  0x11   : > { %s6616_s16 = scalar_select %p5156_p4, 1, 0 }
  0x12   : > { %s6617_s17 = scalar_select %p5160_p5, 1, 0 }
  0x13   : > { %p6602_p8 = scmp.eq.s32.totalorder %s5141_s28, 0  ;;  %p5167_p9 = pnand %p3863_p6, %p336_p7 }
  0x14   : > { %s5041_s19 = smov [#allocation5]   ;;  %s5042_s21 = smov [#allocation8]  }
  0x15   : > { %s6618_s18 = scalar_select %p5167_p9, 1, 0 }
  0x16   : > { %s366_s20 = sshll.u32 %s5041_s19, 4  ;;  %p4424_p10 = pneg %p5167_p9  ;;  %s367_s20 = int_to_ptr.vmem [resolvable:$true] %s366_s20 }
  0x17   : > { %s392_s22 = sshll.u32 %s5042_s21, 4  ;;  %s5043_s24 = smov [#allocation3]   ;;  %s5179_s22 = int_to_ptr.vmem [resolvable:$true] %s392_s22 }
  0x18   : > { %p5175_p11 = pnand %p6602_p8, %p4424_p10  ;;  %s352_s30 = sshll.u32 %s5043_s24, 4  ;;  %s353_s30 = int_to_ptr.vmem [resolvable:$true] %s352_s30 }
  0x19   : > { %s4856_s19 = scalar_lea.vmem %s367_s20, 16  ;;  %s4863_s21 = scalar_lea.vmem %s367_s20, 32 }
  0x1a   : > { %p5183_p12 = pneg %p5175_p11  ;;  %p4857_p13 = scmp.ne.s32.totalorder %s367_s20, %s4856_s19 }
  0x1b   : > { %p4864_p2 = scmp.lt.s32.totalorder %s367_s20, %s367_s20  ;;  %p4865_p3 = scmp.lt.s32.totalorder %s4863_s21, %s4856_s19 }
  0x1c   : > { %p4859_p0 = pnand %p4857_p13, %p5183_p12 }
  0x1d   : > { %p4866_p6 = por %p4865_p3, %p4864_p2 }
  0x1e   : > { %p4860_p1 = pneg %p4859_p0 }
  0x20   : > { %p4867_p7 = pnand %p4866_p6, %p4860_p1 }
  0x22   : > { %4870 = shalt.err (!%p4867_p7)
}
  0x23   : > { %s6621_s4 = sld [smem:[#allocation23_spill]]  ;;  %s4882_s29 = scalar_lea.vmem %s5179_s22, 1024 }
  0x24   : > { %p4883_p10 = scmp.ne.s32.totalorder %s5179_s22, %s4882_s29  ;;  %p4890_p8 = scmp.lt.s32.totalorder %s5179_s22, %s5179_s22 }
  0x25   : > { %p4891_p2 = scmp.lt.s32.totalorder %s4882_s29, %s4882_s29 }
  0x26   : > { %p4885_p13 = pnand %p4883_p10, %p5183_p12 }
  0x27   : > { %p4892_p1 = por %p4891_p2, %p4890_p8 }
  0x28   : > { %p4886_p0 = pneg %p4885_p13 }
  0x29   : > { %4430 = dma.hbm_to_vmem [thread:$0]  (!%p5175_p11), %s6621_s4, 16, %s367_s20, [#allocation6]  }
  0x2a   : > { %p4893_p3 = pnand %p4892_p1, %p4886_p0 }
  0x2c   : > { %4896 = shalt.err (!%p4893_p3)
}
  0x2d   : > { %s5044_s19 = smov 64   ;;  %s5045_s15 = smov 4  }
  0x2e   : > { %4436 = dma.hbm_to_vmem [thread:$0]  (!%p5175_p11), %s6593_s7, 1024, %s5179_s22, [#allocation9], %s5044_s19, %s5044_s19, %s5045_s15  }
  0x2f   : > { %s4908_s20 = scalar_lea.vmem %s353_s30, 16  ;;  %s4915_s29 = scalar_lea.vmem %s353_s30, 32 }
  0x30   : > { %p4909_p6 = scmp.ne.s32.totalorder %s353_s30, %s4908_s20  ;;  %p4916_p8 = scmp.lt.s32.totalorder %s353_s30, %s353_s30 }
  0x31   : > { %p4917_p13 = scmp.lt.s32.totalorder %s4915_s29, %s4908_s20 }
  0x32   : > { %p4911_p7 = pnand %p4909_p6, %p5183_p12 }
  0x33   : > { %p4918_p0 = por %p4917_p13, %p4916_p8 }
  0x34   : > { %p4912_p10 = pneg %p4911_p7 }
  0x36   : > { %p4919_p2 = pnand %p4918_p0, %p4912_p10 }
  0x38   : > { %4922 = shalt.err (!%p4919_p2)
}
  0x39   : > { %s6622_s2 = sld [smem:[#allocation22_spill]]  ;;  %s5046_s22 = smov [#allocation7]  }
  0x3a   : > { %s376_s19 = sshll.u32 %s5046_s22, 4  ;;  %s377_s19 = int_to_ptr.vmem [resolvable:$true] %s376_s19 }
  0x3b   : > { %s4934_s15 = scalar_lea.vmem %s377_s19, 3072  ;;  %p4942_p7 = scmp.lt.s32.totalorder %s377_s19, %s377_s19 }
  0x3c   : > { %p4935_p1 = scmp.ne.s32.totalorder %s377_s19, %s4934_s15  ;;  %p4943_p5 = scmp.lt.s32.totalorder %s4934_s15, %s4934_s15 }
  0x3e   : > { %p4937_p3 = pnand %p4935_p1, %p5183_p12  ;;  %p4944_p8 = por %p4943_p5, %p4942_p7 }
  0x3f   : > { %4427 = dma.hbm_to_vmem [thread:$0]  (!%p5175_p11), %s6622_s2, 16, %s353_s30, [#allocation4]  }
  0x40   : > { %p4938_p6 = pneg %p4937_p3 }
  0x42   : > { %p4945_p10 = pnand %p4944_p8, %p4938_p6 }
  0x44   : > { %4948 = shalt.err (!%p4945_p10)
}
  0x45   : > { %s5047_s21 = smov 192   ;;  %s5048_s24 = smov 12  }
  0x46   : > { %4433 = dma.hbm_to_vmem [thread:$0]  (!%p5175_p11), %s6591_s5, 3072, %s377_s19, [#allocation6], %s5047_s21, %s5047_s21, %s5048_s24  }
  0x47   : > { %s5049_s30 = smov [#allocation10]   ;;  %s5050_s29 = smov [#allocation11]  }
  0x48   : > { %s406_s20 = sshll.u32 %s5049_s30, 4  ;;  %s426_s22 = sshll.u32 %s5050_s29, 4  ;;  %s407_s20 = int_to_ptr.vmem [resolvable:$true] %s406_s20  ;;  %s427_s22 = int_to_ptr.vmem [resolvable:$true] %s426_s22 }
  0x49   : > { %s4960_s2 = scalar_lea.vmem %s407_s20, 16  ;;  %s4967_s15 = scalar_lea.vmem %s407_s20, 32 }
  0x4a   : > { %p4961_p13 = scmp.ne.s32.totalorder %s407_s20, %s4960_s2  ;;  %p4968_p2 = scmp.lt.s32.totalorder %s407_s20, %s407_s20 }
  0x4b   : > { %p4969_p1 = scmp.lt.s32.totalorder %s4967_s15, %s4960_s2 }
  0x4c   : > { %p4963_p5 = pnand %p4961_p13, %p5183_p12 }
  0x4d   : > { %p4970_p3 = por %p4969_p1, %p4968_p2 }
  0x4e   : > { %p4964_p0 = pneg %p4963_p5 }
  0x50   : > { %p4971_p6 = pnand %p4970_p3, %p4964_p0 }
  0x52   : > { %4974 = shalt.err (!%p4971_p6)
}
  0x53   : > { %4439 = dma.hbm_to_vmem [thread:$0]  (!%p5175_p11), %s6594_s8, 16, %s407_s20, [#allocation9]  }
  0x54   : > { %s4986_s24 = scalar_lea.vmem %s427_s22, 16  ;;  %s4993_s4 = scalar_lea.vmem %s427_s22, 32 }
  0x55   : > { %p4987_p7 = scmp.ne.s32.totalorder %s427_s22, %s4986_s24  ;;  %p4994_p13 = scmp.lt.s32.totalorder %s427_s22, %s427_s22 }
  0x56   : > { %p4995_p5 = scmp.lt.s32.totalorder %s4993_s4, %s4986_s24 }
  0x57   : > { %p4989_p8 = pnand %p4987_p7, %p5183_p12 }
  0x58   : > { %p4996_p9 = por %p4995_p5, %p4994_p13 }
  0x59   : > { %p4990_p10 = pneg %p4989_p8 }
  0x5b   : > { %p4997_p4 = pnand %p4996_p9, %p4990_p10 }
  0x5d   : > { %5000 = shalt.err (!%p4997_p4)
}
  0x5e   : > { %4442 = dma.hbm_to_vmem [thread:$0]  (!%p5175_p11), %s6598_s12, 16, %s427_s22, [#allocation12]  }
  0x5f   : > { %p3870_p0 = scmp.ge.s32.totalorder %s5039_s27, 2 }
  0x60   : > { %p6623_p2 = scmp.ne.s32.totalorder (!%p3870_p0), %s6616_s16, 0 }
  0x61   : > { %433 = sbr.rel (%p3870_p0) target bundleno = 114 (0x72), region = 64 }
  0x66   : > { %436 = sbr.rel (!%p6623_p2) target bundleno = 114 (0x72), region = 68  ;;  %s438_s14 = sand.u32 (%p6623_p2), 1, %s5035_s26  }
  0x67   : > { %s4038_s30 = sshll.u32 (%p6623_p2), %s5039_s27, 6  ;;  %s3871_s20 = sshll.u32 (%p6623_p2), %s438_s14, 7 }
  0x68   : > { %s5242_s19 = scalar_lea.vmem (%p6623_p2), %s6586_s0, %s4038_s30  ;;  %s440_s16 = scalar_lea.vmem (%p6623_p2), [#allocation2], %s3871_s20 }
  0x69   : > { %v502_v0 = vld [vmem:[%s5242_s19] sm:$0xff] (%p6623_p2)  ;;  %v504_v1 = vld [vmem:[%s5242_s19 + $0x8] sm:$0xff] (%p6623_p2)  ;;  %v506_v2 = vld [vmem:[%s5242_s19 + $0x10] sm:$0xff] (%p6623_p2) }
  0x6a   : > { %503 = vst [vmem:[%s440_s16] sm:$0xff] (%p6623_p2), %v502_v0  ;;  %505 = vst [vmem:[%s440_s16 + $0x8] sm:$0xff] (%p6623_p2), %v504_v1  ;;  %v508_v3 = vld [vmem:[%s5242_s19 + $0x18] sm:$0xff] (%p6623_p2)  ;;  %v510_v4 = vld [vmem:[%s5242_s19 + $0x20] sm:$0xff] (%p6623_p2) }
  0x6b   : > { %507 = vst [vmem:[%s440_s16 + $0x10] sm:$0xff] %v506_v2  ;;  %v512_v5 = vld [vmem:[%s5242_s19 + $0x28] sm:$0xff]  ;;  %509 = vst [vmem:[%s440_s16 + $0x18] sm:$0xff] %v508_v3  ;;  %v514_v6 = vld [vmem:[%s5242_s19 + $0x30] sm:$0xff] }
  0x6c   : > { %511 = vst [vmem:[%s440_s16 + $0x20] sm:$0xff] %v510_v4  ;;  %513 = vst [vmem:[%s440_s16 + $0x28] sm:$0xff] %v512_v5  ;;  %v516_v7 = vld [vmem:[%s5242_s19 + $0x38] sm:$0xff]  ;;  %v518_v8 = vld [vmem:[%s5242_s19 + $0x80] sm:$0xff] }
  0x6d   : > { %515 = vst [vmem:[%s440_s16 + $0x30] sm:$0xff] %v514_v6  ;;  %517 = vst [vmem:[%s440_s16 + $0x38] sm:$0xff] %v516_v7  ;;  %v520_v9 = vld [vmem:[%s5242_s19 + $0x88] sm:$0xff]  ;;  %v522_v10 = vld [vmem:[%s5242_s19 + $0x90] sm:$0xff] }
  0x6e   : > { %519 = vst [vmem:[%s440_s16 + $0x40] sm:$0xff] %v518_v8  ;;  %v524_v11 = vld [vmem:[%s5242_s19 + $0x98] sm:$0xff]  ;;  %521 = vst [vmem:[%s440_s16 + $0x48] sm:$0xff] %v520_v9  ;;  %v526_v12 = vld [vmem:[%s5242_s19 + $0xa0] sm:$0xff] }
  0x6f   : > { %523 = vst [vmem:[%s440_s16 + $0x50] sm:$0xff] %v522_v10  ;;  %525 = vst [vmem:[%s440_s16 + $0x58] sm:$0xff] %v524_v11  ;;  %v528_v13 = vld [vmem:[%s5242_s19 + $0xa8] sm:$0xff]  ;;  %v530_v14 = vld [vmem:[%s5242_s19 + $0xb0] sm:$0xff] }
  0x70   : > { %527 = vst [vmem:[%s440_s16 + $0x60] sm:$0xff] %v526_v12  ;;  %529 = vst [vmem:[%s440_s16 + $0x68] sm:$0xff] %v528_v13  ;;  %v532_v15 = vld [vmem:[%s5242_s19 + $0xb8] sm:$0xff] }
  0x71   : > { %531 = vst [vmem:[%s440_s16 + $0x70] sm:$0xff] %v530_v14  ;;  %533 = vst [vmem:[%s440_s16 + $0x78] sm:$0xff] %v532_v15 }
  0x72 PF: > { %p6624_p4 = scmp.ne.s32.totalorder %s6618_s18, 0 }
  0x74   : > { %542 = sbr.rel (%p6624_p4) target bundleno = 3794 (0xed2), region = 106 }
  0x79   : > { %s545_s27 = sand.u32 1, %s5031_s25   ;;  %p6625_p9 = scmp.eq.s32.totalorder %s5141_s28, 0 }
  0x7a   : > { %s5263_s23 = sshll.u32 %s545_s27, 7 }
  0x7b   : > { %s5266_s22 = scalar_lea.vmem [#allocation2], %s5263_s23 }
  0x7c   : > { %5014 = dma.done.wait (%p6625_p9), [#allocation4], 16   ;;  %p6626_p11 = pmov %p6625_p9 }
  0x7d   : > { %p6627_p12 = pmov %p6625_p9 }
  0x7e   : > { %5016 = vsyncadd (%p6626_p11), [#allocation4], 4294967280 }
  0x7f   : > { %5018 = dma.done.wait (%p6627_p12), [#allocation6], 3088   ;;  %p6628_p1 = pmov %p6625_p9 }
  0x81   : > { %5020 = vsyncadd (%p6628_p1), [#allocation6], 4294964208  ;;  %p6629_p3 = pmov %p6628_p1 }
  0x82   : > { %p6630_p6 = pmov %p6628_p1 }
  0x83   : > { %5022 = dma.done.wait (%p6629_p3), [#allocation9], 1040  }
  0x84   : > { %5024 = vsyncadd (%p6630_p6), [#allocation9], 4294966256  ;;  %p6631_p7 = pmov %p6628_p1 }
  0x85   : > { %p6632_p8 = pmov %p6628_p1 }
  0x86   : > { %5026 = dma.done.wait (%p6631_p7), [#allocation12], 16  }
  0x87   : > { %5028 = vsyncadd (%p6632_p8), [#allocation12], 4294967280  ;;  %v3883_v16 = vld [vmem:[%s5266_s22 + $0x40] sm:$0xff]  ;;  %v3885_v17 = vld [vmem:[%s5266_s22 + $0x50] sm:$0xff]  ;;  %v6607_v14 = vmov 0   ;;  %vm1079_vm0 = vcmask 261120  }
  0x88   : > { %631 = vadd.xlane.f32.xlu0 %v3883_v16  ;;  %635 = vadd.xlane.f32.xlu1 %v3885_v17  ;;  %v3884_v18 = vld [vmem:[%s5266_s22 + $0x48] sm:$0xff]  ;;  %v3886_v19 = vld [vmem:[%s5266_s22 + $0x58] sm:$0xff]  ;;  %v3887_v20 = vld [vmem:[%s5266_s22 + $0x60] sm:$0xff]  ;;  %vm1169_vm1 = vcmask 523264   ;;  %s5052_s4 = smov 96   ;;  %s5053_s2 = smov 64  }
  0x89   : > { %v3888_v21 = vld [vmem:[%s5266_s22 + $0x68] sm:$0xff]  ;;  %v3889_v22 = vld [vmem:[%s5266_s22 + $0x70] sm:$0xff]  ;;  %v3890_v23 = vld [vmem:[%s5266_s22 + $0x78] sm:$0xff]  ;;  %961 = vmatprep.mubr.bf16.mxu0 %v6607_v14  ;;  %s5054_s13 = smov 32   ;;  %vm2281_vm2 = vcmask 785408   ;;  %s5923_s14 = scalar_lea.vmem [#allocation13], %s5263_s23 }
  0x8a   : > { %v4493_v24 = vld [vmem:[#allocation7 + $0xac] ss:$12 sps:$4 sm:$0xff]   ;;  %v4495_v25 = vld [vmem:[#allocation7 + $0xa8] ss:$12 sps:$4 sm:$0xff]   ;;  %v4498_v58 = vld [vmem:[#allocation7 + $0xb0] ss:$12 sps:$4 sm:$0xff]  }
  0x8b   : > { %929 = vmatprep.subr.bf16.mxu0 %v4493_v24  ;;  %v4496_v57 = vld [vmem:[#allocation7 + $0x94] ss:$12 sps:$4 sm:$0xff]   ;;  %v4499_v59 = vld [vmem:[#allocation7 + $0x90] ss:$12 sps:$4 sm:$0xff]   ;;  %4208 = vmatprep.subr.bf16.mxu1 %v4498_v58  ;;  %v4502_v62 = vld [vmem:[#allocation7 + $0x98] ss:$12 sps:$4 sm:$0xff]  }
  0x8c   : > { %633 = vadd.xlane.f32.xlu0 %v3884_v18  ;;  %637 = vadd.xlane.f32.xlu1 %v3886_v19  ;;  %v4500_v61 = vld [vmem:[#allocation7 + $0x7c] ss:$12 sps:$4 sm:$0xff]   ;;  %v4503_v63 = vld [vmem:[#allocation7 + $0x78] ss:$12 sps:$4 sm:$0xff]   ;;  %v4506_v1 = vld [vmem:[#allocation7 + $0x80] ss:$12 sps:$4 sm:$0xff]  }
  0x8d   : > { %930 = vmatpush1.bf16.msra.mxu0 %v4495_v25  ;;  %4209 = vmatpush3.bf16.msra.mxu1 %v4498_v58  ;;  %v4504_v0 = vld [vmem:[#allocation7 + $0x64] ss:$12 sps:$4 sm:$0xff]   ;;  %v4507_v2 = vld [vmem:[#allocation7 + $0x60] ss:$12 sps:$4 sm:$0xff]   ;;  %v4510_v4 = vld [vmem:[#allocation7 + $0x68] ss:$12 sps:$4 sm:$0xff]  }
  0x8e   : > { %931 = vmatprep.subr.bf16.mxu0 %v4496_v57  ;;  %4210 = vmatprep.subr.bf16.mxu1 %v4502_v62  ;;  %v4508_v3 = vld [vmem:[#allocation7 + $0x4c] ss:$12 sps:$4 sm:$0xff]   ;;  %v4511_v5 = vld [vmem:[#allocation7 + $0x48] ss:$12 sps:$4 sm:$0xff]   ;;  %v4514_v7 = vld [vmem:[#allocation7 + $0x50] ss:$12 sps:$4 sm:$0xff]  }
  0x8f   : > { %v4512_v6 = vld [vmem:[#allocation7 + $0x34] ss:$12 sps:$4 sm:$0xff]   ;;  %v4515_v8 = vld [vmem:[#allocation7 + $0x30] ss:$12 sps:$4 sm:$0xff]   ;;  %v4518_v10 = vld [vmem:[#allocation7 + $0x38] ss:$12 sps:$4 sm:$0xff]  }
  0x90   : > { %639 = vadd.xlane.f32.xlu0 %v3887_v20  ;;  %641 = vadd.xlane.f32.xlu1 %v3888_v21  ;;  %v4516_v9 = vld [vmem:[#allocation7 + $0x1c] ss:$12 sps:$4 sm:$0xff]   ;;  %v4519_v11 = vld [vmem:[#allocation7 + $0x18] ss:$12 sps:$4 sm:$0xff]   ;;  %v4522_v13 = vld [vmem:[#allocation7 + $0x20] ss:$12 sps:$4 sm:$0xff]  }
  0x91   : > { %932 = vmatpush1.bf16.msra.mxu0 %v4499_v59  ;;  %4211 = vmatpush3.bf16.msra.mxu1 %v4502_v62  ;;  %v4520_v12 = vld [vmem:[#allocation7 + $0x4] ss:$12 sps:$4 sm:$0xff]   ;;  %v4523_v15 = vld [vmem:[#allocation7] ss:$12 sps:$4 sm:$0xff]   ;;  %p6645_p10 = scmp.ne.s32.totalorder %s6617_s17, 0 }
  0x92   : > { %933 = vmatprep.subr.bf16.mxu0 %v4500_v61  ;;  %4212 = vmatprep.subr.bf16.mxu1 %v4506_v1 }
  0x94   : > { %643 = vadd.xlane.f32.xlu0 %v3889_v22  ;;  %645 = vadd.xlane.f32.xlu1 %v3890_v23 }
  0x95   : > { %934 = vmatpush1.bf16.msra.mxu0 %v4503_v63  ;;  %4213 = vmatpush3.bf16.msra.mxu1 %v4506_v1 }
  0x96   : > { %935 = vmatprep.subr.bf16.mxu0 %v4504_v0  ;;  %4214 = vmatprep.subr.bf16.mxu1 %v4510_v4 }
  0x99   : > { %936 = vmatpush1.bf16.msra.mxu0 %v4507_v2  ;;  %4215 = vmatpush3.bf16.msra.mxu1 %v4510_v4 }
  0x9a   : > { %937 = vmatprep.subr.bf16.mxu0 %v4508_v3  ;;  %4216 = vmatprep.subr.bf16.mxu1 %v4514_v7 }
  0x9d   : > { %938 = vmatpush1.bf16.msra.mxu0 %v4511_v5  ;;  %4217 = vmatpush3.bf16.msra.mxu1 %v4514_v7 }
  0x9e   : > { %939 = vmatprep.subr.bf16.mxu0 %v4512_v6  ;;  %4218 = vmatprep.subr.bf16.mxu1 %v4518_v10 }
  0xa1   : > { %940 = vmatpush1.bf16.msra.mxu0 %v4515_v8  ;;  %4219 = vmatpush3.bf16.msra.mxu1 %v4518_v10 }
  0xa2   : > { %941 = vmatprep.subr.bf16.mxu0 %v4516_v9  ;;  %4220 = vmatprep.subr.bf16.mxu1 %v4522_v13 }
  0xa5   : > { %942 = vmatpush1.bf16.msra.mxu0 %v4519_v11  ;;  %4221 = vmatpush3.bf16.msra.mxu1 %v4522_v13 }
  0xa6   : > { %943 = vmatprep.subr.bf16.mxu0 %v4520_v12 }
  0xa9   : > { %944 = vmatpush1.bf16.msra.mxu0 %v4523_v15 }
 0x111   : > { %v632_v26 = vpop.xlane.xlu0 %631  ;;  %v636_v27 = vpop.xlane.xlu1 %635 }
 0x112   : > { %v648_v28 = vmul.f32 0.0078125, %v632_v26  ;;  %v650_v29 = vmul.f32 0.0078125, %v636_v27 }
 0x114   : > { %v5292_v30 = vsub.f32 %v3883_v16, %v648_v28  ;;  %v5294_v31 = vsub.f32 %v3885_v17, %v650_v29  ;;  %v4524_v16 = vld [vmem:[#allocation7 + $0x8] ss:$12 sps:$4 sm:$0xff]  }
 0x115   : > { %v634_v32 = vpop.xlane.xlu0 %633  ;;  %v638_v33 = vpop.xlane.xlu1 %637  ;;  %4222 = vmatprep.subr.bf16.mxu1 %v4524_v16 }
 0x116   : > { %v649_v34 = vmul.f32 0.0078125, %v634_v32  ;;  %v664_v35 = vmul.f32 %v5292_v30, %v5292_v30  ;;  %v651_v36 = vmul.f32 0.0078125, %v638_v33  ;;  %v666_v37 = vmul.f32 %v5294_v31, %v5294_v31  ;;  %4223 = vmatpush3.bf16.msra.mxu1 %v4524_v16 }
 0x118   : > { %672 = vadd.xlane.f32.xlu0 %v664_v35  ;;  %v5300_v38 = vsub.f32 %v3884_v18, %v649_v34  ;;  %v5302_v39 = vsub.f32 %v3886_v19, %v651_v36 }
 0x119   : > { %v640_v40 = vpop.xlane.xlu0 %639  ;;  %v642_v41 = vpop.xlane.xlu1 %641 }
 0x11a   : > { %v652_v42 = vmul.f32 0.0078125, %v640_v40  ;;  %v665_v43 = vmul.f32 %v5300_v38, %v5300_v38  ;;  %v653_v44 = vmul.f32 0.0078125, %v642_v41  ;;  %v667_v45 = vmul.f32 %v5302_v39, %v5302_v39 }
 0x11c   : > { %676 = vadd.xlane.f32.xlu0 %v666_v37  ;;  %674 = vadd.xlane.f32.xlu1 %v665_v43  ;;  %v5308_v46 = vsub.f32 %v3887_v20, %v652_v42  ;;  %v5310_v47 = vsub.f32 %v3888_v21, %v653_v44 }
 0x11d   : > { %v644_v48 = vpop.xlane.xlu0 %643  ;;  %v646_v49 = vpop.xlane.xlu1 %645 }
 0x11e   : > { %v654_v50 = vmul.f32 0.0078125, %v644_v48  ;;  %v668_v51 = vmul.f32 %v5308_v46, %v5308_v46  ;;  %v655_v52 = vmul.f32 0.0078125, %v646_v49  ;;  %v669_v53 = vmul.f32 %v5310_v47, %v5310_v47  ;;  %v3891_v49 = vld [vmem:[%s6587_s1] ss:$0 sm:$0xff] }
 0x120   : > { %678 = vadd.xlane.f32.xlu1 %v667_v45  ;;  %680 = vadd.xlane.f32.xlu0 %v668_v51  ;;  %v5316_v54 = vsub.f32 %v3889_v22, %v654_v50  ;;  %v5318_v55 = vsub.f32 %v3890_v23, %v655_v52 }
 0x122   : > { %v670_v56 = vmul.f32 %v5316_v54, %v5316_v54  ;;  %v671_v60 = vmul.f32 %v5318_v55, %v5318_v55 }
 0x124   : > { %682 = vadd.xlane.f32.xlu1 %v669_v53  ;;  %684 = vadd.xlane.f32.xlu0 %v670_v56  ;;  %v3892_v56 = vld [vmem:[#allocation3] ss:$0 sm:$0xff] }
 0x128   : > { %686 = vadd.xlane.f32.xlu1 %v671_v60 }
 0x1a1   : > { %v673_v17 = vpop.xlane.xlu0 %672 }
 0x1a2   : > { %v688_v18 = vmul.f32 0.0078125, %v673_v17 }
 0x1a4   : > { %v696_v19 = vadd.f32 1e-06, %v688_v18 }
 0x1a5   : > { %v675_v20 = vpop.xlane.xlu1 %674  ;;  %v677_v21 = vpop.xlane.xlu0 %676 }
 0x1a6   : > { %4613 = vrsqrt.f32 %v696_v19  ;;  %v689_v22 = vmul.f32 0.0078125, %v675_v20  ;;  %v690_v23 = vmul.f32 0.0078125, %v677_v21  ;;  %v784_v19 = vld [vmem:[%s6592_s6] sm:$0x7] }
 0x1a8   : > { %v697_v24 = vadd.f32 1e-06, %v689_v22  ;;  %v698_v25 = vadd.f32 1e-06, %v690_v23 }
 0x1a9   : > { %v679_v26 = vpop.xlane.xlu1 %678  ;;  %v681_v27 = vpop.xlane.xlu0 %680 }
 0x1aa   : > { %4615 = vrsqrt.f32 %v697_v24  ;;  %v691_v28 = vmul.f32 0.0078125, %v679_v26  ;;  %v692_v29 = vmul.f32 0.0078125, %v681_v27 }
 0x1ab   : > { %4617 = vrsqrt.f32 %v698_v25 }
 0x1ac   : > { %v699_v32 = vadd.f32 1e-06, %v691_v28  ;;  %v700_v33 = vadd.f32 1e-06, %v692_v29 }
 0x1ad   : > { %v683_v34 = vpop.xlane.xlu1 %682  ;;  %v685_v35 = vpop.xlane.xlu0 %684 }
 0x1ae   : > { %4619 = vrsqrt.f32 %v699_v32  ;;  %v693_v36 = vmul.f32 0.0078125, %v683_v34  ;;  %v694_v37 = vmul.f32 0.0078125, %v685_v35 }
 0x1af   : > { %4621 = vrsqrt.f32 %v700_v33 }
 0x1b0   : > { %v701_v40 = vadd.f32 1e-06, %v693_v36  ;;  %v702_v41 = vadd.f32 1e-06, %v694_v37 }
 0x1b1   : > { %v687_v42 = vpop.xlane.xlu1 %686 }
 0x1b2   : > { %4623 = vrsqrt.f32 %v701_v40  ;;  %v695_v43 = vmul.f32 0.0078125, %v687_v42 }
 0x1b3   : > { %v4614_v44 = vpop.eup %4613  ;;  %4625 = vrsqrt.f32 %v702_v41 }
 0x1b4   : > { %v703_v45 = vadd.f32 1e-06, %v695_v43  ;;  %v712_v48 = vmul.f32 %v4614_v44, %v5292_v30 }
 0x1b6   : > { %4627 = vrsqrt.f32 %v703_v45  ;;  %v726_v53 = vmul.f32 %v3891_v49, %v712_v48 }
 0x1b7   : > { %v4616_v50 = vpop.eup %4615 }
 0x1b8   : > { %v4618_v51 = vpop.eup %4617  ;;  %v713_v52 = vmul.f32 %v4616_v50, %v5300_v38  ;;  %v740_v62 = vadd.f32 %v3892_v56, %v726_v53 }
 0x1b9   : > { %v714_v57 = vmul.f32 %v4618_v51, %v5294_v31 }
 0x1ba   : > { %v727_v58 = vmul.f32 %v3891_v49, %v713_v52 }
 0x1bb   : > { %v4620_v59 = vpop.eup %4619  ;;  %v728_v60 = vmul.f32 %v3891_v49, %v714_v57 }
 0x1bc   : > { %v4622_v61 = vpop.eup %4621  ;;  %v741_v63 = vadd.f32 %v3892_v56, %v727_v58  ;;  %v715_v30 = vmul.f32 %v4620_v59, %v5302_v39 }
 0x1bd   : > { %v716_v0 = vmul.f32 %v4622_v61, %v5308_v46  ;;  %v742_v4 = vadd.f32 %v3892_v56, %v728_v60 }
 0x1be   : > { %v748_v1 = vpack.c.bf16 %v741_v63, %v740_v62  ;;  %v729_v2 = vmul.f32 %v3891_v49, %v715_v30 }
 0x1bf   : > { %v4624_v3 = vpop.eup %4623  ;;  %v730_v6 = vmul.f32 %v3891_v49, %v716_v0 }
 0x1c0   : > { %v4626_v5 = vpop.eup %4625  ;;  %962 = vmatmul.mubr.bf16.vlgmr.msra.gmra.mxu0 %v748_v1  ;;  %4224 = vmatprep.mubr.bf16.mxu1 %v748_v1  ;;  %v743_v38 = vadd.f32 %v3892_v56, %v729_v2  ;;  %v717_v31 = vmul.f32 %v4624_v3, %v5310_v47 }
 0x1c1   : > { %971 = vmatprep.mubr.bf16.mxu0 %v6607_v14  ;;  %v718_v7 = vmul.f32 %v4626_v5, %v5316_v54  ;;  %v744_v46 = vadd.f32 %v3892_v56, %v730_v6  ;;  %v786_v54 = vlaneseq }
 0x1c2   : > { %v749_v8 = vpack.c.bf16 %v743_v38, %v742_v4  ;;  %v731_v9 = vmul.f32 %v3891_v49, %v717_v31 }
 0x1c3   : > { %v4628_v39 = vpop.eup %4627  ;;  %v732_v12 = vmul.f32 %v3891_v49, %v718_v7  ;;  %v5339_v18 = vshrl.u32 %v786_v54, 7 }
 0x1c4   : > { %4225 = vmatmul.mubr.bf16.vlgmr.msra.gmra.mxu1 %v749_v8  ;;  %v745_v10 = vadd.f32 %v3892_v56, %v731_v9  ;;  %v719_v11 = vmul.f32 %v4628_v39, %v5318_v55 }
 0x1c5   : > { %v746_v16 = vadd.f32 %v3892_v56, %v732_v12  ;;  %v6606_v55 = vsub.s32 0, %v5339_v18  ;;  %v6605_v36 = vsub.s32 2, %v5339_v18  ;;  %v6604_v63 = vsub.s32 1, %v5339_v18 }
 0x1c6   : > { %v750_v13 = vpack.c.bf16 %v745_v10, %v744_v46  ;;  %v733_v15 = vmul.f32 %v3891_v49, %v719_v11 }
 0x1c7   : > { %v5347_v21 = vrot.slane %v784_v19, %v6606_v55  ;;  %v797_v43 = vrot.slane %v784_v19, %v6605_v36  ;;  %v793_v4 = vrot.slane %v784_v19, %v6604_v63 }
 0x1c8   : > { %972 = vmatmul.mubr.bf16.gmra.mxu0 %v749_v8  ;;  %4228 = vmatprep.mubr.bf16.mxu1 %v750_v13  ;;  %v747_v47 = vadd.f32 %v3892_v56, %v733_v15 }
 0x1c9   : > { %981 = vmatprep.mubr.bf16.mxu0 %v6607_v14 }
 0x1ca   : > { %v751_v17 = vpack.c.bf16 %v747_v47, %v746_v16 }
 0x1cc   : > { %4229 = vmatmul.mubr.bf16.gmra.mxu1 %v751_v17 }
 0x1d0   : > { %982 = vmatmul.mubr.bf16.gmra.mxu0 %v750_v13 }
 0x1d1   : > { %991 = vmatprep.mubr.bf16.mxu0 %v6607_v14 }
 0x1d8   : > { %992 = vmatmul.mubr.bf16.gmra.mxu0 %v751_v17 }
 0x280   : > { %v963_v20 = vpop.f32.mrf.mxu0 }
 0x281   : > { %v964_v25 = vadd.f32 %v963_v20, %v5347_v21 }
 0x282   : > { %v5349_v22 = vpop.f32.mrf.mxu0 }
 0x283   : > { %v966_v16 = vadd.f32 %v5349_v22, %v793_v4 }
 0x284   : > { %v967_v23 = vpop.f32.mrf.mxu0  ;;  %v4226_v24 = vpop.f32.mrf.mxu1 }
 0x285   : > { %v968_v26 = vadd.f32 %v967_v23, %v5347_v21  ;;  %v1045_v61 = vadd.f32 %v4226_v24, %v797_v43 }
 0x286   : > { %v5353_v27 = vpop.f32.mrf.mxu0  ;;  %v1036_v28 = vpop.f32.mrf.mxu1 }
 0x287   : > { %v5355_v29 = vpack.c.bf16 %v968_v26, %v964_v25  ;;  %v1037_v2 = vadd.f32 %v1036_v28, %v797_v43  ;;  %v970_v15 = vadd.f32 %v5353_v27, %v793_v4 }
 0x288   : > { %v5357_v32 = vpop.f32.mrf.mxu0  ;;  %v4227_v33 = vpop.f32.mrf.mxu1 }
 0x289   : > { %4240 = vmatprep.mubr.msk.bf16.mxu0 %vm1079_vm0, %v5355_v29  ;;  %v1048_v58 = vadd.f32 %v4227_v33, %v797_v43  ;;  %v5401_v47 = vpack.c.bf16 %v970_v15, %v966_v16  ;;  %v974_v22 = vadd.f32 %v5357_v32, %v5347_v21 }
 0x28a   : > { %v975_v34 = vpop.f32.mrf.mxu0  ;;  %v1039_v35 = vpop.f32.mrf.mxu1 }
 0x28b   : > { %v5372_v30 = vpack.c.bf16 %v1048_v58, %v1045_v61  ;;  %v1040_v0 = vadd.f32 %v1039_v35, %v797_v43  ;;  %v976_v11 = vadd.f32 %v975_v34, %v793_v4  ;;  %v1093_v54 = vsel %vm1079_vm0, %v5401_v47, 0 }
 0x28c   : > { %v977_v37 = vpop.f32.mrf.mxu0  ;;  %v4230_v40 = vpop.f32.mrf.mxu1 }
 0x28d   : > { %v1061_v48 = vadd.f32 %v4230_v40, %v797_v43  ;;  %v5378_v5 = vpack.c.bf16 %v1040_v0, %v1037_v2  ;;  %v978_v19 = vadd.f32 %v977_v37, %v5347_v21 }
 0x28e   : > { %v979_v41 = vpop.f32.mrf.mxu0  ;;  %v1052_v42 = vpop.f32.mrf.mxu1 }
 0x28f   : > { %v1053_v52 = vadd.f32 %v1052_v42, %v797_v43  ;;  %v980_v10 = vadd.f32 %v979_v41, %v793_v4  ;;  %v5414_v24 = vpack.c.bf16 %v978_v19, %v974_v22 }
 0x290   : > { %v983_v44 = vpop.f32.mrf.mxu0  ;;  %v4231_v45 = vpop.f32.mrf.mxu1 }
 0x291   : > { %v1064_v49 = vadd.f32 %v4231_v45, %v797_v43  ;;  %v5393_v12 = vpack.c.bf16 %v980_v10, %v976_v11  ;;  %v984_v23 = vadd.f32 %v983_v44, %v5347_v21 }
 0x292   : > { %v985_v50 = vpop.f32.mrf.mxu0  ;;  %v1055_v51 = vpop.f32.mrf.mxu1 }
 0x293   : > { %v5364_v53 = vpack.c.bf16 %v1064_v49, %v1061_v48  ;;  %v1056_v56 = vadd.f32 %v1055_v51, %v797_v43  ;;  %v986_v8 = vadd.f32 %v985_v50, %v793_v4  ;;  %v1096_v17 = vsel %vm1079_vm0, %v5393_v12, 0 }
 0x294   : > { %v987_v57 = vpop.f32.mrf.mxu0 }
 0x295   : > { %v5366_v59 = vpack.c.bf16 %v1056_v56, %v1053_v52  ;;  %4248 = vmatprep.subr.bf16.mxu1 %v5364_v53  ;;  %v988_v20 = vadd.f32 %v987_v57, %v5347_v21 }
 0x296   : > { %v989_v60 = vpop.f32.mrf.mxu0  ;;  %4249 = vmatpush3.bf16.msra.mxu1 %v5364_v53 }
 0x297   : > { %4250 = vmatprep.subr.bf16.mxu1 %v5366_v59  ;;  %v990_v31 = vadd.f32 %v989_v60, %v793_v4  ;;  %v5416_v25 = vpack.c.bf16 %v988_v20, %v984_v23 }
 0x298   : > { %v993_v62 = vpop.f32.mrf.mxu0 }
 0x299   : > { %v5385_v39 = vpack.c.bf16 %v990_v31, %v986_v8  ;;  %v994_v27 = vadd.f32 %v993_v62, %v5347_v21 }
 0x29a   : > { %v995_v1 = vpop.f32.mrf.mxu0  ;;  %4251 = vmatpush3.bf16.msra.mxu1 %v5366_v59 }
 0x29b   : > { %4252 = vmatprep.subr.bf16.mxu1 %v5372_v30  ;;  %v996_v6 = vadd.f32 %v995_v1, %v793_v4  ;;  %v1099_v13 = vsel %vm1079_vm0, %v5385_v39, 0 }
 0x29c   : > { %v997_v3 = vpop.f32.mrf.mxu0 }
 0x29d   : > { %v998_v26 = vadd.f32 %v997_v3, %v5347_v21 }
 0x29e   : > { %v999_v38 = vpop.f32.mrf.mxu0  ;;  %4253 = vmatpush3.bf16.msra.mxu1 %v5372_v30 }
 0x29f   : > { %v1000_v7 = vadd.f32 %v999_v38, %v793_v4  ;;  %4254 = vmatprep.subr.bf16.mxu1 %v5378_v5  ;;  %v5424_v28 = vpack.c.bf16 %v998_v26, %v994_v27 }
 0x2a1   : > { %v5382_v9 = vpack.c.bf16 %v1000_v7, %v996_v6 }
 0x2a2   : > { %4255 = vmatpush3.bf16.msra.mxu1 %v5378_v5 }
 0x2a3   : > { %4384 = vmatprep.subr.msk.bf16.mxu0 %vm1079_vm0, %v5382_v9  ;;  %v1102_v46 = vsel %vm1079_vm0, %v5382_v9, 0 }
 0x2a4   : > { %4233 = vmatpush3.bf16.xpose.msra.mxu0 %v1102_v46 }
 0x2a5   : > { %4385 = vmatprep.subr.msk.bf16.mxu0 %vm1079_vm0, %v5385_v39 }
 0x2ac   : > { %4235 = vmatpush3.bf16.xpose.msra.mxu0 %v1099_v13 }
 0x2ad   : > { %4386 = vmatprep.subr.msk.bf16.mxu0 %vm1079_vm0, %v5393_v12 }
 0x2b4   : > { %4237 = vmatpush3.bf16.xpose.msra.mxu0 %v1096_v17 }
 0x2b5   : > { %4387 = vmatprep.subr.msk.bf16.mxu0 %vm1079_vm0, %v5401_v47 }
 0x2bc   : > { %4239 = vmatpush3.bf16.xpose.msra.mxu0 %v1093_v54 }
 0x2c3   : > { %4241 = vmatmul.mubr.msk.bf16.vlgmr.msra.gmra.mxu0 %vm1079_vm0, %v5414_v24 }
 0x2c4   : > { %4244 = vmatprep.mubr.msk.bf16.mxu0 %vm1079_vm0, %v5416_v25 }
 0x2cb   : > { %4245 = vmatmul.mubr.msk.bf16.gmra.mxu0 %vm1079_vm0, %v5424_v28 }
 0x383   : > { %v4242_v32 = vpop.f32.mrf.mxu0 }
 0x384   : > { %v1176_v41 = vsel %vm1169_vm1, %v4242_v32, -inf }
 0x385   : > { %v1138_v33 = vpop.f32.mrf.mxu0 }
 0x386   : > { %v1170_v34 = vsel %vm1169_vm1, %v1138_v33, -inf }
 0x387   : > { %1171 = vmax.xlane.f32.xlu0 %v1170_v34  ;;  %v4243_v35 = vpop.f32.mrf.mxu0 }
 0x388   : > { %v1179_v37 = vsel %vm1169_vm1, %v4243_v35, -inf }
 0x389   : > { %1180 = vmax.xlane.f32.xlu1 %v1179_v37  ;;  %v1141_v40 = vpop.f32.mrf.mxu0 }
 0x38a   : > { %v1173_v42 = vsel %vm1169_vm1, %v1141_v40, -inf }
 0x38b   : > { %1177 = vmax.xlane.f32.xlu0 %v1176_v41  ;;  %v4246_v21 = vpop.f32.mrf.mxu0 }
 0x38c   : > { %v1188_v50 = vsel %vm1169_vm1, %v4246_v21, -inf }
 0x38d   : > { %1174 = vmax.xlane.f32.xlu1 %v1173_v42  ;;  %v1154_v43 = vpop.f32.mrf.mxu0 }
 0x38e   : > { %v1182_v44 = vsel %vm1169_vm1, %v1154_v43, -inf }
 0x38f   : > { %1183 = vmax.xlane.f32.xlu0 %v1182_v44  ;;  %v4247_v45 = vpop.f32.mrf.mxu0 }
 0x390   : > { %v1191_v48 = vsel %vm1169_vm1, %v4247_v45, -inf }
 0x391   : > { %1192 = vmax.xlane.f32.xlu1 %v1191_v48  ;;  %v1157_v49 = vpop.f32.mrf.mxu0 }
 0x392   : > { %v1185_v51 = vsel %vm1169_vm1, %v1157_v49, -inf }
 0x393   : > { %1189 = vmax.xlane.f32.xlu0 %v1188_v50 }
 0x395   : > { %1186 = vmax.xlane.f32.xlu1 %v1185_v51 }
 0x3a6   : > { %1363 = vrot.lane.b32.xlu1 %v5385_v39, %s5052_s4 }
 0x3aa   : > { %1361 = vrot.lane.b32.xlu1 %v5393_v12, %s5052_s4 }
 0x410   : > { %v1172_v52 = vpop.xlane.xlu0 %1171 }
 0x411   : > { %v1194_v56 = vsub.f32 %v1138_v33, %v1172_v52 }
 0x412   : > { %v1181_v57 = vpop.xlane.xlu1 %1180 }
 0x413   : > { %v1197_v58 = vsub.f32 %v4243_v35, %v1181_v57  ;;  %v1202_v0 = vmul.f32 1.442695, %v1194_v56 }
 0x414   : > { %v1178_v60 = vpop.xlane.xlu0 %1177 }
 0x415   : > { %v1208_v61 = vmul.f32 1.442695, %v1197_v58  ;;  %v1196_v62 = vsub.f32 %v4242_v32, %v1178_v60 }
 0x416   : > { %v1175_v1 = vpop.xlane.xlu1 %1174 }
 0x417   : > { %4629 = vpow2.f32 %v1208_v61  ;;  %v1206_v2 = vmul.f32 1.442695, %v1196_v62  ;;  %v1195_v3 = vsub.f32 %v1141_v40, %v1175_v1 }
 0x418   : > { %v1184_v13 = vpop.xlane.xlu0 %1183 }
 0x419   : > { %4631 = vpow2.f32 %v1206_v2  ;;  %v1204_v4 = vmul.f32 1.442695, %v1195_v3  ;;  %v1198_v23 = vsub.f32 %v1154_v43, %v1184_v13 }
 0x41a   : > { %4633 = vpow2.f32 %v1202_v0  ;;  %v1193_v15 = vpop.xlane.xlu1 %1192 }
 0x41b   : > { %4635 = vpow2.f32 %v1204_v4  ;;  %v1201_v17 = vsub.f32 %v4247_v45, %v1193_v15  ;;  %v1210_v32 = vmul.f32 1.442695, %v1198_v23 }
 0x41c   : > { %v1190_v16 = vpop.xlane.xlu0 %1189 }
 0x41d   : > { %v1200_v19 = vsub.f32 %v4246_v21, %v1190_v16  ;;  %v1216_v20 = vmul.f32 1.442695, %v1201_v17 }
 0x41e   : > { %v1187_v54 = vpop.xlane.xlu1 %1186 }
 0x41f   : > { %v1199_v22 = vsub.f32 %v1157_v49, %v1187_v54  ;;  %v1214_v26 = vmul.f32 1.442695, %v1200_v19  ;;  %4637 = vpow2.f32 %v1216_v20 }
 0x421   : > { %v1212_v27 = vmul.f32 1.442695, %v1199_v22  ;;  %4639 = vpow2.f32 %v1214_v26 }
 0x422   : > { %v1364_v43 = vpop.permute.xlu1 %1363 }
 0x423   : > { %4641 = vpow2.f32 %v1212_v27 }
 0x424   : > { %v5440_v38 = vpop.eup %4629  ;;  %4643 = vpow2.f32 %v1210_v32 }
 0x425   : > { %v1227_v31 = vsel %vm1169_vm1, %v5440_v38, 0.0 }
 0x426   : > { %v5444_v6 = vpop.eup %4631  ;;  %1228 = vadd.xlane.f32.xlu1 %v1227_v31  ;;  %v1362_v44 = vpop.permute.xlu1 %1361 }
 0x427   : > { %v5446_v7 = vpop.eup %4633  ;;  %v1224_v8 = vsel %vm1169_vm1, %v5444_v6, 0.0 }
 0x428   : > { %v5450_v46 = vpop.eup %4635  ;;  %1225 = vadd.xlane.f32.xlu0 %v1224_v8  ;;  %v1218_v11 = vsel %vm1169_vm1, %v5446_v7, 0.0  ;;  %v1386_v8 = vsel %vm1079_vm0, %v1364_v43, 0 }
 0x429   : > { %v1221_v10 = vsel %vm1169_vm1, %v5450_v46, 0.0 }
 0x42a   : > { %1222 = vadd.xlane.f32.xlu1 %v1221_v10 }
 0x42c   : > { %1219 = vadd.xlane.f32.xlu0 %v1218_v11  ;;  %v5460_v33 = vpop.eup %4637 }
 0x42d   : > { %v1239_v35 = vsel %vm1169_vm1, %v5460_v33, 0.0 }
 0x42e   : > { %v5462_v34 = vpop.eup %4639 }
 0x42f   : > { %v1236_v40 = vsel %vm1169_vm1, %v5462_v34, 0.0 }
 0x430   : > { %v5466_v37 = vpop.eup %4641 }
 0x431   : > { %v5470_v41 = vpop.eup %4643  ;;  %v1233_v21 = vsel %vm1169_vm1, %v5466_v37, 0.0 }
 0x432   : > { %v1230_v42 = vsel %vm1169_vm1, %v5470_v41, 0.0 }
 0x43b   : > { %1659 = vrot.lane.b32.xlu1 %v5382_v9, %s5053_s2 }
 0x442   : > { %1365 = vrot.lane.b32.xlu0 %v5382_v9, %s5052_s4 }
 0x45f   : > { %1240 = vadd.xlane.f32.xlu1 %v1239_v35 }
 0x461   : > { %1237 = vadd.xlane.f32.xlu0 %v1236_v40 }
 0x463   : > { %1234 = vadd.xlane.f32.xlu1 %v1233_v21 }
 0x465   : > { %1231 = vadd.xlane.f32.xlu0 %v1230_v42 }
 0x474   : > { %1657 = vrot.lane.b32.xlu1 %v5385_v39, %s5053_s2 }
 0x478   : > { %1349 = vrot.lane.b32.xlu1 %v5414_v24, %s5052_s4 }
 0x47b   : > { %1359 = vrot.lane.b32.xlu0 %v5401_v47, %s5052_s4 }
 0x47c   : > { %1351 = vrot.lane.b32.xlu1 %v5416_v25, %s5052_s4 }
 0x47f   : > { %1347 = vrot.lane.b32.xlu0 %v5355_v29, %s5052_s4 }
 0x480   : > { %1653 = vrot.lane.b32.xlu1 %v5401_v47, %s5053_s2 }
 0x483   : > { %1655 = vrot.lane.b32.xlu0 %v5393_v12, %s5053_s2 }
 0x484   : > { %1647 = vrot.lane.b32.xlu1 %v5414_v24, %s5053_s2 }
 0x487   : > { %1353 = vrot.lane.b32.xlu0 %v5424_v28, %s5052_s4 }
 0x488   : > { %1651 = vrot.lane.b32.xlu1 %v5424_v28, %s5053_s2 }
 0x48b   : > { %1645 = vrot.lane.b32.xlu0 %v5355_v29, %s5053_s2 }
 0x48f   : > { %1649 = vrot.lane.b32.xlu0 %v5416_v25, %s5053_s2 }
 0x4af   : > { %v1229_v45 = vpop.xlane.xlu1 %1228 }
 0x4b1   : > { %v1226_v48 = vpop.xlane.xlu0 %1225 }
 0x4b2   : > { %4645 = vrcp.f32 %v1226_v48 }
 0x4b3   : > { %v1223_v49 = vpop.xlane.xlu1 %1222 }
 0x4b4   : > { %4647 = vrcp.f32 %v1223_v49 }
 0x4b5   : > { %4649 = vrcp.f32 %v1229_v45  ;;  %v1220_v50 = vpop.xlane.xlu0 %1219 }
 0x4b6   : > { %4651 = vrcp.f32 %v1220_v50 }
 0x4b7   : > { %v1660_v51 = vpop.permute.xlu1 %1659 }
 0x4b8   : > { %4392 = vmatprep.subr.msk.bf16.mxu0 %vm1079_vm0, %v1660_v51  ;;  %v1683_v52 = vsel %vm1079_vm0, %v1660_v51, 0 }
 0x4b9   : > { %v1366_v56 = vpop.permute.xlu0 %1365  ;;  %4297 = vmatpush3.bf16.xpose.msra.mxu0 %v1683_v52 }
 0x4ba   : > { %4388 = vmatprep.subr.msk.bf16.mxu1 %vm1079_vm0, %v1366_v56  ;;  %v1389_v31 = vsel %vm1079_vm0, %v1366_v56, 0 }
 0x4bf   : > { %v4646_v57 = vpop.eup %4645 }
 0x4c0   : > { %v1247_v62 = vmul.f32 %v4646_v57, %v5444_v6  ;;  %v1383_v6 = vsel %vm1079_vm0, %v1362_v44, 0 }
 0x4c1   : > { %v4648_v58 = vpop.eup %4647 }
 0x4c2   : > { %v4650_v60 = vpop.eup %4649  ;;  %v1245_v1 = vmul.f32 %v4648_v58, %v5450_v46 }
 0x4c3   : > { %v4652_v61 = vpop.eup %4651  ;;  %v1249_v2 = vmul.f32 %v4650_v60, %v5440_v38 }
 0x4c4   : > { %v1243_v0 = vmul.f32 %v4652_v61, %v5446_v7 }
 0x4c5   : > { %v1259_v4 = vpack.c.bf16 %v1249_v2, %v1247_v62 }
 0x4c6   : > { %v1258_v3 = vpack.c.bf16 %v1245_v1, %v1243_v0 }
 0x4c8   : > { %4256 = vmatprep.mubr.msk.bf16.mxu1 %vm1169_vm1, %v1258_v3 }
 0x4c9   : > { %4257 = vmatmul.mubr.msk.bf16.vlgmr.msra.gmra.mxu1 %vm1169_vm1, %v1259_v4 }
 0x4ca   : > { %4265 = vmatpush3.bf16.xpose.msra.mxu1 %v1389_v31 }
 0x4cb   : > { %4389 = vmatprep.subr.msk.bf16.mxu1 %vm1079_vm0, %v1364_v43 }
 0x4d2   : > { %4267 = vmatpush3.bf16.xpose.msra.mxu1 %v1386_v8 }
 0x4d3   : > { %4390 = vmatprep.subr.msk.bf16.mxu1 %vm1079_vm0, %v1362_v44 }
 0x4da   : > { %4269 = vmatpush3.bf16.xpose.msra.mxu1 %v1383_v6 }
 0x4e8   : > { %v1241_v38 = vpop.xlane.xlu1 %1240 }
 0x4ea   : > { %v1238_v7 = vpop.xlane.xlu0 %1237 }
 0x4eb   : > { %4653 = vrcp.f32 %v1238_v7 }
 0x4ec   : > { %v1235_v46 = vpop.xlane.xlu1 %1234 }
 0x4ed   : > { %4655 = vrcp.f32 %v1235_v46 }
 0x4ee   : > { %4657 = vrcp.f32 %v1241_v38  ;;  %v1232_v10 = vpop.xlane.xlu0 %1231 }
 0x4ef   : > { %4659 = vrcp.f32 %v1232_v10 }
 0x4f0   : > { %v1658_v11 = vpop.permute.xlu1 %1657 }
 0x4f1   : > { %4393 = vmatprep.subr.msk.bf16.mxu0 %vm1079_vm0, %v1658_v11  ;;  %v1680_v13 = vsel %vm1079_vm0, %v1658_v11, 0 }
 0x4f2   : > { %v1360_v15 = vpop.permute.xlu0 %1359  ;;  %4299 = vmatpush3.bf16.xpose.msra.mxu0 %v1680_v13 }
 0x4f3   : > { %4391 = vmatprep.subr.msk.bf16.mxu1 %vm1079_vm0, %v1360_v15  ;;  %v1380_v16 = vsel %vm1079_vm0, %v1360_v15, 0 }
 0x4f4   : > { %4271 = vmatpush3.bf16.xpose.msra.mxu1 %v1380_v16  ;;  %v1350_v17 = vpop.permute.xlu1 %1349 }
 0x4f6   : > { %v1348_v54 = vpop.permute.xlu0 %1347 }
 0x4f8   : > { %v1352_v19 = vpop.permute.xlu1 %1351  ;;  %v4654_v20 = vpop.eup %4653 }
 0x4f9   : > { %v1255_v40 = vmul.f32 %v4654_v20, %v5462_v34 }
 0x4fa   : > { %v4656_v22 = vpop.eup %4655  ;;  %v1656_v23 = vpop.permute.xlu0 %1655 }
 0x4fb   : > { %v4658_v26 = vpop.eup %4657  ;;  %4394 = vmatprep.subr.msk.bf16.mxu0 %vm1079_vm0, %v1656_v23  ;;  %v1677_v27 = vsel %vm1079_vm0, %v1656_v23, 0  ;;  %v1253_v42 = vmul.f32 %v4656_v22, %v5466_v37 }
 0x4fc   : > { %v4660_v32 = vpop.eup %4659  ;;  %4301 = vmatpush3.bf16.xpose.msra.mxu0 %v1677_v27  ;;  %v1654_v35 = vpop.permute.xlu1 %1653  ;;  %v1257_v44 = vmul.f32 %v4658_v26, %v5460_v33 }
 0x4fd   : > { %4395 = vmatprep.subr.msk.bf16.mxu0 %vm1079_vm0, %v1654_v35  ;;  %v1251_v21 = vmul.f32 %v4660_v32, %v5470_v41  ;;  %v1674_v34 = vsel %vm1079_vm0, %v1654_v35, 0 }
 0x4fe   : > { %v1354_v43 = vpop.permute.xlu0 %1353  ;;  %v1261_v48 = vpack.c.bf16 %v1257_v44, %v1255_v40 }
 0x4ff   : > { %v1260_v45 = vpack.c.bf16 %v1253_v42, %v1251_v21 }
 0x500   : > { %v1648_v41 = vpop.permute.xlu1 %1647 }
 0x501   : > { %4260 = vmatprep.mubr.msk.bf16.mxu1 %vm1169_vm1, %v1260_v45 }
 0x502   : > { %v1646_v49 = vpop.permute.xlu0 %1645  ;;  %4261 = vmatmul.mubr.msk.bf16.gmra.mxu1 %vm1169_vm1, %v1261_v48 }
 0x503   : > { %4272 = vmatprep.mubr.msk.bf16.mxu1 %vm1079_vm0, %v1348_v54  ;;  %4304 = vmatprep.mubr.msk.bf16.mxu0 %vm1079_vm0, %v1646_v49 }
 0x504   : > { %4303 = vmatpush3.bf16.xpose.msra.mxu0 %v1674_v34  ;;  %v1652_v33 = vpop.permute.xlu1 %1651 }
 0x506   : > { %v1650_v37 = vpop.permute.xlu0 %1649 }
 0x50a   : > { %4273 = vmatmul.mubr.msk.bf16.vlgmr.msra.gmra.mxu1 %vm1079_vm0, %v1350_v17 }
 0x50b   : > { %4276 = vmatprep.mubr.msk.bf16.mxu1 %vm1079_vm0, %v1352_v19  ;;  %4305 = vmatmul.mubr.msk.bf16.vlgmr.msra.gmra.mxu0 %vm1079_vm0, %v1648_v41 }
 0x50c   : > { %4308 = vmatprep.mubr.msk.bf16.mxu0 %vm1079_vm0, %v1650_v37 }
 0x512   : > { %4277 = vmatmul.mubr.msk.bf16.gmra.mxu1 %vm1079_vm0, %v1354_v43 }
 0x513   : > { %4309 = vmatmul.mubr.msk.bf16.gmra.mxu0 %vm1079_vm0, %v1652_v33 }
 0x589   : > { %v5536_v50 = vpop.f32.mrf.mxu1 }
 0x58b   : > { %v5538_v51 = vpop.f32.mrf.mxu1 }
 0x58d   : > { %v5540_v52 = vpop.f32.mrf.mxu1 }
 0x58e   : > { %v1340_v56 = vpack.c.bf16 %v5540_v52, %v5536_v50 }
 0x58f   : > { %v5544_v57 = vpop.f32.mrf.mxu1 }
 0x590   : > { %v1339_v58 = vpack.c.bf16 %v5544_v57, %v5538_v51 }
 0x5c2   : > { %v5548_v60 = vpop.f32.mrf.mxu1 }
 0x5c4   : > { %v5550_v61 = vpop.f32.mrf.mxu1 }
 0x5c6   : > { %v5552_v62 = vpop.f32.mrf.mxu1 }
 0x5c8   : > { %v5556_v1 = vpop.f32.mrf.mxu1 }
 0x5ca   : > { %v5560_v3 = vpop.f32.mrf.mxu1 }
 0x5cb   : > { %v4306_v4 = vpop.f32.mrf.mxu0  ;;  %v1462_v22 = vsel %vm1169_vm1, %v5560_v3, -inf }
 0x5cc   : > { %v5563_v6 = vpop.f32.mrf.mxu1  ;;  %v1756_v46 = vsel %vm1169_vm1, %v4306_v4, -inf }
 0x5cd   : > { %v1719_v31 = vpop.f32.mrf.mxu0  ;;  %v1456_v27 = vsel %vm1169_vm1, %v5563_v6, -inf }
 0x5ce   : > { %v1750_v8 = vsel %vm1169_vm1, %v1719_v31, -inf  ;;  %v5567_v11 = vpop.f32.mrf.mxu1 }
 0x5cf   : > { %1751 = vmax.xlane.f32.xlu0 %v1750_v8  ;;  %v4307_v38 = vpop.f32.mrf.mxu0  ;;  %v1465_v40 = vsel %vm1169_vm1, %v5567_v11, -inf }
 0x5d0   : > { %v1759_v16 = vsel %vm1169_vm1, %v4307_v38, -inf  ;;  %v5576_v54 = vpop.f32.mrf.mxu1 }
 0x5d1   : > { %v1722_v7 = vpop.f32.mrf.mxu0  ;;  %v1459_v32 = vsel %vm1169_vm1, %v5576_v54, -inf }
 0x5d2   : > { %v1753_v10 = vsel %vm1169_vm1, %v1722_v7, -inf  ;;  %v5583_v26 = vpop.f32.mrf.mxu1 }
 0x5d3   : > { %1757 = vmax.xlane.f32.xlu0 %v1756_v46  ;;  %1754 = vmax.xlane.f32.xlu1 %v1753_v10  ;;  %v5569_v13 = vpop.f32.mrf.mxu0  ;;  %v1474_v43 = vsel %vm1169_vm1, %v5583_v26, -inf }
 0x5d4   : > { %v5589_v35 = vpop.f32.mrf.mxu1  ;;  %v1768_v34 = vsel %vm1169_vm1, %v5569_v13, -inf }
 0x5d5   : > { %v5571_v15 = vpop.f32.mrf.mxu0  ;;  %v1468_v48 = vsel %vm1169_vm1, %v5589_v35, -inf }
 0x5d6   : > { %v1762_v17 = vsel %vm1169_vm1, %v5571_v15, -inf  ;;  %v5595_v42 = vpop.f32.mrf.mxu1 }
 0x5d7   : > { %1760 = vmax.xlane.f32.xlu1 %v1759_v16  ;;  %1763 = vmax.xlane.f32.xlu0 %v1762_v17  ;;  %v5578_v19 = vpop.f32.mrf.mxu0  ;;  %v1477_v44 = vsel %vm1169_vm1, %v5595_v42, -inf }
 0x5d8   : > { %v1771_v21 = vsel %vm1169_vm1, %v5578_v19, -inf  ;;  %v5601_v45 = vpop.f32.mrf.mxu1 }
 0x5d9   : > { %v1738_v20 = vpop.f32.mrf.mxu0  ;;  %v1471_v49 = vsel %vm1169_vm1, %v5601_v45, -inf }
 0x5da   : > { %v1765_v23 = vsel %vm1169_vm1, %v1738_v20, -inf }
 0x5db   : > { %1463 = vmax.xlane.f32.xlu0 %v1462_v22  ;;  %1766 = vmax.xlane.f32.xlu1 %v1765_v23 }
 0x5df   : > { %1457 = vmax.xlane.f32.xlu0 %v1456_v27  ;;  %1460 = vmax.xlane.f32.xlu1 %v1459_v32 }
 0x5e3   : > { %1466 = vmax.xlane.f32.xlu0 %v1465_v40  ;;  %1772 = vmax.xlane.f32.xlu1 %v1771_v21 }
 0x5e7   : > { %1475 = vmax.xlane.f32.xlu0 %v1474_v43  ;;  %1478 = vmax.xlane.f32.xlu1 %v1477_v44 }
 0x5eb   : > { %1469 = vmax.xlane.f32.xlu0 %v1468_v48  ;;  %1472 = vmax.xlane.f32.xlu1 %v1471_v49 }
 0x5ef   : > { %1769 = vmax.xlane.f32.xlu0 %v1768_v34 }
 0x605   : > { %1558 = vrot.lane.b32.xlu0 %v5364_v53, %s5052_s4 }
 0x609   : > { %1554 = vrot.lane.b32.xlu0 %v5372_v30, %s5052_s4 }
 0x60d   : > { %1552 = vrot.lane.b32.xlu0 %v5378_v5, %s5052_s4 }
 0x611   : > { %1848 = vrot.lane.b32.xlu0 %v5364_v53, %s5053_s2 }
 0x615   : > { %1844 = vrot.lane.b32.xlu0 %v5372_v30, %s5053_s2 }
 0x658   : > { %v1752_v41 = vpop.xlane.xlu0 %1751 }
 0x659   : > { %v1774_v37 = vsub.f32 %v1719_v31, %v1752_v41 }
 0x65b   : > { %v1782_v33 = vmul.f32 1.442695, %v1774_v37 }
 0x65c   : > { %v1758_v8 = vpop.xlane.xlu0 %1757  ;;  %v1755_v46 = vpop.xlane.xlu1 %1754 }
 0x65d   : > { %4661 = vpow2.f32 %v1782_v33  ;;  %v1776_v10 = vsub.f32 %v4306_v4, %v1758_v8  ;;  %v1775_v16 = vsub.f32 %v1722_v7, %v1755_v46 }
 0x65f   : > { %v1784_v17 = vmul.f32 1.442695, %v1775_v16  ;;  %v1786_v22 = vmul.f32 1.442695, %v1776_v10 }
 0x660   : > { %v5619_v23 = vpop.xlane.xlu0 %1763  ;;  %v1761_v27 = vpop.xlane.xlu1 %1760 }
 0x661   : > { %v1777_v32 = vsub.f32 %v4307_v38, %v1761_v27  ;;  %4663 = vpow2.f32 %v1784_v17 }
 0x662   : > { %4665 = vpow2.f32 %v1786_v22 }
 0x663   : > { %v1788_v40 = vmul.f32 1.442695, %v1777_v32 }
 0x664   : > { %v1464_v21 = vpop.xlane.xlu0 %1463  ;;  %v1767_v43 = vpop.xlane.xlu1 %1766 }
 0x665   : > { %v1482_v44 = vsub.f32 %v5560_v3, %v1464_v21  ;;  %v1779_v31 = vsub.f32 %v1738_v20, %v1767_v43  ;;  %4667 = vpow2.f32 %v1788_v40 }
 0x667   : > { %v1792_v48 = vmul.f32 1.442695, %v1779_v31  ;;  %v1492_v49 = vmul.f32 1.442695, %v1482_v44 }
 0x668   : > { %v1458_v34 = vpop.xlane.xlu0 %1457  ;;  %v1461_v3 = vpop.xlane.xlu1 %1460 }
 0x669   : > { %v1480_v4 = vsub.f32 %v5563_v6, %v1458_v34  ;;  %4669 = vpow2.f32 %v1792_v48 }
 0x66a   : > { %v5623_v7 = vpop.eup %4661  ;;  %4671 = vpow2.f32 %v1492_v49 }
 0x66b   : > { %v1798_v38 = vsel %vm1169_vm1, %v5623_v7, 0.0  ;;  %v1488_v41 = vmul.f32 1.442695, %v1480_v4 }
 0x66c   : > { %v1467_v37 = vpop.xlane.xlu0 %1466  ;;  %1799 = vadd.xlane.f32.xlu1 %v1798_v38  ;;  %v1773_v27 = vpop.xlane.xlu1 %1772 }
 0x66d   : > { %4673 = vpow2.f32 %v1488_v41  ;;  %v1781_v43 = vsub.f32 %v5578_v19, %v1773_v27 }
 0x66e   : > { %v5627_v33 = vpop.eup %4663 }
 0x66f   : > { %v1801_v8 = vsel %vm1169_vm1, %v5627_v33, 0.0  ;;  %v5631_v46 = vpop.eup %4665  ;;  %v1796_v34 = vmul.f32 1.442695, %v1781_v43  ;;  %v1483_v43 = vsub.f32 %v5567_v11, %v1467_v37 }
 0x670   : > { %v1476_v20 = vpop.xlane.xlu0 %1475  ;;  %1802 = vadd.xlane.f32.xlu1 %v1801_v8  ;;  %v1804_v17 = vsel %vm1169_vm1, %v5631_v46, 0.0 }
 0x671   : > { %v1486_v6 = vsub.f32 %v5583_v26, %v1476_v20 }
 0x672   : > { %v5636_v22 = vpop.eup %4667 }
 0x673   : > { %v1500_v10 = vmul.f32 1.442695, %v1486_v6  ;;  %v1807_v26 = vsel %vm1169_vm1, %v5636_v22, 0.0 }
 0x674   : > { %v1470_v16 = vpop.xlane.xlu0 %1469  ;;  %1805 = vadd.xlane.f32.xlu1 %v1804_v17 }
 0x675   : > { %4675 = vpow2.f32 %v1500_v10  ;;  %v1484_v32 = vsub.f32 %v5589_v35, %v1470_v16 }
 0x676   : > { %v5639_v40 = vpop.eup %4669 }
 0x677   : > { %v1496_v21 = vmul.f32 1.442695, %v1484_v32  ;;  %v1813_v31 = vsel %vm1169_vm1, %v5639_v40, 0.0  ;;  %v5646_v48 = vpop.eup %4671  ;;  %v1778_v32 = vsub.f32 %v5571_v15, %v5619_v23 }
 0x678   : > { %v1770_v44 = vpop.xlane.xlu0 %1769  ;;  %1808 = vadd.xlane.f32.xlu1 %v1807_v26  ;;  %1814 = vadd.xlane.f32.xlu0 %v1813_v31  ;;  %v1510_v19 = vsel %vm1169_vm1, %v5646_v48, 0.0  ;;  %v1481_v26 = vsub.f32 %v5576_v54, %v1461_v3  ;;  %v1494_v31 = vmul.f32 1.442695, %v1483_v43 }
 0x679   : > { %4677 = vpow2.f32 %v1496_v21  ;;  %v1780_v49 = vsub.f32 %v5569_v13, %v1770_v44  ;;  %v1790_v21 = vmul.f32 1.442695, %v1778_v32  ;;  %v1479_v44 = vpop.xlane.xlu1 %1478 }
 0x67a   : > { %v5651_v38 = vpop.eup %4673 }
 0x67b   : > { %v1794_v35 = vmul.f32 1.442695, %v1780_v49  ;;  %v1504_v41 = vsel %vm1169_vm1, %v5651_v38, 0.0  ;;  %v1490_v49 = vmul.f32 1.442695, %v1481_v26 }
 0x67c   : > { %v1559_v4 = vpop.permute.xlu0 %1558  ;;  %1511 = vadd.xlane.f32.xlu0 %v1510_v19 }
 0x67d   : > { %4679 = vpow2.f32 %v1794_v35  ;;  %4280 = vmatprep.subr.bf16.mxu1 %v1559_v4  ;;  %v1487_v35 = vsub.f32 %v5595_v42, %v1479_v44 }
 0x67e   : > { %4281 = vmatpush3.bf16.msra.mxu1 %v1559_v4  ;;  %4681 = vpow2.f32 %v1796_v34  ;;  %v1473_v34 = vpop.xlane.xlu1 %1472 }
 0x67f   : > { %4683 = vpow2.f32 %v1790_v21  ;;  %v1502_v4 = vmul.f32 1.442695, %v1487_v35  ;;  %v1485_v15 = vsub.f32 %v5601_v45, %v1473_v34 }
 0x680   : > { %1505 = vadd.xlane.f32.xlu0 %v1504_v41  ;;  %4685 = vpow2.f32 %v1494_v31 }
 0x681   : > { %4687 = vpow2.f32 %v1490_v49  ;;  %v1498_v11 = vmul.f32 1.442695, %v1485_v15 }
 0x682   : > { %v5655_v13 = vpop.eup %4675  ;;  %4689 = vpow2.f32 %v1502_v4 }
 0x683   : > { %v1522_v20 = vsel %vm1169_vm1, %v5655_v13, 0.0  ;;  %4691 = vpow2.f32 %v1498_v11 }
 0x684   : > { %1523 = vadd.xlane.f32.xlu0 %v1522_v20 }
 0x686   : > { %v5659_v8 = vpop.eup %4677 }
 0x687   : > { %v1516_v6 = vsel %vm1169_vm1, %v5659_v8, 0.0 }
 0x688   : > { %1517 = vadd.xlane.f32.xlu0 %v1516_v6 }
 0x689   : > { %1556 = vrot.lane.b32.xlu1 %v5366_v59, %s5052_s4 }
 0x68a   : > { %v5663_v10 = vpop.eup %4679 }
 0x68b   : > { %v1816_v16 = vsel %vm1169_vm1, %v5663_v10, 0.0  ;;  %v5669_v17 = vpop.eup %4681 }
 0x68c   : > { %1817 = vadd.xlane.f32.xlu0 %v1816_v16  ;;  %v1819_v27 = vsel %vm1169_vm1, %v5669_v17, 0.0  ;;  %v5685_v54 = vpop.eup %4683 }
 0x68d   : > { %1846 = vrot.lane.b32.xlu1 %v5366_v59, %s5053_s2  ;;  %v1810_v42 = vsel %vm1169_vm1, %v5685_v54, 0.0  ;;  %v5691_v23 = vpop.eup %4685 }
 0x68e   : > { %v5695_v45 = vpop.eup %4687 }
 0x68f   : > { %v5699_v37 = vpop.eup %4689 }
 0x690   : > { %1820 = vadd.xlane.f32.xlu0 %v1819_v27  ;;  %v5703_v3 = vpop.eup %4691 }
 0x691   : > { %v1519_v19 = vsel %vm1169_vm1, %v5703_v3, 0.0 }
 0x6a6   : > { %1949 = vrot.lane.b32.xlu0 %v5382_v9, %s5054_s13  ;;  %v1513_v9 = vsel %vm1169_vm1, %v5691_v23, 0.0 }
 0x6aa   : > { %1935 = vrot.lane.b32.xlu0 %v5355_v29, %s5054_s13  ;;  %v1507_v29 = vsel %vm1169_vm1, %v5695_v45, 0.0 }
 0x6ae   : > { %1939 = vrot.lane.b32.xlu0 %v5416_v25, %s5054_s13  ;;  %v1525_v25 = vsel %vm1169_vm1, %v5699_v37, 0.0 }
 0x6b1   : > { %1811 = vadd.xlane.f32.xlu1 %v1810_v42 }
 0x6b5   : > { %1514 = vadd.xlane.f32.xlu1 %v1513_v9 }
 0x6b9   : > { %1508 = vadd.xlane.f32.xlu1 %v1507_v29 }
 0x6bd   : > { %1526 = vadd.xlane.f32.xlu1 %v1525_v25 }
 0x6c1   : > { %1520 = vadd.xlane.f32.xlu1 %v1519_v19 }
 0x6d2   : > { %1842 = vrot.lane.b32.xlu1 %v5378_v5, %s5053_s2 }
 0x6d6   : > { %1947 = vrot.lane.b32.xlu1 %v5385_v39, %s5054_s13  ;;  %v1555_v39 = vpop.permute.xlu0 %1554 }
 0x6da   : > { %1945 = vrot.lane.b32.xlu1 %v5393_v12, %s5054_s13 }
 0x6de   : > { %1943 = vrot.lane.b32.xlu1 %v5401_v47, %s5054_s13 }
 0x6e2   : > { %1937 = vrot.lane.b32.xlu1 %v5414_v24, %s5054_s13 }
 0x6e6   : > { %1941 = vrot.lane.b32.xlu1 %v5424_v28, %s5054_s13  ;;  %v1553_v28 = vpop.permute.xlu0 %1552 }
 0x6ea   : > { %v1849_v44 = vpop.permute.xlu0 %1848 }
 0x6ee   : > { %v1845_v49 = vpop.permute.xlu0 %1844 }
 0x6f5   : > { %v1800_v41 = vpop.xlane.xlu1 %1799 }
 0x6f6   : > { %4693 = vrcp.f32 %v1800_v41 }
 0x6f9   : > { %v1803_v20 = vpop.xlane.xlu1 %1802 }
 0x6fa   : > { %4695 = vrcp.f32 %v1803_v20 }
 0x6fd   : > { %v1806_v6 = vpop.xlane.xlu1 %1805 }
 0x6fe   : > { %4697 = vrcp.f32 %v1806_v6 }
 0x701   : > { %v1809_v16 = vpop.xlane.xlu1 %1808  ;;  %v1815_v35 = vpop.xlane.xlu0 %1814 }
 0x702   : > { %4699 = vrcp.f32 %v1809_v16 }
 0x703   : > { %v4694_v27 = vpop.eup %4693 }
 0x704   : > { %v5720_v47 = vmul.f32 %v4694_v27, %v5623_v7 }
 0x705   : > { %v1557_v12 = vpop.permute.xlu1 %1556  ;;  %v1512_v34 = vpop.xlane.xlu0 %1511 }
 0x706   : > { %4282 = vmatprep.subr.bf16.mxu1 %v1557_v12 }
 0x707   : > { %v4696_v32 = vpop.eup %4695  ;;  %4283 = vmatpush3.bf16.msra.mxu1 %v1557_v12 }
 0x708   : > { %4284 = vmatprep.subr.bf16.mxu1 %v1555_v39  ;;  %v5723_v24 = vmul.f32 %v4696_v32, %v5627_v33 }
 0x709   : > { %v1847_v4 = vpop.permute.xlu1 %1846  ;;  %v1506_v15 = vpop.xlane.xlu0 %1505 }
 0x70a   : > { %v1838_v21 = vpack.c.bf16 %v5723_v24, %v5720_v47 }
 0x70b   : > { %4285 = vmatpush3.bf16.msra.mxu1 %v1555_v39  ;;  %v4698_v43 = vpop.eup %4697 }
 0x70c   : > { %4286 = vmatprep.subr.bf16.mxu1 %v1553_v28  ;;  %v5728_v31 = vmul.f32 %v4698_v43, %v5631_v46 }
 0x70d   : > { %v1524_v9 = vpop.xlane.xlu0 %1523 }
 0x70f   : > { %4287 = vmatpush3.bf16.msra.mxu1 %v1553_v28  ;;  %v4700_v26 = vpop.eup %4699 }
 0x710   : > { %4312 = vmatprep.subr.bf16.mxu1 %v1849_v44  ;;  %v5731_v7 = vmul.f32 %v4700_v26, %v5636_v22 }
 0x711   : > { %v1518_v46 = vpop.xlane.xlu0 %1517 }
 0x712   : > { %v1839_v33 = vpack.c.bf16 %v5731_v7, %v5728_v31 }
 0x715   : > { %v1818_v6 = vpop.xlane.xlu0 %1817 }
 0x73a   : > { %v1812_v11 = vpop.xlane.xlu1 %1811 }
 0x73e   : > { %v1515_v42 = vpop.xlane.xlu1 %1514 }
 0x73f   : > { %4701 = vrcp.f32 %v1515_v42 }
 0x740   : > { %4703 = vrcp.f32 %v1506_v15 }
 0x741   : > { %4705 = vrcp.f32 %v1512_v34  ;;  %v1821_v34 = vpop.xlane.xlu0 %1820 }
 0x742   : > { %v1509_v29 = vpop.xlane.xlu1 %1508 }
 0x743   : > { %4707 = vrcp.f32 %v1509_v29 }
 0x746   : > { %v1527_v25 = vpop.xlane.xlu1 %1526 }
 0x747   : > { %4709 = vrcp.f32 %v1527_v25 }
 0x748   : > { %4711 = vrcp.f32 %v1518_v46 }
 0x749   : > { %4713 = vrcp.f32 %v1524_v9 }
 0x74a   : > { %v1521_v22 = vpop.xlane.xlu1 %1520 }
 0x74b   : > { %4715 = vrcp.f32 %v1521_v22 }
 0x74c   : > { %v4702_v19 = vpop.eup %4701  ;;  %4717 = vrcp.f32 %v1812_v11 }
 0x74d   : > { %v4704_v41 = vpop.eup %4703  ;;  %v1535_v39 = vmul.f32 %v4702_v19, %v5691_v23  ;;  %4719 = vrcp.f32 %v1815_v35 }
 0x74e   : > { %v4706_v20 = vpop.eup %4705  ;;  %v1529_v27 = vmul.f32 %v4704_v41, %v5651_v38  ;;  %4721 = vrcp.f32 %v1821_v34 }
 0x74f   : > { %v1533_v32 = vmul.f32 %v4706_v20, %v5646_v48  ;;  %4723 = vrcp.f32 %v1818_v6 }
 0x750   : > { %v4708_v16 = vpop.eup %4707 }
 0x751   : > { %v1531_v12 = vmul.f32 %v4708_v16, %v5695_v45  ;;  %v1545_v43 = vpack.c.bf16 %v1535_v39, %v1533_v32 }
 0x753   : > { %v1544_v28 = vpack.c.bf16 %v1531_v12, %v1529_v27 }
 0x754   : > { %v4710_v26 = vpop.eup %4709 }
 0x755   : > { %4288 = vmatprep.mubr.msk.bf16.mxu1 %vm1169_vm1, %v1544_v28  ;;  %v4712_v15 = vpop.eup %4711  ;;  %v1543_v38 = vmul.f32 %v4710_v26, %v5699_v37  ;;  %v1950_v37 = vpop.permute.xlu0 %1949 }
 0x756   : > { %4289 = vmatmul.mubr.msk.bf16.vlgmr.msra.gmra.mxu1 %vm1169_vm1, %v1545_v43  ;;  %v4714_v42 = vpop.eup %4713  ;;  %v1537_v45 = vmul.f32 %v4712_v15, %v5659_v8  ;;  %v1973_v25 = vsel %vm1079_vm0, %v1950_v37, 0 }
 0x757   : > { %4313 = vmatpush3.bf16.msra.mxu1 %v1849_v44  ;;  %v1541_v35 = vmul.f32 %v4714_v42, %v5655_v13  ;;  %v1843_v44 = vpop.permute.xlu1 %1842 }
 0x758   : > { %v4716_v23 = vpop.eup %4715  ;;  %4314 = vmatprep.subr.bf16.mxu1 %v1847_v4 }
 0x759   : > { %v1539_v48 = vmul.f32 %v4716_v23, %v5703_v3  ;;  %v1547_v9 = vpack.c.bf16 %v1543_v38, %v1541_v35  ;;  %v4718_v29 = vpop.eup %4717 }
 0x75a   : > { %v4720_v8 = vpop.eup %4719  ;;  %v1831_v13 = vmul.f32 %v4718_v29, %v5685_v54 }
 0x75b   : > { %4315 = vmatpush3.bf16.msra.mxu1 %v1847_v4  ;;  %v1546_v11 = vpack.c.bf16 %v1539_v48, %v1537_v45  ;;  %v1833_v3 = vmul.f32 %v4720_v8, %v5639_v40  ;;  %v4722_v4 = vpop.eup %4721  ;;  %v1948_v24 = vpop.permute.xlu1 %1947 }
 0x75c   : > { %4316 = vmatprep.subr.bf16.mxu1 %v1845_v49  ;;  %v4724_v47 = vpop.eup %4723  ;;  %v1837_v40 = vmul.f32 %v4722_v4, %v5669_v17  ;;  %v1970_v22 = vsel %vm1079_vm0, %v1948_v24, 0 }
 0x75d   : > { %4292 = vmatprep.mubr.msk.bf16.mxu1 %vm1169_vm1, %v1546_v11  ;;  %v1840_v46 = vpack.c.bf16 %v1833_v3, %v1831_v13  ;;  %v1835_v54 = vmul.f32 %v4724_v47, %v5663_v10 }
 0x75e   : > { %4293 = vmatmul.mubr.msk.bf16.gmra.mxu1 %vm1169_vm1, %v1547_v9 }
 0x75f   : > { %4317 = vmatpush3.bf16.msra.mxu1 %v1845_v49  ;;  %4320 = vmatprep.mubr.msk.bf16.mxu1 %vm1169_vm1, %v1838_v21  ;;  %v1841_v21 = vpack.c.bf16 %v1837_v40, %v1835_v54  ;;  %v1936_v49 = vpop.permute.xlu0 %1935  ;;  %v1946_v31 = vpop.permute.xlu1 %1945 }
 0x760   : > { %4318 = vmatprep.subr.bf16.mxu1 %v1843_v44  ;;  %v1967_v7 = vsel %vm1079_vm0, %v1946_v31, 0 }
 0x763   : > { %4319 = vmatpush3.bf16.msra.mxu1 %v1843_v44  ;;  %v1940_v19 = vpop.permute.xlu0 %1939 }
 0x764   : > { %4396 = vmatprep.subr.msk.bf16.mxu1 %vm1079_vm0, %v1950_v37 }
 0x766   : > { %4321 = vmatmul.mubr.msk.bf16.vlgmr.msra.gmra.mxu1 %vm1169_vm1, %v1839_v33  ;;  %v1944_v33 = vpop.permute.xlu1 %1943 }
 0x767   : > { %4329 = vmatpush3.bf16.xpose.msra.mxu1 %v1973_v25  ;;  %4324 = vmatprep.mubr.msk.bf16.mxu1 %vm1169_vm1, %v1840_v46  ;;  %v1964_v10 = vsel %vm1079_vm0, %v1944_v33, 0 }
 0x768   : > { %4397 = vmatprep.subr.msk.bf16.mxu1 %vm1079_vm0, %v1948_v24 }
 0x76a   : > { %v1938_v17 = vpop.permute.xlu1 %1937 }
 0x76e   : > { %4325 = vmatmul.mubr.msk.bf16.gmra.mxu1 %vm1169_vm1, %v1841_v21  ;;  %v1942_v41 = vpop.permute.xlu1 %1941 }
 0x76f   : > { %4331 = vmatpush3.bf16.xpose.msra.mxu1 %v1970_v22  ;;  %4336 = vmatprep.mubr.msk.bf16.mxu1 %vm1079_vm0, %v1936_v49 }
 0x770   : > { %4398 = vmatprep.subr.msk.bf16.mxu1 %vm1079_vm0, %v1946_v31 }
 0x777   : > { %4333 = vmatpush3.bf16.xpose.msra.mxu1 %v1967_v7 }
 0x778   : > { %4399 = vmatprep.subr.msk.bf16.mxu1 %vm1079_vm0, %v1944_v33 }
 0x77f   : > { %4335 = vmatpush3.bf16.xpose.msra.mxu1 %v1964_v10 }
 0x786   : > { %4337 = vmatmul.mubr.msk.bf16.vlgmr.msra.gmra.mxu1 %vm1079_vm0, %v1938_v17 }
 0x787   : > { %4340 = vmatprep.mubr.msk.bf16.mxu1 %vm1079_vm0, %v1940_v19 }
 0x78e   : > { %4341 = vmatmul.mubr.msk.bf16.gmra.mxu1 %vm1079_vm0, %v1942_v41 }
 0x78f   : > { %2806 = vmatprep.mubr.bf16.mxu1 %v6607_v14 }
 0x816   : > { %v5774_v20 = vpop.f32.mrf.mxu1 }
 0x818   : > { %v5776_v6 = vpop.f32.mrf.mxu1 }
 0x81a   : > { %v5778_v16 = vpop.f32.mrf.mxu1 }
 0x81b   : > { %v1642_v39 = vpack.c.bf16 %v5778_v16, %v5774_v20 }
 0x81c   : > { %v5782_v27 = vpop.f32.mrf.mxu1 }
 0x81d   : > { %v1641_v12 = vpack.c.bf16 %v5782_v27, %v5776_v6 }
 0x81e   : > { %v5786_v32 = vpop.f32.mrf.mxu1 }
 0x820   : > { %v5788_v28 = vpop.f32.mrf.mxu1 }
 0x822   : > { %v5790_v43 = vpop.f32.mrf.mxu1 }
 0x823   : > { %v1644_v26 = vpack.c.bf16 %v5790_v43, %v5786_v32 }
 0x824   : > { %v5794_v34 = vpop.f32.mrf.mxu1 }
 0x825   : > { %v1643_v15 = vpack.c.bf16 %v5794_v34, %v5788_v28 }
 0x826   : > { %v5798_v42 = vpop.f32.mrf.mxu1 }
 0x828   : > { %v5800_v23 = vpop.f32.mrf.mxu1 }
 0x82a   : > { %v5802_v38 = vpop.f32.mrf.mxu1 }
 0x82b   : > { %v1932_v45 = vpack.c.bf16 %v5802_v38, %v5798_v42 }
 0x82c   : > { %v5806_v48 = vpop.f32.mrf.mxu1 }
 0x82d   : > { %v1931_v35 = vpack.c.bf16 %v5806_v48, %v5800_v23 }
 0x82e   : > { %v5810_v11 = vpop.f32.mrf.mxu1 }
 0x830   : > { %v5812_v9 = vpop.f32.mrf.mxu1 }
 0x832   : > { %v5814_v29 = vpop.f32.mrf.mxu1 }
 0x833   : > { %v1934_v44 = vpack.c.bf16 %v5814_v29, %v5810_v11 }
 0x834   : > { %v5818_v8 = vpop.f32.mrf.mxu1 }
 0x835   : > { %v1933_v13 = vpack.c.bf16 %v5818_v8, %v5812_v9 }
 0x846   : > { %v4338_v37 = vpop.f32.mrf.mxu1 }
 0x847   : > { %v2046_v47 = vsel %vm1169_vm1, %v4338_v37, -inf }
 0x848   : > { %v2009_v3 = vpop.f32.mrf.mxu1 }
 0x849   : > { %v2040_v4 = vsel %vm1169_vm1, %v2009_v3, -inf }
 0x84a   : > { %2041 = vmax.xlane.f32.xlu0 %v2040_v4  ;;  %v4339_v46 = vpop.f32.mrf.mxu1 }
 0x84b   : > { %v2049_v21 = vsel %vm1169_vm1, %v4339_v46, -inf }
 0x84c   : > { %v2012_v25 = vpop.f32.mrf.mxu1 }
 0x84d   : > { %v2043_v24 = vsel %vm1169_vm1, %v2012_v25, -inf }
 0x84e   : > { %2047 = vmax.xlane.f32.xlu0 %v2046_v47  ;;  %2044 = vmax.xlane.f32.xlu1 %v2043_v24  ;;  %v4342_v40 = vpop.f32.mrf.mxu1 }
 0x84f   : > { %v2058_v33 = vsel %vm1169_vm1, %v4342_v40, -inf }
 0x850   : > { %v2025_v54 = vpop.f32.mrf.mxu1 }
 0x851   : > { %v2052_v31 = vsel %vm1169_vm1, %v2025_v54, -inf }
 0x852   : > { %2050 = vmax.xlane.f32.xlu0 %v2049_v21  ;;  %v4343_v49 = vpop.f32.mrf.mxu1 }
 0x853   : > { %v2061_v10 = vsel %vm1169_vm1, %v4343_v49, -inf }
 0x854   : > { %v2028_v22 = vpop.f32.mrf.mxu1 }
 0x855   : > { %v2055_v7 = vsel %vm1169_vm1, %v2028_v22, -inf }
 0x856   : > { %2053 = vmax.xlane.f32.xlu0 %v2052_v31  ;;  %2056 = vmax.xlane.f32.xlu1 %v2055_v7 }
 0x85a   : > { %2059 = vmax.xlane.f32.xlu0 %v2058_v33  ;;  %2062 = vmax.xlane.f32.xlu1 %v2061_v10 }
 0x870   : > { %2138 = vrot.lane.b32.xlu0 %v5364_v53, %s5054_s13 }
 0x8d3   : > { %v2042_v17 = vpop.xlane.xlu0 %2041 }
 0x8d4   : > { %v2064_v19 = vsub.f32 %v2009_v3, %v2042_v17 }
 0x8d6   : > { %v2072_v24 = vmul.f32 1.442695, %v2064_v19 }
 0x8d7   : > { %v2048_v41 = vpop.xlane.xlu0 %2047  ;;  %v2045_v4 = vpop.xlane.xlu1 %2044 }
 0x8d8   : > { %v2066_v47 = vsub.f32 %v4338_v37, %v2048_v41  ;;  %v2065_v63 = vsub.f32 %v2012_v25, %v2045_v4 }
 0x8da   : > { %v2076_v21 = vmul.f32 1.442695, %v2066_v47  ;;  %v2074_v7 = vmul.f32 1.442695, %v2065_v63 }
 0x8db   : > { %v2051_v36 = vpop.xlane.xlu0 %2050 }
 0x8dc   : > { %4725 = vpow2.f32 %v2076_v21  ;;  %v2067_v31 = vsub.f32 %v4339_v46, %v2051_v36 }
 0x8dd   : > { %4727 = vpow2.f32 %v2072_v24 }
 0x8de   : > { %v2078_v55 = vmul.f32 1.442695, %v2067_v31 }
 0x8df   : > { %v2054_v14 = vpop.xlane.xlu0 %2053  ;;  %v2057_v33 = vpop.xlane.xlu1 %2056 }
 0x8e0   : > { %4729 = vpow2.f32 %v2078_v55  ;;  %v2068_v10 = vsub.f32 %v2025_v54, %v2054_v14  ;;  %v2069_v36 = vsub.f32 %v2028_v22, %v2057_v33 }
 0x8e1   : > { %4731 = vpow2.f32 %v2074_v7 }
 0x8e2   : > { %v2080_v17 = vmul.f32 1.442695, %v2068_v10  ;;  %v2082_v54 = vmul.f32 1.442695, %v2069_v36 }
 0x8e3   : > { %v2060_v53 = vpop.xlane.xlu0 %2059  ;;  %v2063_v0 = vpop.xlane.xlu1 %2062 }
 0x8e4   : > { %v2070_v3 = vsub.f32 %v4342_v40, %v2060_v53  ;;  %v2071_v37 = vsub.f32 %v4343_v49, %v2063_v0 }
 0x8e6   : > { %v2084_v2 = vmul.f32 1.442695, %v2070_v3  ;;  %v2086_v63 = vmul.f32 1.442695, %v2071_v37 }
 0x8e7   : > { %v2139_v19 = vpop.permute.xlu0 %2138 }
 0x8e8   : > { %4733 = vpow2.f32 %v2084_v2  ;;  %4344 = vmatprep.subr.bf16.mxu0 %v2139_v19 }
 0x8e9   : > { %v5832_v25 = vpop.eup %4725  ;;  %4345 = vmatpush3.bf16.msra.mxu0 %v2139_v19  ;;  %4735 = vpow2.f32 %v2080_v17 }
 0x8ea   : > { %v2094_v55 = vsel %vm1169_vm1, %v5832_v25, 0.0  ;;  %v4728_v46 = vpop.eup %4727  ;;  %4737 = vpow2.f32 %v2086_v63 }
 0x8eb   : > { %2095 = vadd.xlane.f32.xlu0 %v2094_v55  ;;  %v2088_v40 = vsel %vm1169_vm1, %v4728_v46, 0.0  ;;  %4739 = vpow2.f32 %v2082_v54 }
 0x8ed   : > { %v4730_v14 = vpop.eup %4729 }
 0x8ee   : > { %v2097_v0 = vsel %vm1169_vm1, %v4730_v14, 0.0  ;;  %v4732_v2 = vpop.eup %4731 }
 0x8ef   : > { %2089 = vadd.xlane.f32.xlu0 %v2088_v40  ;;  %2098 = vadd.xlane.f32.xlu1 %v2097_v0  ;;  %v2091_v49 = vsel %vm1169_vm1, %v4732_v2, 0.0 }
 0x8f3   : > { %2092 = vadd.xlane.f32.xlu1 %v2091_v49  ;;  %v4525_v49 = vld [vmem:[#allocation8 + $0x38] sm:$0xff]  }
 0x8f5   : > { %v5839_v22 = vpop.eup %4733 }
 0x8f6   : > { %v2106_v41 = vsel %vm1169_vm1, %v5839_v22, 0.0  ;;  %v4736_v4 = vpop.eup %4735 }
 0x8f7   : > { %2107 = vadd.xlane.f32.xlu1 %v2106_v41  ;;  %v2100_v47 = vsel %vm1169_vm1, %v4736_v4, 0.0  ;;  %v4738_v24 = vpop.eup %4737  ;;  %v4527_v41 = vld [vmem:[#allocation8 + $0x28] sm:$0xff]  }
 0x8f8   : > { %v2109_v21 = vsel %vm1169_vm1, %v4738_v24, 0.0  ;;  %v4740_v31 = vpop.eup %4739 }
 0x8f9   : > { %v2103_v7 = vsel %vm1169_vm1, %v4740_v31, 0.0 }
 0x8fb   : > { %2101 = vadd.xlane.f32.xlu1 %v2100_v47  ;;  %v4529_v47 = vld [vmem:[#allocation8 + $0x18] sm:$0xff]  }
 0x8ff   : > { %2110 = vadd.xlane.f32.xlu1 %v2109_v21  ;;  %v4532_v21 = vld [vmem:[#allocation8] sm:$0xff]  }
 0x903   : > { %2104 = vadd.xlane.f32.xlu1 %v2103_v7 }
 0x905   : > { %2134 = vrot.lane.b32.xlu0 %v5372_v30, %s5054_s13 }
 0x909   : > { %2132 = vrot.lane.b32.xlu0 %v5378_v5, %s5054_s13 }
 0x90d   : > { %2229 = vrot.lane.b32.xlu0 %v1641_v12, %s5054_s13 }
 0x911   : > { %2241 = vrot.lane.b32.xlu0 %v1931_v35, %s5053_s2 }
 0x914   : > { %2136 = vrot.lane.b32.xlu1 %v5366_v59, %s5054_s13 }
 0x918   : > { %2231 = vrot.lane.b32.xlu1 %v1642_v39, %s5054_s13 }
 0x91c   : > { %2243 = vrot.lane.b32.xlu1 %v1932_v45, %s5053_s2 }
 0x974   : > { %v2096_v30 = vpop.xlane.xlu0 %2095 }
 0x978   : > { %v2090_v5 = vpop.xlane.xlu0 %2089  ;;  %v2099_v6 = vpop.xlane.xlu1 %2098 }
 0x979   : > { %4741 = vrcp.f32 %v2090_v5 }
 0x97c   : > { %v2093_v27 = vpop.xlane.xlu1 %2092  ;;  %v2135_v38 = vpop.permute.xlu0 %2134 }
 0x97d   : > { %4743 = vrcp.f32 %v2093_v27 }
 0x97e   : > { %4745 = vrcp.f32 %v2099_v6 }
 0x97f   : > { %4747 = vrcp.f32 %v2096_v30 }
 0x980   : > { %v2108_v12 = vpop.xlane.xlu1 %2107  ;;  %v2133_v53 = vpop.permute.xlu0 %2132 }
 0x984   : > { %v2102_v23 = vpop.xlane.xlu1 %2101  ;;  %v2230_v28 = vpop.permute.xlu0 %2229 }
 0x985   : > { %4749 = vrcp.f32 %v2102_v23  ;;  %v2263_v11 = vsel %vm1079_vm0, %v1339_v58, %v2230_v28 }
 0x986   : > { %v4742_v59 = vpop.eup %4741 }
 0x987   : > { %v2113_v20 = vmul.f32 %v4742_v59, %v4728_v46 }
 0x988   : > { %v2111_v48 = vpop.xlane.xlu1 %2110  ;;  %v2242_v34 = vpop.permute.xlu0 %2241 }
 0x989   : > { %v2274_v29 = vsel %vm1169_vm1, %v2263_v11, %v2242_v34 }
 0x98a   : > { %v4744_v35 = vpop.eup %4743 }
 0x98b   : > { %v2115_v16 = vmul.f32 %v4744_v35, %v4732_v2  ;;  %v4746_v33 = vpop.eup %4745 }
 0x98c   : > { %v2105_v39 = vpop.xlane.xlu1 %2104  ;;  %v4748_v10 = vpop.eup %4747  ;;  %v2119_v3 = vmul.f32 %v4746_v33, %v4730_v14 }
 0x98d   : > { %4751 = vrcp.f32 %v2105_v39  ;;  %v2128_v42 = vpack.c.bf16 %v2115_v16, %v2113_v20  ;;  %v2117_v37 = vmul.f32 %v4748_v10, %v5832_v25  ;;  %v4526_v25 = vld [vmem:[#allocation8 + $0x30] sm:$0xff]   ;;  %v6633_v39 = vpack.c.bf16 %v5556_v1, %v5550_v61 }
 0x98e   : > { %4753 = vrcp.f32 %v2111_v48  ;;  %v6635_v1 = vmov 0  }
 0x98f   : > { %4352 = vmatprep.mubr.msk.bf16.mxu0 %vm1169_vm1, %v2128_v42  ;;  %4755 = vrcp.f32 %v2108_v12  ;;  %v2129_v36 = vpack.c.bf16 %v2119_v3, %v2117_v37 }
 0x990   : > { %v2137_v45 = vpop.permute.xlu1 %2136 }
 0x991   : > { %4346 = vmatprep.subr.bf16.mxu0 %v2137_v45 }
 0x992   : > { %4347 = vmatpush3.bf16.msra.mxu0 %v2137_v45  ;;  %v4750_v17 = vpop.eup %4749 }
 0x993   : > { %4348 = vmatprep.subr.bf16.mxu0 %v2135_v38  ;;  %v2121_v63 = vmul.f32 %v4750_v17, %v4736_v4  ;;  %v4528_v4 = vld [vmem:[#allocation8 + $0x20] sm:$0xff]  }
 0x994   : > { %v2232_v43 = vpop.permute.xlu1 %2231  ;;  %v612_v17 = vld [vmem:[%s5266_s22] sm:$0xff] }
 0x995   : > { %v2266_v9 = vsel %vm1079_vm0, %v1340_v56, %v2232_v43  ;;  %v6634_v56 = vpack.c.bf16 %v5552_v62, %v5548_v60  ;;  %v614_v60 = vld [vmem:[%s5266_s22 + $0x10] sm:$0xff]  ;;  %v4538_v43 = vld [vmem:[%s6595_s9 + $0xec] ss:$16 sps:$4 sm:$0xff]  }
 0x996   : > { %4349 = vmatpush3.bf16.msra.mxu0 %v2135_v38 }
 0x997   : > { %4350 = vmatprep.subr.bf16.mxu0 %v2133_v53 }
 0x99a   : > { %v4752_v19 = vpop.eup %4751  ;;  %4351 = vmatpush3.bf16.msra.mxu0 %v2133_v53  ;;  %v3949_v53 = vld [vmem:[#allocation10] ss:$0 sm:$0xff] }
 0x99b   : > { %v2123_v55 = vmul.f32 %v4752_v19, %v4740_v31  ;;  %v4754_v46 = vpop.eup %4753  ;;  %4360 = vmatprep.subr.bf16.mxu0 %v4525_v49 }
 0x99c   : > { %v4756_v40 = vpop.eup %4755  ;;  %v2127_v0 = vmul.f32 %v4754_v46, %v4738_v24  ;;  %v4530_v24 = vld [vmem:[#allocation8 + $0x10] sm:$0xff]  }
 0x99d   : > { %4353 = vmatmul.mubr.msk.bf16.vlgmr.msra.gmra.mxu0 %vm1169_vm1, %v2129_v36  ;;  %v2130_v54 = vpack.c.bf16 %v2123_v55, %v2121_v63  ;;  %v2125_v2 = vmul.f32 %v4756_v40, %v5839_v22  ;;  %v4531_v22 = vld [vmem:[#allocation8 + $0x8] sm:$0xff]   ;;  %v615_v63 = vld [vmem:[%s5266_s22 + $0x18] sm:$0xff] }
 0x99e   : > { %4361 = vmatpush3.bf16.msra.mxu0 %v4525_v49  ;;  %v613_v40 = vld [vmem:[%s5266_s22 + $0x8] sm:$0xff] }
 0x99f   : > { %4356 = vmatprep.mubr.msk.bf16.mxu0 %vm1169_vm1, %v2130_v54  ;;  %v2131_v14 = vpack.c.bf16 %v2127_v0, %v2125_v2  ;;  %4362 = vmatprep.subr.bf16.mxu0 %v4526_v25 }
 0x9a2   : > { %4363 = vmatpush3.bf16.msra.mxu0 %v4526_v25  ;;  %v618_v25 = vld [vmem:[%s5266_s22 + $0x30] sm:$0xff] }
 0x9a3   : > { %4364 = vmatprep.subr.bf16.mxu0 %v4527_v41 }
 0x9a5   : > { %4357 = vmatmul.mubr.msk.bf16.gmra.mxu0 %vm1169_vm1, %v2131_v14 }
 0x9a6   : > { %4365 = vmatpush3.bf16.msra.mxu0 %v4527_v41 }
 0x9a7   : > { %4366 = vmatprep.subr.bf16.mxu0 %v4528_v4 }
 0x9aa   : > { %4367 = vmatpush3.bf16.msra.mxu0 %v4528_v4 }
 0x9ab   : > { %4368 = vmatprep.subr.bf16.mxu0 %v4529_v47 }
 0x9ae   : > { %4369 = vmatpush3.bf16.msra.mxu0 %v4529_v47  ;;  %v616_v47 = vld [vmem:[%s5266_s22 + $0x20] sm:$0xff] }
 0x9af   : > { %4370 = vmatprep.subr.bf16.mxu0 %v4530_v24 }
 0x9b2   : > { %4371 = vmatpush3.bf16.msra.mxu0 %v4530_v24 }
 0x9b3   : > { %4372 = vmatprep.subr.bf16.mxu0 %v4531_v22 }
 0x9b6   : > { %4373 = vmatpush3.bf16.msra.mxu0 %v4531_v22 }
 0x9b7   : > { %4374 = vmatprep.subr.bf16.mxu0 %v4532_v21 }
 0x9ba   : > { %4375 = vmatpush3.bf16.msra.mxu0 %v4532_v21 }
 0x9bb   : > { %2847 = vmatprep.subr.bf16.mxu0 %v4538_v43 }
 0xa5d   : > { %v4354_v31 = vpop.f32.mrf.mxu0 }
 0xa5f   : > { %v2190_v7 = vpop.f32.mrf.mxu0 }
 0xa61   : > { %v4355_v30 = vpop.f32.mrf.mxu0 }
 0xa62   : > { %v2222_v5 = vpack.c.bf16 %v4355_v30, %v4354_v31  ;;  %v619_v31 = vld [vmem:[%s5266_s22 + $0x38] sm:$0xff] }
 0xa63   : > { %v2193_v6 = vpop.f32.mrf.mxu0 }
 0xa64   : > { %v2221_v27 = vpack.c.bf16 %v2193_v6, %v2190_v7  ;;  %2255 = vrot.lane.b32.xlu1 %v2222_v5, %s5052_s4  ;;  %v617_v6 = vld [vmem:[%s5266_s22 + $0x28] sm:$0xff] }
 0xa65   : > { %v4358_v12 = vpop.f32.mrf.mxu0 }
 0xa66   : > { %2253 = vrot.lane.b32.xlu0 %v2221_v27, %s5052_s4 }
 0xa67   : > { %v2206_v23 = vpop.f32.mrf.mxu0 }
 0xa68   : > { %2235 = vrot.lane.b32.xlu1 %v1644_v26, %s5054_s13  ;;  %v2244_v26 = vpop.permute.xlu1 %2243 }
 0xa69   : > { %v4359_v59 = vpop.f32.mrf.mxu0  ;;  %v2276_v8 = vsel %vm1169_vm1, %v2266_v9, %v2244_v26 }
 0xa6a   : > { %2233 = vrot.lane.b32.xlu0 %v1643_v15, %s5054_s13  ;;  %v2224_v35 = vpack.c.bf16 %v4359_v59, %v4358_v12  ;;  %s6646_s13 = sld [smem:[#allocation24_spill]] (%p6645_p10) }
 0xa6b   : > { %v2209_v48 = vpop.f32.mrf.mxu0 }
 0xa6c   : > { %2247 = vrot.lane.b32.xlu1 %v1934_v44, %s5053_s2  ;;  %v2223_v32 = vpack.c.bf16 %v2209_v48, %v2206_v23  ;;  %v4533_v48 = vld [vmem:[%s6595_s9 + $0xe0] ss:$16 sps:$4 sm:$0xff]  }
 0xa6e   : > { %2245 = vrot.lane.b32.xlu0 %v1933_v13, %s5053_s2 }
 0xa70   : > { %2259 = vrot.lane.b32.xlu1 %v2224_v35, %s5052_s4  ;;  %v4535_v35 = vld [vmem:[%s6595_s9 + $0xe4] ss:$16 sps:$4 sm:$0xff]  }
 0xa71   : > { %2774 = vmatprep.subr.bf16.mxu1 %v4535_v35  ;;  %v4580_v35 = vld [vmem:[%s6595_s9 + $0xc] ss:$16 sps:$4 sm:$0xff]  }
 0xa72   : > { %2257 = vrot.lane.b32.xlu0 %v2223_v32, %s5052_s4  ;;  %v4536_v32 = vld [vmem:[%s6595_s9 + $0xe8] ss:$16 sps:$4 sm:$0xff]   ;;  %2775 = vmatpush1.bf16.msra.mxu1 %v4533_v48  ;;  %s4039_s4 = sshll.u32 (%p6645_p10), %s5141_s28, 6 }
 0xa73   : > { %v4578_v48 = vld [vmem:[%s6595_s9 + $0x8] ss:$16 sps:$4 sm:$0xff]   ;;  %s3651_s30 = scalar_lea.vmem (%p6645_p10), %s6646_s13, %s4039_s4 }
 0xad6   : > { %v2256_v15 = vpop.permute.xlu1 %2255 }
 0xad7   : > { %v2286_v20 = vsel %vm2281_vm2, %v2276_v8, %v2256_v15 }
 0xad8   : > { %v2254_v44 = vpop.permute.xlu0 %2253 }
 0xad9   : > { %v2283_v13 = vsel %vm2281_vm2, %v2274_v29, %v2254_v44 }
 0xada   : > { %4376 = vmatprep.mubr.bf16.mxu0 %v2283_v13  ;;  %v2236_v16 = vpop.permute.xlu1 %2235 }
 0xadb   : > { %4377 = vmatmul.mubr.bf16.vlgmr.msra.gmra.mxu0 %v2286_v20  ;;  %v2272_v42 = vsel %vm1079_vm0, %v6634_v56, %v2236_v16 }
 0xadc   : > { %v2234_v51 = vpop.permute.xlu0 %2233  ;;  %2848 = vmatpush1.bf16.msra.mxu0 %v4536_v32 }
 0xadd   : > { %v2269_v50 = vsel %vm1079_vm0, %v6633_v39, %v2234_v51 }
 0xade   : > { %v2248_v57 = vpop.permute.xlu1 %2247 }
 0xadf   : > { %v2280_v33 = vsel %vm1169_vm1, %v2272_v42, %v2248_v57 }
 0xae0   : > { %v2246_v58 = vpop.permute.xlu0 %2245 }
 0xae1   : > { %v2278_v38 = vsel %vm1169_vm1, %v2269_v50, %v2246_v58 }
 0xae2   : > { %v2260_v52 = vpop.permute.xlu1 %2259 }
 0xae3   : > { %v2292_v61 = vsel %vm2281_vm2, %v2280_v33, %v2260_v52 }
 0xae4   : > { %v2258_v45 = vpop.permute.xlu0 %2257 }
 0xae5   : > { %v2289_v10 = vsel %vm2281_vm2, %v2278_v38, %v2258_v45 }
 0xae6   : > { %4380 = vmatprep.mubr.bf16.mxu0 %v2289_v10 }
 0xae7   : > { %4381 = vmatmul.mubr.bf16.gmra.mxu0 %v2292_v61  ;;  %v4541_v61 = vld [vmem:[%s6595_s9 + $0xc4] ss:$16 sps:$4 sm:$0xff]  }
 0xae8   : > { %2879 = vmatprep.mubr.bf16.mxu0 %v6635_v1  ;;  %2776 = vmatprep.subr.bf16.mxu1 %v4541_v61 }
 0xb9b   : > { %v4378_v62 = vpop.f32.mrf.mxu0 }
 0xb9c   : > { %v2408_v3 = vadd.f32 %v4378_v62, %v3949_v53 }
 0xb9d   : > { %v2399_v37 = vpop.f32.mrf.mxu0 }
 0xb9e   : > { %v2432_v19 = vadd.f32 %v2408_v3, %v614_v60  ;;  %v2400_v36 = vadd.f32 %v3949_v53, %v2399_v37  ;;  %v4539_v3 = vld [vmem:[%s6595_s9 + $0xc0] ss:$16 sps:$4 sm:$0xff]  }
 0xb9f   : > { %v4379_v55 = vpop.f32.mrf.mxu0  ;;  %2777 = vmatpush1.bf16.msra.mxu1 %v4539_v3  ;;  %v3958_v3 = vld [vmem:[%s6589_s3] ss:$0 sm:$0xff] }
 0xba0   : > { %4027 = vst [vmem:[%s5923_s14 + $0x50] sm:$0xff] %v2432_v19  ;;  %v2430_v46 = vadd.f32 %v2400_v36, %v612_v17  ;;  %v2411_v54 = vadd.f32 %v4379_v55, %v3949_v53  ;;  %v4542_v17 = vld [vmem:[%s6595_s9 + $0xc8] ss:$16 sps:$4 sm:$0xff]   ;;  %v4547_v55 = vld [vmem:[%s6595_s9 + $0xa4] ss:$16 sps:$4 sm:$0xff]  }
 0xba1   : > { %v2402_v0 = vpop.f32.mrf.mxu0  ;;  %2778 = vmatprep.subr.bf16.mxu1 %v4547_v55 }
 0xba2   : > { %4025 = vst [vmem:[%s5923_s14 + $0x40] sm:$0xff] %v2430_v46  ;;  %v2433_v2 = vadd.f32 %v2411_v54, %v615_v63  ;;  %v2403_v14 = vadd.f32 %v3949_v53, %v2402_v0  ;;  %2440 = vadd.xlane.f32.xlu0 %v2430_v46  ;;  %v4548_v0 = vld [vmem:[%s6595_s9 + $0xa8] ss:$16 sps:$4 sm:$0xff]  }
 0xba4   : > { %4028 = vst [vmem:[%s5923_s14 + $0x58] sm:$0xff] %v2433_v2  ;;  %v2431_v49 = vadd.f32 %v2403_v14, %v613_v40  ;;  %v4545_v40 = vld [vmem:[%s6595_s9 + $0xa0] ss:$16 sps:$4 sm:$0xff]   ;;  %v4553_v14 = vld [vmem:[%s6595_s9 + $0x84] ss:$16 sps:$4 sm:$0xff]  }
 0xba5   : > { %2779 = vmatpush1.bf16.msra.mxu1 %v4545_v40  ;;  %v3959_v40 = vld [vmem:[#allocation5] ss:$0 sm:$0xff] }
 0xba6   : > { %4026 = vst [vmem:[%s5923_s14 + $0x48] sm:$0xff] %v2431_v49  ;;  %2442 = vadd.xlane.f32.xlu1 %v2431_v49  ;;  %2444 = vadd.xlane.f32.xlu0 %v2432_v19 }
 0xba7   : > { %v4382_v41 = vpop.f32.mrf.mxu0  ;;  %2780 = vmatprep.subr.bf16.mxu1 %v4553_v14 }
 0xba8   : > { %v2424_v4 = vadd.f32 %v4382_v41, %v3949_v53  ;;  %v4554_v41 = vld [vmem:[%s6595_s9 + $0x88] ss:$16 sps:$4 sm:$0xff]  }
 0xba9   : > { %v2415_v24 = vpop.f32.mrf.mxu0 }
 0xbaa   : > { %v2436_v22 = vadd.f32 %v2424_v4, %v618_v25  ;;  %v2416_v21 = vadd.f32 %v3949_v53, %v2415_v24  ;;  %2446 = vadd.xlane.f32.xlu0 %v2433_v2  ;;  %v4551_v25 = vld [vmem:[%s6595_s9 + $0x80] ss:$16 sps:$4 sm:$0xff]   ;;  %v4559_v4 = vld [vmem:[%s6595_s9 + $0x64] ss:$16 sps:$4 sm:$0xff]  }
 0xbab   : > { %v4383_v7 = vpop.f32.mrf.mxu0  ;;  %2781 = vmatpush1.bf16.msra.mxu1 %v4551_v25  ;;  %v4557_v24 = vld [vmem:[%s6595_s9 + $0x60] ss:$16 sps:$4 sm:$0xff]  }
 0xbac   : > { %4031 = vst [vmem:[%s5923_s14 + $0x70] sm:$0xff] %v2436_v22  ;;  %v2434_v30 = vadd.f32 %v2416_v21, %v616_v47  ;;  %v2427_v5 = vadd.f32 %v4383_v7, %v3949_v53  ;;  %v4562_v47 = vld [vmem:[%s6595_s9 + $0x6c] ss:$16 sps:$4 sm:$0xff]   ;;  %2782 = vmatprep.subr.bf16.mxu1 %v4559_v4  ;;  %v4565_v21 = vld [vmem:[%s6595_s9 + $0x44] ss:$16 sps:$4 sm:$0xff]  }
 0xbad   : > { %v2418_v27 = vpop.f32.mrf.mxu0  ;;  %v4563_v7 = vld [vmem:[%s6595_s9 + $0x40] ss:$16 sps:$4 sm:$0xff]  }
 0xbae   : > { %4029 = vst [vmem:[%s5923_s14 + $0x60] sm:$0xff] %v2434_v30  ;;  %v2437_v12 = vadd.f32 %v2427_v5, %v619_v31  ;;  %v2419_v23 = vadd.f32 %v3949_v53, %v2418_v27  ;;  %2448 = vadd.xlane.f32.xlu0 %v2434_v30  ;;  %v4544_v53 = vld [vmem:[%s6595_s9 + $0xcc] ss:$16 sps:$4 sm:$0xff]   ;;  %v4571_v5 = vld [vmem:[%s6595_s9 + $0x24] ss:$16 sps:$4 sm:$0xff]  }
 0xbaf   : > { %2849 = vmatprep.subr.bf16.mxu0 %v4544_v53  ;;  %2783 = vmatpush1.bf16.msra.mxu1 %v4557_v24  ;;  %v4568_v31 = vld [vmem:[%s6595_s9 + $0x4c] ss:$16 sps:$4 sm:$0xff]   ;;  %v4569_v27 = vld [vmem:[%s6595_s9 + $0x20] ss:$16 sps:$4 sm:$0xff]  }
 0xbb0   : > { %4032 = vst [vmem:[%s5923_s14 + $0x78] sm:$0xff] %v2437_v12  ;;  %v2435_v59 = vadd.f32 %v2419_v23, %v617_v6  ;;  %2850 = vmatpush1.bf16.msra.mxu0 %v4542_v17  ;;  %2784 = vmatprep.subr.bf16.mxu1 %v4565_v21  ;;  %v4574_v6 = vld [vmem:[%s6595_s9 + $0x2c] ss:$16 sps:$4 sm:$0xff]   ;;  %v4575_v23 = vld [vmem:[%s6595_s9] ss:$16 sps:$4 sm:$0xff]  }
 0xbb2   : > { %4030 = vst [vmem:[%s5923_s14 + $0x68] sm:$0xff] %v2435_v59  ;;  %2450 = vadd.xlane.f32.xlu1 %v2435_v59  ;;  %2452 = vadd.xlane.f32.xlu0 %v2436_v22 }
 0xbb3   : > { %2785 = vmatpush1.bf16.msra.mxu1 %v4563_v7 }
 0xbb4   : > { %2786 = vmatprep.subr.bf16.mxu1 %v4571_v5 }
 0xbb6   : > { %2454 = vadd.xlane.f32.xlu1 %v2437_v12 }
 0xbb7   : > { %2787 = vmatpush1.bf16.msra.mxu1 %v4569_v27 }
 0xc2b   : > { %v2441_v28 = vpop.xlane.xlu0 %2440 }
 0xc2c   : > { %v2456_v26 = vmul.f32 0.0078125, %v2441_v28 }
 0xc2e   : > { %v5950_v34 = vsub.f32 %v2430_v46, %v2456_v26  ;;  %v4550_v46 = vld [vmem:[%s6595_s9 + $0xac] ss:$16 sps:$4 sm:$0xff]  }
 0xc2f   : > { %v2443_v15 = vpop.xlane.xlu1 %2442  ;;  %v2445_v11 = vpop.xlane.xlu0 %2444  ;;  %2851 = vmatprep.subr.bf16.mxu0 %v4550_v46 }
 0xc30   : > { %v2457_v29 = vmul.f32 0.0078125, %v2443_v15  ;;  %v2458_v9 = vmul.f32 0.0078125, %v2445_v11  ;;  %v2472_v44 = vmul.f32 %v5950_v34, %v5950_v34  ;;  %2852 = vmatpush1.bf16.msra.mxu0 %v4548_v0 }
 0xc32   : > { %v5954_v8 = vsub.f32 %v2431_v49, %v2457_v29  ;;  %v5956_v13 = vsub.f32 %v2432_v19, %v2458_v9  ;;  %2480 = vadd.xlane.f32.xlu0 %v2472_v44  ;;  %v4556_v49 = vld [vmem:[%s6595_s9 + $0x8c] ss:$16 sps:$4 sm:$0xff]  }
 0xc33   : > { %v2447_v20 = vpop.xlane.xlu0 %2446  ;;  %2853 = vmatprep.subr.bf16.mxu0 %v4556_v49 }
 0xc34   : > { %v2459_v16 = vmul.f32 0.0078125, %v2447_v20  ;;  %v2473_v51 = vmul.f32 %v5954_v8, %v5954_v8  ;;  %v2474_v57 = vmul.f32 %v5956_v13, %v5956_v13  ;;  %2854 = vmatpush1.bf16.msra.mxu0 %v4554_v41 }
 0xc35   : > { %2855 = vmatprep.subr.bf16.mxu0 %v4562_v47 }
 0xc36   : > { %v5962_v58 = vsub.f32 %v2433_v2, %v2459_v16  ;;  %2482 = vadd.xlane.f32.xlu1 %v2473_v51  ;;  %2484 = vadd.xlane.f32.xlu0 %v2474_v57 }
 0xc37   : > { %v2449_v39 = vpop.xlane.xlu0 %2448 }
 0xc38   : > { %v2460_v50 = vmul.f32 0.0078125, %v2449_v39  ;;  %v2475_v52 = vmul.f32 %v5962_v58, %v5962_v58 }
 0xc3a   : > { %v5966_v56 = vsub.f32 %v2434_v30, %v2460_v50  ;;  %2486 = vadd.xlane.f32.xlu1 %v2475_v52  ;;  %v4566_v30 = vld [vmem:[%s6595_s9 + $0x48] ss:$16 sps:$4 sm:$0xff]  }
 0xc3b   : > { %v2451_v42 = vpop.xlane.xlu1 %2450  ;;  %v2453_v38 = vpop.xlane.xlu0 %2452 }
 0xc3c   : > { %v2461_v45 = vmul.f32 0.0078125, %v2451_v42  ;;  %v2462_v33 = vmul.f32 0.0078125, %v2453_v38  ;;  %v2476_v10 = vmul.f32 %v5966_v56, %v5966_v56 }
 0xc3e   : > { %v5976_v60 = vsub.f32 %v2435_v59, %v2461_v45  ;;  %v5978_v62 = vsub.f32 %v2436_v22, %v2462_v33  ;;  %2488 = vadd.xlane.f32.xlu0 %v2476_v10  ;;  %v4560_v22 = vld [vmem:[%s6595_s9 + $0x68] ss:$16 sps:$4 sm:$0xff]   ;;  %v4577_v59 = vld [vmem:[%s6595_s9 + $0x4] ss:$16 sps:$4 sm:$0xff]  }
 0xc3f   : > { %v2455_v37 = vpop.xlane.xlu1 %2454  ;;  %2856 = vmatpush1.bf16.msra.mxu0 %v4560_v22  ;;  %2788 = vmatprep.subr.bf16.mxu1 %v4577_v59 }
 0xc40   : > { %v2463_v19 = vmul.f32 0.0078125, %v2455_v37  ;;  %v2477_v36 = vmul.f32 %v5976_v60, %v5976_v60  ;;  %v2478_v63 = vmul.f32 %v5978_v62, %v5978_v62  ;;  %2857 = vmatprep.subr.bf16.mxu0 %v4568_v31  ;;  %2789 = vmatpush1.bf16.msra.mxu1 %v4575_v23 }
 0xc42   : > { %v5996_v54 = vsub.f32 %v2437_v12, %v2463_v19  ;;  %2490 = vadd.xlane.f32.xlu1 %v2477_v36  ;;  %2492 = vadd.xlane.f32.xlu0 %v2478_v63  ;;  %v4572_v12 = vld [vmem:[%s6595_s9 + $0x28] ss:$16 sps:$4 sm:$0xff]  }
 0xc43   : > { %2858 = vmatpush1.bf16.msra.mxu0 %v4566_v30 }
 0xc44   : > { %v2479_v2 = vmul.f32 %v5996_v54, %v5996_v54  ;;  %2859 = vmatprep.subr.bf16.mxu0 %v4574_v6 }
 0xc46   : > { %2494 = vadd.xlane.f32.xlu1 %v2479_v2 }
 0xc47   : > { %2860 = vmatpush1.bf16.msra.mxu0 %v4572_v12 }
 0xc48   : > { %2861 = vmatprep.subr.bf16.mxu0 %v4580_v35 }
 0xc4b   : > { %2862 = vmatpush1.bf16.msra.mxu0 %v4578_v48 }
 0xcbb   : > { %v2481_v32 = vpop.xlane.xlu0 %2480 }
 0xcbc   : > { %v2496_v43 = vmul.f32 0.0078125, %v2481_v32 }
 0xcbe   : > { %v2504_v28 = vadd.f32 1e-06, %v2496_v43 }
 0xcbf   : > { %v2483_v26 = vpop.xlane.xlu1 %2482  ;;  %v2485_v15 = vpop.xlane.xlu0 %2484 }
 0xcc0   : > { %4757 = vrsqrt.f32 %v2504_v28  ;;  %v2497_v11 = vmul.f32 0.0078125, %v2483_v26  ;;  %v2498_v29 = vmul.f32 0.0078125, %v2485_v15  ;;  %v4583_v28 = vld [vmem:[%s6597_s11 + $0x38] sm:$0xff]   ;;  %v4585_v26 = vld [vmem:[%s6597_s11 + $0x70] sm:$0xff]  }
 0xcc1   : > { %v4586_v15 = vld [vmem:[%s6597_s11 + $0xf0] sm:$0xff]  }
 0xcc2   : > { %v2505_v9 = vadd.f32 1e-06, %v2497_v11  ;;  %v2506_v44 = vadd.f32 1e-06, %v2498_v29  ;;  %v4587_v11 = vld [vmem:[%s6597_s11 + $0x30] sm:$0xff]  }
 0xcc3   : > { %v2487_v20 = vpop.xlane.xlu1 %2486  ;;  %v4588_v29 = vld [vmem:[%s6597_s11 + $0xb0] sm:$0xff]  }
 0xcc4   : > { %4759 = vrsqrt.f32 %v2505_v9  ;;  %v2499_v16 = vmul.f32 0.0078125, %v2487_v20  ;;  %v4589_v9 = vld [vmem:[%s6597_s11 + $0x68] sm:$0xff]  }
 0xcc5   : > { %4761 = vrsqrt.f32 %v2506_v44  ;;  %v4590_v44 = vld [vmem:[%s6597_s11 + $0xe8] sm:$0xff]  }
 0xcc6   : > { %v2507_v51 = vadd.f32 1e-06, %v2499_v16  ;;  %v4591_v20 = vld [vmem:[%s6597_s11 + $0x28] sm:$0xff]  }
 0xcc7   : > { %v2489_v57 = vpop.xlane.xlu0 %2488  ;;  %v4592_v16 = vld [vmem:[%s6597_s11 + $0xa8] sm:$0xff]  }
 0xcc8   : > { %4763 = vrsqrt.f32 %v2507_v51  ;;  %v2500_v39 = vmul.f32 0.0078125, %v2489_v57  ;;  %v4593_v51 = vld [vmem:[%s6597_s11 + $0x60] sm:$0xff]  }
 0xcc9   : > { %v4594_v57 = vld [vmem:[%s6597_s11 + $0xe0] sm:$0xff]  }
 0xcca   : > { %v2508_v50 = vadd.f32 1e-06, %v2500_v39  ;;  %v4595_v39 = vld [vmem:[%s6597_s11 + $0x20] sm:$0xff]  }
 0xccb   : > { %v2491_v52 = vpop.xlane.xlu1 %2490  ;;  %v2493_v42 = vpop.xlane.xlu0 %2492 }
 0xccc   : > { %v2501_v38 = vmul.f32 0.0078125, %v2491_v52  ;;  %v2502_v33 = vmul.f32 0.0078125, %v2493_v42  ;;  %4765 = vrsqrt.f32 %v2508_v50  ;;  %v4596_v50 = vld [vmem:[%s6597_s11 + $0xa0] sm:$0xff]   ;;  %v4597_v52 = vld [vmem:[%s6597_s11 + $0x58] sm:$0xff]  }
 0xccd   : > { %v4758_v45 = vpop.eup %4757  ;;  %v4598_v42 = vld [vmem:[%s6597_s11 + $0xd8] sm:$0xff]  }
 0xcce   : > { %v2520_v10 = vmul.f32 %v4758_v45, %v5950_v34  ;;  %v2509_v61 = vadd.f32 1e-06, %v2501_v38  ;;  %v2510_v19 = vadd.f32 1e-06, %v2502_v33  ;;  %v4599_v38 = vld [vmem:[%s6597_s11 + $0x18] sm:$0xff]   ;;  %v4601_v33 = vld [vmem:[%s6597_s11 + $0x50] sm:$0xff]  }
 0xccf   : > { %v2495_v53 = vpop.xlane.xlu1 %2494  ;;  %v4600_v45 = vld [vmem:[%s6597_s11 + $0x98] sm:$0xff]  }
 0xcd0   : > { %4767 = vrsqrt.f32 %v2509_v61  ;;  %v2503_v17 = vmul.f32 0.0078125, %v2495_v53  ;;  %v2534_v55 = vmul.f32 %v3958_v3, %v2520_v10  ;;  %v4602_v10 = vld [vmem:[%s6597_s11 + $0xd0] sm:$0xff]  }
 0xcd1   : > { %v4760_v37 = vpop.eup %4759  ;;  %v4603_v61 = vld [vmem:[%s6597_s11 + $0x10] sm:$0xff]  }
 0xcd2   : > { %v2521_v36 = vmul.f32 %v4760_v37, %v5954_v8  ;;  %v2511_v63 = vadd.f32 1e-06, %v2503_v17  ;;  %v4762_v46 = vpop.eup %4761  ;;  %v2548_v2 = vadd.f32 %v3959_v40, %v2534_v55  ;;  %v4604_v53 = vld [vmem:[%s6597_s11 + $0x90] sm:$0xff]   ;;  %v4606_v17 = vld [vmem:[%s6597_s11 + $0xc8] sm:$0xff]   ;;  %v4611_v55 = vld [vmem:[%s6597_s11] sm:$0xff]  }
 0xcd3   : > { %v2522_v49 = vmul.f32 %v4762_v46, %v5956_v13  ;;  %v4607_v37 = vld [vmem:[%s6597_s11 + $0x8] sm:$0xff]   ;;  %v4612_v46 = vld [vmem:[%s6597_s11 + $0x80] sm:$0xff]  }
 0xcd4   : > { %4769 = vrsqrt.f32 %v2511_v63  ;;  %v2535_v0 = vmul.f32 %v3958_v3, %v2521_v36  ;;  %v4609_v36 = vld [vmem:[%s6597_s11 + $0x40] sm:$0xff]  }
 0xcd5   : > { %v4764_v34 = vpop.eup %4763  ;;  %4771 = vrsqrt.f32 %v2510_v19  ;;  %v2536_v47 = vmul.f32 %v3958_v3, %v2522_v49  ;;  %v4608_v19 = vld [vmem:[%s6597_s11 + $0x88] sm:$0xff]   ;;  %v4610_v63 = vld [vmem:[%s6597_s11 + $0xc0] sm:$0xff]  }
 0xcd6   : > { %v2549_v14 = vadd.f32 %v3959_v40, %v2535_v0  ;;  %v2523_v25 = vmul.f32 %v4764_v34, %v5962_v58  ;;  %v2608_v0 = vsub.s32 3, %v5339_v18  ;;  %v6636_v34 = vsub.s32 0, %v5339_v18 }
 0xcd7   : > { %v2550_v21 = vadd.f32 %v3959_v40, %v2536_v47 }
 0xcd8   : > { %v2556_v41 = vpack.c.bf16 %v2549_v14, %v2548_v2  ;;  %v2537_v4 = vmul.f32 %v3958_v3, %v2523_v25  ;;  %v6637_v14 = vsub.s32 2, %v5339_v18  ;;  %v6638_v25 = vsub.s32 1, %v5339_v18 }
 0xcd9   : > { %v4766_v8 = vpop.eup %4765 }
 0xcda   : > { %2807 = vmatmul.mubr.bf16.vlgmr.msra.gmra.mxu1 %v2556_v41  ;;  %2880 = vmatmul.mubr.bf16.vlgmr.msra.gmra.mxu0 %v2556_v41  ;;  %v2551_v24 = vadd.f32 %v3959_v40, %v2537_v4  ;;  %v2524_v31 = vmul.f32 %v4766_v8, %v5966_v56 }
 0xcdb   : > { %2816 = vmatprep.mubr.bf16.mxu1 %v6635_v1  ;;  %2889 = vmatprep.mubr.bf16.mxu0 %v6635_v1 }
 0xcdc   : > { %v2557_v13 = vpack.c.bf16 %v2551_v24, %v2550_v21  ;;  %v2538_v6 = vmul.f32 %v3958_v3, %v2524_v31 }
 0xcdd   : > { %v4768_v22 = vpop.eup %4767 }
 0xcde   : > { %v2525_v7 = vmul.f32 %v4768_v22, %v5976_v60  ;;  %v2552_v23 = vadd.f32 %v3959_v40, %v2538_v6 }
 0xce0   : > { %v2539_v30 = vmul.f32 %v3958_v3, %v2525_v7 }
 0xce1   : > { %v4770_v58 = vpop.eup %4769 }
 0xce2   : > { %v4772_v5 = vpop.eup %4771  ;;  %2817 = vmatmul.mubr.bf16.gmra.mxu1 %v2557_v13  ;;  %2890 = vmatmul.mubr.bf16.gmra.mxu0 %v2557_v13  ;;  %v2553_v27 = vadd.f32 %v3959_v40, %v2539_v30  ;;  %v2527_v12 = vmul.f32 %v4770_v58, %v5996_v54  ;;  %v4581_v54 = vld [vmem:[%s6597_s11 + $0x78] sm:$0xff]  }
 0xce3   : > { %2826 = vmatprep.mubr.bf16.mxu1 %v6635_v1  ;;  %2899 = vmatprep.mubr.bf16.mxu0 %v6635_v1  ;;  %v2526_v59 = vmul.f32 %v4772_v5, %v5978_v62  ;;  %v4582_v62 = vld [vmem:[%s6597_s11 + $0xf8] sm:$0xff]  }
 0xce4   : > { %v2558_v56 = vpack.c.bf16 %v2553_v27, %v2552_v23  ;;  %v2541_v48 = vmul.f32 %v3958_v3, %v2527_v12  ;;  %4128 = vmatprep.subr.bf16.mxu1 %v4581_v54  ;;  %4168 = vmatprep.subr.bf16.mxu0 %v4582_v62 }
 0xce5   : > { %v2540_v60 = vmul.f32 %v3958_v3, %v2526_v59  ;;  %4129 = vmatpush3.bf16.msra.mxu1 %v4583_v28  ;;  %v4605_v3 = vld [vmem:[%s6597_s11 + $0x48] sm:$0xff]  }
 0xce6   : > { %v2555_v35 = vadd.f32 %v3959_v40, %v2541_v48  ;;  %4130 = vmatprep.subr.bf16.mxu1 %v4585_v26 }
 0xce7   : > { %v2554_v32 = vadd.f32 %v3959_v40, %v2540_v60  ;;  %v2592_v40 = vld [vmem:[%s6596_s10] sm:$0xf] }
 0xce8   : > { %v6185_v2 = vrot.slane %v2592_v40, %v6636_v34  ;;  %v6189_v49 = vrot.slane %v2592_v40, %v6637_v14  ;;  %v6193_v41 = vrot.slane %v2592_v40, %v6638_v25  ;;  %v6195_v4 = vrot.slane %v2592_v40, %v2608_v0 }
 0xce9   : > { %v2559_v43 = vpack.c.bf16 %v2555_v35, %v2554_v32  ;;  %4131 = vmatpush3.bf16.msra.mxu1 %v4587_v11 }
 0xcea   : > { %2827 = vmatmul.mubr.bf16.gmra.mxu1 %v2558_v56  ;;  %2900 = vmatmul.mubr.bf16.gmra.mxu0 %v2558_v56 }
 0xceb   : > { %2836 = vmatprep.mubr.bf16.mxu1 %v6635_v1  ;;  %2909 = vmatprep.mubr.bf16.mxu0 %v6635_v1  ;;  %v4584_v1 = vld [vmem:[%s6597_s11 + $0xb8] sm:$0xff]  }
 0xcec   : > { %4169 = vmatpush3.bf16.msra.mxu0 %v4584_v1  ;;  %4132 = vmatprep.subr.bf16.mxu1 %v4589_v9 }
 0xced   : > { %4170 = vmatprep.subr.bf16.mxu0 %v4586_v15  ;;  %4133 = vmatpush3.bf16.msra.mxu1 %v4591_v20 }
 0xcee   : > { %4134 = vmatprep.subr.bf16.mxu1 %v4593_v51 }
 0xcf0   : > { %4171 = vmatpush3.bf16.msra.mxu0 %v4588_v29 }
 0xcf1   : > { %4172 = vmatprep.subr.bf16.mxu0 %v4590_v44  ;;  %4135 = vmatpush3.bf16.msra.mxu1 %v4595_v39 }
 0xcf2   : > { %2837 = vmatmul.mubr.bf16.gmra.mxu1 %v2559_v43  ;;  %2910 = vmatmul.mubr.bf16.gmra.mxu0 %v2559_v43 }
 0xcf3   : > { %4136 = vmatprep.subr.bf16.mxu1 %v4597_v52 }
 0xcf4   : > { %4173 = vmatpush3.bf16.msra.mxu0 %v4592_v16 }
 0xcf5   : > { %4174 = vmatprep.subr.bf16.mxu0 %v4594_v57  ;;  %4137 = vmatpush3.bf16.msra.mxu1 %v4599_v38 }
 0xcf6   : > { %4138 = vmatprep.subr.bf16.mxu1 %v4601_v33 }
 0xcf8   : > { %4175 = vmatpush3.bf16.msra.mxu0 %v4596_v50 }
 0xcf9   : > { %4176 = vmatprep.subr.bf16.mxu0 %v4598_v42  ;;  %4139 = vmatpush3.bf16.msra.mxu1 %v4603_v61 }
 0xcfa   : > { %4140 = vmatprep.subr.bf16.mxu1 %v4605_v3 }
 0xcfc   : > { %4177 = vmatpush3.bf16.msra.mxu0 %v4600_v45 }
 0xcfd   : > { %4178 = vmatprep.subr.bf16.mxu0 %v4602_v10  ;;  %4141 = vmatpush3.bf16.msra.mxu1 %v4607_v37 }
 0xcfe   : > { %4142 = vmatprep.subr.bf16.mxu1 %v4609_v36 }
 0xd00   : > { %4179 = vmatpush3.bf16.msra.mxu0 %v4604_v53 }
 0xd01   : > { %4180 = vmatprep.subr.bf16.mxu0 %v4606_v17  ;;  %4143 = vmatpush3.bf16.msra.mxu1 %v4611_v55 }
 0xd04   : > { %4181 = vmatpush3.bf16.msra.mxu0 %v4608_v19 }
 0xd05   : > { %4182 = vmatprep.subr.bf16.mxu0 %v4610_v63 }
 0xd08   : > { %4183 = vmatpush3.bf16.msra.mxu0 %v4612_v46 }
 0xd9a   : > { %v2808_v47 = vpop.f32.mrf.mxu1  ;;  %v2881_v8 = vpop.f32.mrf.mxu0 }
 0xd9b   : > { %v6198_v24 = vadd.f32 %v2808_v47, %v6185_v2  ;;  %v6201_v22 = vadd.f32 %v2881_v8, %v6189_v49 }
 0xd9c   : > { %v2810_v21 = vpop.f32.mrf.mxu1  ;;  %v2883_v31 = vpop.f32.mrf.mxu0 }
 0xd9d   : > { %v2920_v7 = vmul.f32 %v6198_v24, %v6198_v24  ;;  %v2922_v18 = vmul.f32 %v6201_v22, %v6201_v22  ;;  %v6208_v13 = vadd.f32 %v2810_v21, %v6193_v41  ;;  %v6211_v30 = vadd.f32 %v2883_v31, %v6195_v4 }
 0xd9e   : > { %v2812_v58 = vpop.f32.mrf.mxu1  ;;  %v2885_v5 = vpop.f32.mrf.mxu0 }
 0xd9f   : > { %v2952_v6 = vmul.f32 %v2920_v7, %v6198_v24  ;;  %v2954_v27 = vmul.f32 %v2922_v18, %v6201_v22  ;;  %v2921_v12 = vmul.f32 %v6208_v13, %v6208_v13  ;;  %v2923_v23 = vmul.f32 %v6211_v30, %v6211_v30 }
 0xda0   : > { %v6220_v59 = vadd.f32 %v2812_v58, %v6185_v2  ;;  %v6223_v56 = vadd.f32 %v2885_v5, %v6189_v49  ;;  %v2814_v48 = vpop.f32.mrf.mxu1  ;;  %v2887_v60 = vpop.f32.mrf.mxu0 }
 0xda1   : > { %v2984_v35 = vmul.f32 0.044715, %v2952_v6  ;;  %v2986_v32 = vmul.f32 0.044715, %v2954_v27  ;;  %v2953_v43 = vmul.f32 %v2921_v12, %v6208_v13  ;;  %v2955_v54 = vmul.f32 %v2923_v23, %v6211_v30 }
 0xda2   : > { %v2924_v62 = vmul.f32 %v6220_v59, %v6220_v59  ;;  %v2926_v28 = vmul.f32 %v6223_v56, %v6223_v56  ;;  %v6232_v1 = vadd.f32 %v2814_v48, %v6193_v41  ;;  %v6235_v26 = vadd.f32 %v2887_v60, %v6195_v4  ;;  %v2818_v15 = vpop.f32.mrf.mxu1  ;;  %v2891_v11 = vpop.f32.mrf.mxu0 }
 0xda3   : > { %v3016_v29 = vadd.f32 %v2984_v35, %v6198_v24  ;;  %v3018_v9 = vadd.f32 %v2986_v32, %v6201_v22  ;;  %v2985_v44 = vmul.f32 0.044715, %v2953_v43  ;;  %v2987_v20 = vmul.f32 0.044715, %v2955_v54 }
 0xda4   : > { %v2956_v16 = vmul.f32 %v2924_v62, %v6220_v59  ;;  %v2958_v51 = vmul.f32 %v2926_v28, %v6223_v56  ;;  %v2925_v57 = vmul.f32 %v6232_v1, %v6232_v1  ;;  %v2927_v39 = vmul.f32 %v6235_v26, %v6235_v26  ;;  %v2820_v45 = vpop.f32.mrf.mxu1  ;;  %v2893_v3 = vpop.f32.mrf.mxu0 }
 0xda5   : > { %v3048_v50 = vmul.f32 0.7978846, %v3016_v29  ;;  %v3050_v52 = vmul.f32 0.7978846, %v3018_v9  ;;  %v3017_v42 = vadd.f32 %v2985_v44, %v6208_v13  ;;  %v3019_v38 = vadd.f32 %v2987_v20, %v6211_v30 }
 0xda6   : > { %v2988_v33 = vmul.f32 0.044715, %v2956_v16  ;;  %v2990_v10 = vmul.f32 0.044715, %v2958_v51  ;;  %v2957_v61 = vmul.f32 %v2925_v57, %v6232_v1  ;;  %v2959_v53 = vmul.f32 %v2927_v39, %v6235_v26  ;;  %v2822_v34 = vpop.f32.mrf.mxu1  ;;  %v2895_v8 = vpop.f32.mrf.mxu0 }
 0xda7   : > { %4773 = vtanh.f32 %v3048_v50  ;;  %v3049_v17 = vmul.f32 0.7978846, %v3017_v42  ;;  %v3051_v37 = vmul.f32 0.7978846, %v3019_v38  ;;  %v6250_v19 = vadd.f32 %v2818_v15, %v6185_v2 }
 0xda8   : > { %4775 = vtanh.f32 %v3050_v52  ;;  %v3020_v36 = vadd.f32 %v2988_v33, %v6220_v59  ;;  %v3022_v63 = vadd.f32 %v2990_v10, %v6223_v56  ;;  %v2989_v55 = vmul.f32 0.044715, %v2957_v61  ;;  %v2824_v48 = vpop.f32.mrf.mxu1  ;;  %v2897_v43 = vpop.f32.mrf.mxu0 }
 0xda9   : > { %4777 = vtanh.f32 %v3049_v17  ;;  %v2991_v46 = vmul.f32 0.044715, %v2959_v53  ;;  %v2928_v40 = vmul.f32 %v6250_v19, %v6250_v19  ;;  %v6257_v0 = vadd.f32 %v2891_v11, %v6189_v49 }
 0xdaa   : > { %4779 = vtanh.f32 %v3051_v37  ;;  %v3052_v14 = vmul.f32 0.7978846, %v3020_v36  ;;  %v3054_v25 = vmul.f32 0.7978846, %v3022_v63  ;;  %v3021_v47 = vadd.f32 %v2989_v55, %v6232_v1  ;;  %v2828_v57 = vpop.f32.mrf.mxu1  ;;  %v2901_v38 = vpop.f32.mrf.mxu0 }
 0xdab   : > { %v3023_v21 = vadd.f32 %v2991_v46, %v6235_v26  ;;  %v2960_v31 = vmul.f32 %v2928_v40, %v6250_v19  ;;  %v2930_v7 = vmul.f32 %v6257_v0, %v6257_v0  ;;  %v6265_v18 = vadd.f32 %v2820_v45, %v6193_v41 }
 0xdac   : > { %4781 = vtanh.f32 %v3052_v14  ;;  %v3053_v58 = vmul.f32 0.7978846, %v3021_v47  ;;  %v6268_v5 = vadd.f32 %v2893_v3, %v6195_v4  ;;  %v6271_v6 = vadd.f32 %v2822_v34, %v6185_v2  ;;  %v2830_v40 = vpop.f32.mrf.mxu1 }
 0xdad   : > { %4783 = vtanh.f32 %v3054_v25  ;;  %v3055_v27 = vmul.f32 0.7978846, %v3023_v21  ;;  %v2992_v12 = vmul.f32 0.044715, %v2960_v31  ;;  %v2962_v23 = vmul.f32 %v2930_v7, %v6257_v0  ;;  %v2903_v21 = vpop.f32.mrf.mxu0 }
 0xdae   : > { %4785 = vtanh.f32 %v3053_v58  ;;  %v2929_v60 = vmul.f32 %v6265_v18, %v6265_v18  ;;  %v2931_v35 = vmul.f32 %v6268_v5, %v6268_v5  ;;  %v2932_v32 = vmul.f32 %v6271_v6, %v6271_v6 }
 0xdaf   : > { %4787 = vtanh.f32 %v3055_v27  ;;  %v3024_v54 = vadd.f32 %v2992_v12, %v6250_v19  ;;  %v2994_v62 = vmul.f32 0.044715, %v2962_v23  ;;  %v6282_v28 = vadd.f32 %v2895_v8, %v6189_v49 }
 0xdb0   : > { %v2961_v15 = vmul.f32 %v2929_v60, %v6265_v18  ;;  %v2963_v11 = vmul.f32 %v2931_v35, %v6268_v5  ;;  %v2964_v29 = vmul.f32 %v2932_v32, %v6271_v6  ;;  %v6288_v9 = vadd.f32 %v2824_v48, %v6193_v41 }
 0xdb1   : > { %v3056_v44 = vmul.f32 0.7978846, %v3024_v54  ;;  %v3026_v20 = vadd.f32 %v2994_v62, %v6257_v0  ;;  %v2934_v16 = vmul.f32 %v6282_v28, %v6282_v28  ;;  %v6294_v51 = vadd.f32 %v2897_v43, %v6195_v4  ;;  %v2832_v62 = vpop.f32.mrf.mxu1 }
 0xdb2   : > { %v2993_v39 = vmul.f32 0.044715, %v2961_v15  ;;  %v2995_v50 = vmul.f32 0.044715, %v2963_v11  ;;  %v2996_v52 = vmul.f32 0.044715, %v2964_v29  ;;  %v2933_v42 = vmul.f32 %v6288_v9, %v6288_v9 }
 0xdb3   : > { %4789 = vtanh.f32 %v3056_v44  ;;  %v3058_v45 = vmul.f32 0.7978846, %v3026_v20  ;;  %v2966_v33 = vmul.f32 %v2934_v16, %v6282_v28  ;;  %v2935_v10 = vmul.f32 %v6294_v51, %v6294_v51  ;;  %v2905_v20 = vpop.f32.mrf.mxu0 }
 0xdb4   : > { %v4774_v61 = vpop.eup %4773  ;;  %v3025_v53 = vadd.f32 %v2993_v39, %v6265_v18  ;;  %v3027_v3 = vadd.f32 %v2995_v50, %v6268_v5  ;;  %v3028_v17 = vadd.f32 %v2996_v52, %v6271_v6  ;;  %v2965_v37 = vmul.f32 %v2933_v42, %v6288_v9 }
 0xdb5   : > { %v4776_v36 = vpop.eup %4775  ;;  %v3112_v63 = vadd.f32 1.0, %v4774_v61  ;;  %4791 = vtanh.f32 %v3058_v45  ;;  %v2998_v55 = vmul.f32 0.044715, %v2966_v33  ;;  %v2967_v46 = vmul.f32 %v2935_v10, %v6294_v51 }
 0xdb6   : > { %v6306_v34 = vpop.eup %4777  ;;  %v3114_v14 = vadd.f32 1.0, %v4776_v36  ;;  %v3057_v25 = vmul.f32 0.7978846, %v3025_v53  ;;  %v3059_v47 = vmul.f32 0.7978846, %v3027_v3  ;;  %v6309_v8 = vadd.f32 %v2828_v57, %v6185_v2  ;;  %v2834_v53 = vpop.f32.mrf.mxu1 }
 0xdb7   : > { %v6311_v31 = vpop.eup %4779  ;;  %v3144_v7 = vmul.f32 0.5, %v3112_v63  ;;  %v3060_v58 = vmul.f32 0.7978846, %v3028_v17  ;;  %v3030_v27 = vadd.f32 %v2998_v55, %v6282_v28  ;;  %v2997_v12 = vmul.f32 0.044715, %v2965_v37  ;;  %v2907_v37 = vpop.f32.mrf.mxu0 }
 0xdb8   : > { %v3146_v23 = vmul.f32 0.5, %v3114_v14  ;;  %4793 = vtanh.f32 %v3057_v25  ;;  %v2999_v48 = vmul.f32 0.044715, %v2967_v46  ;;  %v2936_v60 = vmul.f32 %v6309_v8, %v6309_v8 }
 0xdb9   : > { %v4782_v35 = vpop.eup %4781  ;;  %v6317_v32 = vmul.f32 %v3144_v7, %v6198_v24  ;;  %4795 = vtanh.f32 %v3059_v47  ;;  %v3062_v43 = vmul.f32 0.7978846, %v3030_v27  ;;  %v3029_v54 = vadd.f32 %v2997_v12, %v6288_v9  ;;  %v2838_v27 = vpop.f32.mrf.mxu1 }
 0xdba   : > { %v4784_v15 = vpop.eup %4783  ;;  %v6321_v11 = vmul.f32 %v3146_v23, %v6201_v22  ;;  %v3116_v29 = vadd.f32 1.0, %v4782_v35  ;;  %4797 = vtanh.f32 %v3060_v58  ;;  %v3031_v44 = vadd.f32 %v2999_v48, %v6294_v51 }
 0xdbb   : > { %v6324_v16 = vpop.eup %4785  ;;  %v3118_v57 = vadd.f32 1.0, %v4784_v15  ;;  %4799 = vtanh.f32 %v3062_v43  ;;  %v3061_v24 = vmul.f32 0.7978846, %v3029_v54  ;;  %v2968_v39 = vmul.f32 %v2936_v60, %v6309_v8  ;;  %v2911_v43 = vpop.f32.mrf.mxu0 }
 0xdbc   : > { %v6327_v50 = vpop.eup %4787  ;;  %v3148_v52 = vmul.f32 0.5, %v3116_v29  ;;  %v3063_v42 = vmul.f32 0.7978846, %v3031_v44  ;;  %v6330_v45 = vadd.f32 %v2901_v38, %v6189_v49  ;;  %v6333_v22 = vadd.f32 %v2830_v40, %v6193_v41 }
 0xdbd   : > { %v3150_v33 = vmul.f32 0.5, %v3118_v57  ;;  %4801 = vtanh.f32 %v3061_v24  ;;  %v3000_v10 = vmul.f32 0.044715, %v2968_v39  ;;  %v6336_v61 = vadd.f32 %v2903_v21, %v6195_v4 }
 0xdbe   : > { %v6339_v3 = vmul.f32 %v3148_v52, %v6220_v59  ;;  %4803 = vtanh.f32 %v3063_v42  ;;  %v2938_v17 = vmul.f32 %v6330_v45, %v6330_v45  ;;  %v2937_v38 = vmul.f32 %v6333_v22, %v6333_v22 }
 0xdbf   : > { %v6346_v36 = vmul.f32 %v3150_v33, %v6223_v56  ;;  %v3032_v63 = vadd.f32 %v3000_v10, %v6309_v8  ;;  %v2939_v55 = vmul.f32 %v6336_v61, %v6336_v61  ;;  %v6352_v46 = vadd.f32 %v2832_v62, %v6185_v2  ;;  %v2840_v10 = vpop.f32.mrf.mxu1 }
 0xdc0   : > { %v6354_v59 = vpop.eup %4789  ;;  %v2970_v14 = vmul.f32 %v2938_v17, %v6330_v45  ;;  %v2969_v25 = vmul.f32 %v2937_v38, %v6333_v22  ;;  %v6361_v56 = vadd.f32 %v2905_v20, %v6189_v49  ;;  %v6373_v35 = vadd.f32 %v2834_v53, %v6193_v41 }
 0xdc1   : > { %v3064_v21 = vmul.f32 0.7978846, %v3032_v63  ;;  %v2971_v7 = vmul.f32 %v2939_v55, %v6336_v61  ;;  %v2940_v58 = vmul.f32 %v6352_v46, %v6352_v46  ;;  %v6377_v15 = vadd.f32 %v2907_v37, %v6195_v4  ;;  %v2913_v55 = vpop.f32.mrf.mxu0 }
 0xdc2   : > { %v6368_v12 = vpop.eup %4791  ;;  %v3002_v23 = vmul.f32 0.044715, %v2970_v14  ;;  %v3001_v48 = vmul.f32 0.044715, %v2969_v25  ;;  %v2942_v60 = vmul.f32 %v6361_v56, %v6361_v56  ;;  %v2941_v57 = vmul.f32 %v6373_v35, %v6373_v35 }
 0xdc3   : > { %4805 = vtanh.f32 %v3064_v21  ;;  %v3003_v54 = vmul.f32 0.044715, %v2971_v7  ;;  %v2972_v62 = vmul.f32 %v2940_v58, %v6352_v46  ;;  %v2943_v42 = vmul.f32 %v6377_v15, %v6377_v15 }
 0xdc4   : > { %v3034_v29 = vadd.f32 %v3002_v23, %v6330_v45  ;;  %v3033_v44 = vadd.f32 %v3001_v48, %v6333_v22  ;;  %v2974_v20 = vmul.f32 %v2942_v60, %v6361_v56  ;;  %v6390_v33 = vadd.f32 %v2838_v27, %v6185_v2 }
 0xdc5   : > { %v6384_v24 = vpop.eup %4793  ;;  %v3035_v39 = vadd.f32 %v3003_v54, %v6336_v61  ;;  %v3004_v52 = vmul.f32 0.044715, %v2972_v62  ;;  %v2973_v63 = vmul.f32 %v2941_v57, %v6373_v35  ;;  %v2975_v7 = vmul.f32 %v2943_v42, %v6377_v15  ;;  %v2915_v42 = vpop.f32.mrf.mxu0 }
 0xdc6   : > { %6639 = vst [vmem:[#allocation20_spill] sm:$0xff] %v6390_v33  ;;  %v6392_v53 = vpop.eup %4795  ;;  %v3066_v17 = vmul.f32 0.7978846, %v3034_v29  ;;  %v3065_v38 = vmul.f32 0.7978846, %v3033_v44  ;;  %v2944_v58 = vmul.f32 %v6390_v33, %v6390_v33  ;;  %v6405_v60 = vadd.f32 %v2911_v43, %v6189_v49  ;;  %v2842_v44 = vpop.f32.mrf.mxu1 }
 0xdc7   : > { %v3006_v37 = vmul.f32 0.044715, %v2974_v20  ;;  %v6395_v14 = vpop.eup %4797  ;;  %v3067_v25 = vmul.f32 0.7978846, %v3035_v39  ;;  %v3036_v21 = vadd.f32 %v3004_v52, %v6352_v46  ;;  %v3005_v48 = vmul.f32 0.044715, %v2973_v63 }
 0xdc8   : > { %v6401_v27 = vpop.eup %4799  ;;  %4807 = vtanh.f32 %v3066_v17  ;;  %6640 = vst [vmem:[#allocation21_spill] sm:$0xff] %v6405_v60  ;;  %v3007_v62 = vmul.f32 0.044715, %v2975_v7  ;;  %v2976_v29 = vmul.f32 %v2944_v58, %v6390_v33  ;;  %v2946_v52 = vmul.f32 %v6405_v60, %v6405_v60 }
 0xdc9   : > { %v3038_v23 = vadd.f32 %v3006_v37, %v6361_v56  ;;  %4809 = vtanh.f32 %v3065_v38  ;;  %v3068_v54 = vmul.f32 0.7978846, %v3036_v21  ;;  %v3037_v39 = vadd.f32 %v3005_v48, %v6373_v35 }
 0xdca   : > { %v6408_v20 = vpop.eup %4801  ;;  %4811 = vtanh.f32 %v3067_v25  ;;  %v3039_v43 = vadd.f32 %v3007_v62, %v6377_v15  ;;  %v3008_v38 = vmul.f32 0.044715, %v2976_v29  ;;  %v6417_v37 = vadd.f32 %v2840_v10, %v6193_v41 }
 0xdcb   : > { %v3070_v57 = vmul.f32 0.7978846, %v3038_v23  ;;  %v6413_v17 = vpop.eup %4803  ;;  %4813 = vtanh.f32 %v3068_v54  ;;  %v3069_v63 = vmul.f32 0.7978846, %v3037_v39  ;;  %v2978_v25 = vmul.f32 %v2946_v52, %v6405_v60  ;;  %v2844_v54 = vpop.f32.mrf.mxu1 }
 0xdcc   : > { %v6421_v21 = vadd.f32 %v2913_v55, %v6195_v4  ;;  %v3071_v7 = vmul.f32 0.7978846, %v3039_v43  ;;  %v3040_v58 = vadd.f32 %v3008_v38, %v6390_v33  ;;  %v2945_v23 = vmul.f32 %v6417_v37, %v6417_v37  ;;  %v2917_v55 = vpop.f32.mrf.mxu0 }
 0xdcd   : > { %4815 = vtanh.f32 %v3070_v57  ;;  %v6427_v48 = vadd.f32 %v2842_v44, %v6185_v2  ;;  %v3010_v10 = vmul.f32 0.044715, %v2978_v25  ;;  %v6432_v29 = vadd.f32 %v2915_v42, %v6189_v49 }
 0xdce   : > { %4817 = vtanh.f32 %v3069_v63  ;;  %v2947_v62 = vmul.f32 %v6421_v21, %v6421_v21  ;;  %v3072_v57 = vmul.f32 0.7978846, %v3040_v58  ;;  %v2977_v39 = vmul.f32 %v2945_v23, %v6417_v37 }
 0xdcf   : > { %4819 = vtanh.f32 %v3071_v7  ;;  %v2948_v52 = vmul.f32 %v6427_v48, %v6427_v48  ;;  %v3042_v2 = vadd.f32 %v3010_v10, %v6405_v60  ;;  %v2950_v38 = vmul.f32 %v6432_v29, %v6432_v29 }
 0xdd0   : > { %v6437_v43 = vpop.eup %4805  ;;  %v2979_v44 = vmul.f32 %v2947_v62, %v6421_v21  ;;  %v6444_v49 = vadd.f32 %v2844_v54, %v6193_v41  ;;  %4821 = vtanh.f32 %v3072_v57  ;;  %v3009_v42 = vmul.f32 0.044715, %v2977_v39 }
 0xdd1   : > { %v2980_v63 = vmul.f32 %v2948_v52, %v6427_v48  ;;  %v6448_v25 = vadd.f32 %v2917_v55, %v6195_v4  ;;  %v3074_v7 = vmul.f32 0.7978846, %v3042_v2  ;;  %v2982_v23 = vmul.f32 %v2950_v38, %v6432_v29 }
 0xdd2   : > { %v3011_v58 = vmul.f32 0.044715, %v2979_v44  ;;  %v2949_v10 = vmul.f32 %v6444_v49, %v6444_v49  ;;  %v3041_v62 = vadd.f32 %v3009_v42, %v6417_v37  ;;  %v3113_v54 = vadd.f32 1.0, %v6306_v34 }
 0xdd3   : > { %v3012_v47 = vmul.f32 0.044715, %v2980_v63  ;;  %v2951_v41 = vmul.f32 %v6448_v25, %v6448_v25  ;;  %4823 = vtanh.f32 %v3074_v7  ;;  %v3014_v4 = vmul.f32 0.044715, %v2982_v23 }
 0xdd4   : > { %v3043_v57 = vadd.f32 %v3011_v58, %v6421_v21  ;;  %v2981_v55 = vmul.f32 %v2949_v10, %v6444_v49  ;;  %v3073_v52 = vmul.f32 0.7978846, %v3041_v62  ;;  %v3117_v38 = vadd.f32 1.0, %v6324_v16 }
 0xdd5   : > { %v6459_v39 = vpop.eup %4807  ;;  %v3044_v2 = vadd.f32 %v3012_v47, %v6427_v48  ;;  %v2983_v44 = vmul.f32 %v2951_v41, %v6448_v25  ;;  %v3046_v40 = vadd.f32 %v3014_v4, %v6432_v29  ;;  %v3145_v7 = vmul.f32 0.5, %v3113_v54 }
 0xdd6   : > { %v4810_v42 = vpop.eup %4809  ;;  %v3075_v63 = vmul.f32 0.7978846, %v3043_v57  ;;  %v3013_v34 = vmul.f32 0.044715, %v2981_v55  ;;  %4825 = vtanh.f32 %v3073_v52  ;;  %v3149_v10 = vmul.f32 0.5, %v3117_v38 }
 0xdd7   : > { %v6465_v60 = vpop.eup %4811  ;;  %v3076_v58 = vmul.f32 0.7978846, %v3044_v2  ;;  %v3015_v23 = vmul.f32 0.044715, %v2983_v44  ;;  %v3078_v47 = vmul.f32 0.7978846, %v3046_v40  ;;  %v3177_v16 = vmul.f32 %v3145_v7, %v6208_v13 }
 0xdd8   : > { %v6467_v33 = vpop.eup %4813  ;;  %4827 = vtanh.f32 %v3075_v63  ;;  %v3045_v62 = vadd.f32 %v3013_v34, %v6444_v49  ;;  %v3181_v54 = vmul.f32 %v3149_v10, %v6232_v1  ;;  %v3115_v4 = vadd.f32 1.0, %v6311_v31 }
 0xdd9   : > { %4829 = vtanh.f32 %v3076_v58  ;;  %v3047_v57 = vadd.f32 %v3015_v23, %v6448_v25  ;;  %v3119_v52 = vadd.f32 1.0, %v6327_v50  ;;  %v3121_v2 = vadd.f32 1.0, %v6384_v24 }
 0xdda   : > { %v6471_v41 = vpop.eup %4815  ;;  %4831 = vtanh.f32 %v3078_v47  ;;  %v3077_v55 = vmul.f32 0.7978846, %v3045_v62  ;;  %v3209_v38 = vpack.c.bf16 %v3181_v54, %v3177_v16  ;;  %v3147_v63 = vmul.f32 0.5, %v3115_v4 }
 0xddb   : > { %v4818_v40 = vpop.eup %4817  ;;  %v3079_v44 = vmul.f32 0.7978846, %v3047_v57  ;;  %v3125_v13 = vadd.f32 1.0, %v6408_v20  ;;  %v3151_v7 = vmul.f32 0.5, %v3119_v52  ;;  %v3153_v58 = vmul.f32 0.5, %v3121_v2 }
 0xddc   : > { %v4820_v34 = vpop.eup %4819  ;;  %4833 = vtanh.f32 %v3077_v55  ;;  %v3123_v1 = vadd.f32 1.0, %v6392_v53  ;;  %3519 = vmatprep.mubr.bf16.mxu1 %v3209_v38  ;;  %v3179_v31 = vmul.f32 %v3147_v63, %v6211_v30  ;;  %v3127_v50 = vadd.f32 1.0, %v6413_v17 }
 0xddd   : > { %4835 = vtanh.f32 %v3079_v44  ;;  %v3157_v23 = vmul.f32 0.5, %v3125_v13  ;;  %v6482_v24 = vpop.eup %4821  ;;  %v3183_v10 = vmul.f32 %v3151_v7, %v6235_v26  ;;  %v6641_v20 = vpack.c.bf16 %v6339_v3, %v6317_v32 }
 0xdde   : > { %v3185_v47 = vmul.f32 %v3153_v58, %v6265_v18  ;;  %v3155_v62 = vmul.f32 0.5, %v3123_v1  ;;  %v3120_v53 = vadd.f32 1.0, %v6354_v59  ;;  %v3159_v57 = vmul.f32 0.5, %v3127_v50 }
 0xddf   : > { %3520 = vmatmul.mubr.bf16.vlgmr.msra.gmra.mxu1 %v6641_v20  ;;  %v3189_v16 = vmul.f32 %v3157_v23, %v6288_v9  ;;  %v3124_v30 = vadd.f32 1.0, %v6395_v14  ;;  %v3122_v17 = vadd.f32 1.0, %v6368_v12  ;;  %v3211_v54 = vpack.c.bf16 %v3183_v10, %v3179_v31 }
 0xde0   : > { %v3187_v4 = vmul.f32 %v3155_v62, %v6268_v5  ;;  %v3152_v26 = vmul.f32 0.5, %v3120_v53  ;;  %v3126_v55 = vadd.f32 1.0, %v6401_v27  ;;  %v6495_v32 = vpop.eup %4823  ;;  %v3191_v18 = vmul.f32 %v3159_v57, %v6294_v51 }
 0xde1   : > { %v3213_v3 = vpack.c.bf16 %v3189_v16, %v3185_v47  ;;  %v3156_v52 = vmul.f32 0.5, %v3124_v30  ;;  %v3154_v59 = vmul.f32 0.5, %v3122_v17  ;;  %3584 = vmatprep.mubr.bf16.mxu0 %v3211_v54  ;;  %v3129_v14 = vadd.f32 1.0, %v4810_v42 }
 0xde2   : > { %v3184_v9 = vmul.f32 %v3152_v26, %v6250_v19  ;;  %v3158_v2 = vmul.f32 0.5, %v3126_v55  ;;  %v3133_v44 = vadd.f32 1.0, %v4818_v40  ;;  %v6642_v12 = vpack.c.bf16 %v6346_v36, %v6321_v11 }
 0xde3   : > { %3527 = vmatprep.mubr.bf16.mxu1 %v3213_v3  ;;  %v3215_v5 = vpack.c.bf16 %v3191_v18, %v3187_v4  ;;  %v3188_v27 = vmul.f32 %v3156_v52, %v6271_v6  ;;  %v3186_v38 = vmul.f32 %v3154_v59, %v6257_v0  ;;  %v3131_v51 = vadd.f32 1.0, %v6465_v60  ;;  %v4826_v63 = vpop.eup %4825 }
 0xde4   : > { %3585 = vmatmul.mubr.bf16.vlgmr.msra.gmra.mxu0 %v6642_v12  ;;  %v3190_v13 = vmul.f32 %v3158_v2, %v6282_v28  ;;  %v3161_v7 = vmul.f32 0.5, %v3129_v14  ;;  %v3165_v19 = vmul.f32 0.5, %v3133_v44  ;;  %v3135_v58 = vadd.f32 1.0, %v4820_v34 }
 0xde5   : > { %v4828_v42 = vpop.eup %4827  ;;  %3592 = vmatprep.mubr.bf16.mxu0 %v3215_v5  ;;  %v3212_v40 = vpack.c.bf16 %v3188_v27, %v3184_v9  ;;  %v3163_v1 = vmul.f32 0.5, %v3131_v51  ;;  %v3128_v11 = vadd.f32 1.0, %v6437_v43  ;;  %v3132_v36 = vadd.f32 1.0, %v6467_v33 }
 0xde6   : > { %v4830_v31 = vpop.eup %4829  ;;  %v3214_v6 = vpack.c.bf16 %v3190_v13, %v3186_v38  ;;  %v3193_v0 = vmul.f32 %v3161_v7, %v6333_v22  ;;  %v3197_v60 = vmul.f32 %v3165_v19, %v6373_v35  ;;  %v3167_v23 = vmul.f32 0.5, %v3135_v58  ;;  %v6528_v58 = vld [vmem:[#allocation11] ss:$0 sm:$0xff] }
 0xde7   : > { %v4832_v50 = vpop.eup %4831  ;;  %3528 = vmatmul.mubr.bf16.gmra.mxu1 %v3212_v40  ;;  %v3195_v28 = vmul.f32 %v3163_v1, %v6336_v61  ;;  %v3160_v34 = vmul.f32 0.5, %v3128_v11  ;;  %v3164_v10 = vmul.f32 0.5, %v3132_v36  ;;  %v3130_v20 = vadd.f32 1.0, %v6459_v39 }
 0xde8   : > { %v3217_v47 = vpack.c.bf16 %v3197_v60, %v3193_v0  ;;  %v3199_v43 = vmul.f32 %v3167_v23, %v6377_v15  ;;  %v3134_v33 = vadd.f32 1.0, %v6471_v41  ;;  %v3137_v62 = vadd.f32 1.0, %v4826_v63 }
 0xde9   : > { %v4834_v53 = vpop.eup %4833  ;;  %v3192_v22 = vmul.f32 %v3160_v34, %v6309_v8  ;;  %v3196_v35 = vmul.f32 %v3164_v10, %v6352_v46  ;;  %v3162_v16 = vmul.f32 0.5, %v3130_v20  ;;  %v3139_v57 = vadd.f32 1.0, %v4828_v42  ;;  %v4837_v34 = vld [vmem:[%s5266_s22 + $0x40] sm:$0xff] }
 0xdea   : > { %v4836_v30 = vpop.eup %4835  ;;  %3535 = vmatprep.mubr.bf16.mxu1 %v3217_v47  ;;  %v3219_v61 = vpack.c.bf16 %v3199_v43, %v3195_v28  ;;  %v3166_v17 = vmul.f32 0.5, %v3134_v33  ;;  %v3141_v54 = vadd.f32 1.0, %v4834_v53  ;;  %v3169_v4 = vmul.f32 0.5, %v3137_v62 }
 0xdeb   : > { %v3143_v39 = vadd.f32 1.0, %v4836_v30  ;;  %v3171_v26 = vmul.f32 0.5, %v3139_v57  ;;  %v3216_v15 = vpack.c.bf16 %v3196_v35, %v3192_v22  ;;  %v3136_v55 = vadd.f32 1.0, %v6482_v24 }
 0xdec   : > { %3593 = vmatmul.mubr.bf16.gmra.mxu0 %v3214_v6  ;;  %v3173_v41 = vmul.f32 0.5, %v3141_v54  ;;  %v3194_v8 = vmul.f32 %v3162_v16, %v6330_v45  ;;  %v3198_v46 = vmul.f32 %v3166_v17, %v6361_v56  ;;  %v3140_v18 = vadd.f32 1.0, %v4830_v31  ;;  %v4838_v16 = vld [vmem:[%s5266_s22 + $0x48] sm:$0xff] }
 0xded   : > { %3600 = vmatprep.mubr.bf16.mxu0 %v3219_v61  ;;  %v3175_v3 = vmul.f32 0.5, %v3143_v39  ;;  %v3201_v52 = vmul.f32 %v3169_v4, %v6417_v37  ;;  %v3203_v9 = vmul.f32 %v3171_v26, %v6421_v21  ;;  %v3142_v2 = vadd.f32 1.0, %v4832_v50  ;;  %v6643_v37 = vld [vmem:[#allocation20_spill] sm:$0xff] }
 0xdee   : > { %v3205_v59 = vmul.f32 %v3173_v41, %v6444_v49  ;;  %v3168_v44 = vmul.f32 0.5, %v3136_v55  ;;  %v3172_v12 = vmul.f32 0.5, %v3140_v18  ;;  %v3138_v24 = vadd.f32 1.0, %v6495_v32  ;;  %v4839_v41 = vld [vmem:[%s5266_s22 + $0x50] sm:$0xff] }
 0xdef   : > { %3536 = vmatmul.mubr.bf16.gmra.mxu1 %v3216_v15  ;;  %v3207_v14 = vmul.f32 %v3175_v3, %v6448_v25  ;;  %v3218_v45 = vpack.c.bf16 %v3198_v46, %v3194_v8  ;;  %v3174_v38 = vmul.f32 0.5, %v3142_v2  ;;  %v6644_v25 = vld [vmem:[#allocation21_spill] sm:$0xff] }
 0xdf0   : > { %v3221_v5 = vpack.c.bf16 %v3205_v59, %v3201_v52  ;;  %v3204_v56 = vmul.f32 %v3172_v12, %v6427_v48  ;;  %v3200_v49 = vmul.f32 %v3168_v44, %v6643_v37  ;;  %v3170_v51 = vmul.f32 0.5, %v3138_v24 }
 0xdf1   : > { %v3223_v27 = vpack.c.bf16 %v3207_v14, %v3203_v9  ;;  %v3206_v63 = vmul.f32 %v3174_v38, %v6432_v29  ;;  %v4840_v14 = vld [vmem:[%s5266_s22 + $0x58] sm:$0xff] }
 0xdf2   : > { %3543 = vmatprep.mubr.bf16.mxu1 %v3221_v5  ;;  %v3220_v21 = vpack.c.bf16 %v3204_v56, %v3200_v49  ;;  %v3202_v13 = vmul.f32 %v3170_v51, %v6644_v25  ;;  %v4841_v49 = vld [vmem:[%s5266_s22 + $0x60] sm:$0xff] }
 0xdf4   : > { %3601 = vmatmul.mubr.bf16.gmra.mxu0 %v3218_v45  ;;  %v3222_v7 = vpack.c.bf16 %v3206_v63, %v3202_v13 }
 0xdf5   : > { %3608 = vmatprep.mubr.bf16.mxu0 %v3223_v27 }
 0xdf7   : > { %3544 = vmatmul.mubr.bf16.gmra.mxu1 %v3220_v21 }
 0xdfc   : > { %3609 = vmatmul.mubr.bf16.gmra.mxu0 %v3222_v7 }
 0xe9f   : > { %v4144_v32 = vpop.f32.mrf.mxu1 }
 0xea1   : > { %v4145_v19 = vpop.f32.mrf.mxu1 }
 0xea2   : > { %v4146_v48 = vadd.f32 %v4145_v19, %v4144_v32 }
 0xea3   : > { %v4147_v42 = vpop.f32.mrf.mxu1 }
 0xea4   : > { %v4184_v40 = vpop.f32.mrf.mxu0  ;;  %v3522_v1 = vadd.f32 %v4146_v48, %v6528_v58 }
 0xea5   : > { %v4148_v11 = vpop.f32.mrf.mxu1 }
 0xea6   : > { %v4185_v36 = vpop.f32.mrf.mxu0  ;;  %v4149_v31 = vadd.f32 %v4148_v11, %v4147_v42  ;;  %v4842_v42 = vld [vmem:[%s5266_s22 + $0x68] sm:$0xff] }
 0xea7   : > { %v4186_v29 = vadd.f32 %v4185_v36, %v4184_v40  ;;  %v4150_v0 = vpop.f32.mrf.mxu1 }
 0xea8   : > { %v4187_v6 = vpop.f32.mrf.mxu0  ;;  %v3525_v23 = vadd.f32 %v4149_v31, %v6528_v58 }
 0xea9   : > { %v3587_v60 = vadd.f32 %v4186_v29, %v3522_v1  ;;  %v4151_v28 = vpop.f32.mrf.mxu1 }
 0xeaa   : > { %v4188_v50 = vpop.f32.mrf.mxu0  ;;  %v4152_v47 = vadd.f32 %v4151_v28, %v4150_v0  ;;  %v4843_v0 = vld [vmem:[%s5266_s22 + $0x70] sm:$0xff]  ;;  %v4844_v28 = vld [vmem:[%s5266_s22 + $0x78] sm:$0xff] }
 0xeab   : > { %v3617_v10 = vadd.f32 %v4837_v34, %v3587_v60  ;;  %v4189_v20 = vadd.f32 %v4188_v50, %v4187_v6  ;;  %v4153_v33 = vpop.f32.mrf.mxu1 }
 0xeac   : > { %v4190_v43 = vpop.f32.mrf.mxu0  ;;  %v3530_v53 = vadd.f32 %v4152_v47, %v6528_v58 }
 0xead   : > { %3625 = vst [vmem:[%s5923_s14] sm:$0xff] %v3617_v10  ;;  %v3590_v62 = vadd.f32 %v4189_v20, %v3525_v23  ;;  %v4154_v35 = vpop.f32.mrf.mxu1 }
 0xeae   : > { %v4191_v22 = vpop.f32.mrf.mxu0  ;;  %v4155_v61 = vadd.f32 %v4154_v35, %v4153_v33  ;;  %v3728_v35 = vld [vmem:[%s5923_s14 + $0x48] sm:$0xff] (%p6645_p10) }
 0xeaf   : > { %v3618_v57 = vadd.f32 %v4838_v16, %v3590_v62  ;;  %v4192_v30 = vadd.f32 %v4191_v22, %v4190_v43  ;;  %v4156_v54 = vpop.f32.mrf.mxu1  ;;  %v3726_v22 = vld [vmem:[%s5923_s14 + $0x40] sm:$0xff] (%p6645_p10)  ;;  %v3730_v16 = vld [vmem:[%s5923_s14 + $0x50] sm:$0xff] (%p6645_p10)  ;;  %3729 = vst [vmem:[%s3651_s30 + $0x88] sm:$0xff] (%p6645_p10), %v3728_v35 }
 0xeb0   : > { %v4193_v17 = vpop.f32.mrf.mxu0  ;;  %v3533_v39 = vadd.f32 %v4155_v61, %v6528_v58  ;;  %3727 = vst [vmem:[%s3651_s30 + $0x80] sm:$0xff] (%p6645_p10), %v3726_v22  ;;  %3731 = vst [vmem:[%s3651_s30 + $0x90] sm:$0xff] (%p6645_p10), %v3730_v16  ;;  %v3736_v61 = vld [vmem:[%s5923_s14 + $0x68] sm:$0xff] (%p6645_p10) }
 0xeb1   : > { %3626 = vst [vmem:[%s5923_s14 + $0x8] sm:$0xff] %v3618_v57  ;;  %v3595_v4 = vadd.f32 %v4192_v30, %v3530_v53  ;;  %v4157_v15 = vpop.f32.mrf.mxu1  ;;  %v3732_v57 = vld [vmem:[%s5923_s14 + $0x58] sm:$0xff] (%p6645_p10)  ;;  %v3734_v30 = vld [vmem:[%s5923_s14 + $0x60] sm:$0xff] (%p6645_p10)  ;;  %3737 = vst [vmem:[%s3651_s30 + $0xa8] sm:$0xff] (%p6645_p10), %v3736_v61 }
 0xeb2   : > { %v4194_v26 = vpop.f32.mrf.mxu0  ;;  %v4158_v46 = vadd.f32 %v4157_v15, %v4156_v54  ;;  %3733 = vst [vmem:[%s3651_s30 + $0x98] sm:$0xff] (%p6645_p10), %v3732_v57  ;;  %3735 = vst [vmem:[%s3651_s30 + $0xa0] sm:$0xff] (%p6645_p10), %v3734_v30  ;;  %v3740_v54 = vld [vmem:[%s5923_s14 + $0x78] sm:$0xff] (%p6645_p10) }
 0xeb3   : > { %v3619_v55 = vadd.f32 %v4839_v41, %v3595_v4  ;;  %v4195_v8 = vadd.f32 %v4194_v26, %v4193_v17  ;;  %v4159_v18 = vpop.f32.mrf.mxu1  ;;  %v3738_v17 = vld [vmem:[%s5923_s14 + $0x70] sm:$0xff] (%p6645_p10)  ;;  %3741 = vst [vmem:[%s3651_s30 + $0xb8] sm:$0xff] (%p6645_p10), %v3740_v54 }
 0xeb4   : > { %v4196_v3 = vpop.f32.mrf.mxu0  ;;  %v3538_v59 = vadd.f32 %v4158_v46, %v6528_v58  ;;  %3739 = vst [vmem:[%s3651_s30 + $0xb0] sm:$0xff] (%p6645_p10), %v3738_v17 }
 0xeb5   : > { %3627 = vst [vmem:[%s5923_s14 + $0x10] sm:$0xff] %v3619_v55  ;;  %v3598_v52 = vadd.f32 %v4195_v8, %v3533_v39  ;;  %v4160_v2 = vpop.f32.mrf.mxu1 }
 0xeb6   : > { %v4197_v9 = vpop.f32.mrf.mxu0  ;;  %v4161_v24 = vadd.f32 %v4160_v2, %v4159_v18 }
 0xeb7   : > { %v3620_v44 = vadd.f32 %v4840_v14, %v3598_v52  ;;  %v4198_v12 = vadd.f32 %v4197_v9, %v4196_v3  ;;  %v4162_v45 = vpop.f32.mrf.mxu1 }
 0xeb8   : > { %v4199_v5 = vpop.f32.mrf.mxu0  ;;  %v3541_v56 = vadd.f32 %v4161_v24, %v6528_v58  ;;  %v3712_v10 = vld [vmem:[%s5923_s14 + $0x8] sm:$0xff] (%p6645_p10) }
 0xeb9   : > { %3628 = vst [vmem:[%s5923_s14 + $0x18] sm:$0xff] %v3620_v44  ;;  %v3603_v27 = vadd.f32 %v4198_v12, %v3538_v59  ;;  %v4163_v37 = vpop.f32.mrf.mxu1  ;;  %3713 = vst [vmem:[%s3651_s30 + $0x8] sm:$0xff] (%p6645_p10), %v3712_v10 }
 0xeba   : > { %v4200_v38 = vpop.f32.mrf.mxu0  ;;  %v4164_v63 = vadd.f32 %v4163_v37, %v4162_v45 }
 0xebb   : > { %v3621_v51 = vadd.f32 %v4841_v49, %v3603_v27  ;;  %v4201_v21 = vadd.f32 %v4200_v38, %v4199_v5  ;;  %v4165_v13 = vpop.f32.mrf.mxu1 }
 0xebc   : > { %v4202_v25 = vpop.f32.mrf.mxu0  ;;  %v3546_v32 = vadd.f32 %v4164_v63, %v6528_v58  ;;  %v3714_v20 = vld [vmem:[%s5923_s14 + $0x10] sm:$0xff] (%p6645_p10) }
 0xebd   : > { %3629 = vst [vmem:[%s5923_s14 + $0x20] sm:$0xff] %v3621_v51  ;;  %v3606_v7 = vadd.f32 %v4201_v21, %v3541_v56  ;;  %v4166_v48 = vpop.f32.mrf.mxu1  ;;  %3715 = vst [vmem:[%s3651_s30 + $0x10] sm:$0xff] (%p6645_p10), %v3714_v20 }
 0xebe   : > { %v4203_v19 = vpop.f32.mrf.mxu0  ;;  %v4167_v11 = vadd.f32 %v4166_v48, %v4165_v13 }
 0xebf   : > { %v3622_v40 = vadd.f32 %v4842_v42, %v3606_v7  ;;  %v4204_v1 = vadd.f32 %v4203_v19, %v4202_v25 }
 0xec0   : > { %v4205_v36 = vpop.f32.mrf.mxu0  ;;  %v3549_v29 = vadd.f32 %v4167_v11, %v6528_v58  ;;  %v3710_v58 = vld [vmem:[%s5923_s14] sm:$0xff] (%p6645_p10)  ;;  %v3716_v47 = vld [vmem:[%s5923_s14 + $0x18] sm:$0xff] (%p6645_p10) }
 0xec1   : > { %3630 = vst [vmem:[%s5923_s14 + $0x28] sm:$0xff] %v3622_v40  ;;  %v3611_v31 = vadd.f32 %v4204_v1, %v3546_v32  ;;  %3711 = vst [vmem:[%s3651_s30] sm:$0xff] (%p6645_p10), %v3710_v58 }
 0xec2   : > { %v4206_v6 = vpop.f32.mrf.mxu0  ;;  %3717 = vst [vmem:[%s3651_s30 + $0x18] sm:$0xff] (%p6645_p10), %v3716_v47 }
 0xec3   : > { %v3623_v60 = vadd.f32 %v4843_v0, %v3611_v31  ;;  %v4207_v23 = vadd.f32 %v4206_v6, %v4205_v36 }
 0xec4   : > { %v3718_v43 = vld [vmem:[%s5923_s14 + $0x20] sm:$0xff] (%p6645_p10) }
 0xec5   : > { %3631 = vst [vmem:[%s5923_s14 + $0x30] sm:$0xff] %v3623_v60  ;;  %v3614_v50 = vadd.f32 %v4207_v23, %v3549_v29  ;;  %3648 = sbr.rel (!%p6645_p10) target bundleno = 3794 (0xed2), region = 138  ;;  %3719 = vst [vmem:[%s3651_s30 + $0x20] sm:$0xff] (%p6645_p10), %v3718_v43 }
 0xec7   : > { %v3624_v34 = vadd.f32 %v4844_v28, %v3614_v50 }
 0xec8   : > { %v3720_v33 = vld [vmem:[%s5923_s14 + $0x28] sm:$0xff] (%p6645_p10) }
 0xec9   : > { %3632 = vst [vmem:[%s5923_s14 + $0x38] sm:$0xff] %v3624_v34  ;;  %3721 = vst [vmem:[%s3651_s30 + $0x28] sm:$0xff] (%p6645_p10), %v3720_v33 }
 0xecc   : > { %v3722_v62 = vld [vmem:[%s5923_s14 + $0x30] sm:$0xff] }
 0xecd   : > { %3723 = vst [vmem:[%s3651_s30 + $0x30] sm:$0xff] %v3722_v62 }
 0xed0   : > { %v3724_v53 = vld [vmem:[%s5923_s14 + $0x38] sm:$0xff] }
 0xed1   : > { %3725 = vst [vmem:[%s3651_s30 + $0x38] sm:$0xff] %v3724_v53 }
 0xed2 PF: > { %s6647_s27 = sld [smem:[#allocation18_spill]]  ;;  %s6649_s25 = smov %s5035_s26 }
 0xed3   : > { %s6648_s28 = sld [smem:[#allocation19_spill]] }
 0xed8   : > { %p24_p13 = scmp.ge.s32.totalorder %s6647_s27, 4  }
 0xed9   : > { %s6650_s26 = smov %s6648_s28 }
 0xeda   :  { %26 = sbr.rel (!%p24_p13) target bundleno = 9 (0x9), region = 210 }
 0xedf   :  { %3757 = vsyncpa [#allocation4], 1 }
 0xee0   :  { %3759 = vsyncpa [#allocation4 + $0x1], 1 }
 0xee1   :  { %3760 = vsyncpa [#allocation6], 1 }
 0xee2   :  { %3761 = vsyncpa [#allocation9], 1 }
 0xee3   :  { %3762 = vsyncpa [#allocation12], 1 }

</bundles_post_ra>
